<compile_context>
chip_gen: v5e
topology: v5e:2x2
jax: 0.10.0
libtpu: 0.0.40
codegen_flags: <defaults>
</compile_context>

<pallas_src>
import jax
import jax.numpy as jnp
from jax.experimental import pallas as pl
from jax.experimental.pallas import tpu as pltpu


def attention_kernel(ws_ref, uh_ref, xs_ref, mask_ref, wa1_ref, ba1_ref,
                     e_ref, att_ref,
                     acc_scr, den_scr):
    """One (batch-block b, source-chunk l) grid step.

    Grid = (nB, nL); l is the reduction ("arbitrary", last) axis. Unnormalized exp-scores
    go straight into the resident e output block; the exp-sum and the exp-weighted xs_h sum
    are accumulated online; normalization happens once at l == nL - 1.
    """
    l = pl.program_id(1)
    n_l = pl.num_programs(1)

    @pl.when(l == 0)
    def _():
        acc_scr[...] = jnp.zeros_like(acc_scr)
        den_scr[...] = jnp.zeros_like(den_scr)

    # ---- scores for this L chunk; elementwise math in f32 (inputs may be bf16) ----
    uh = uh_ref[...].astype(jnp.float32)                           # (Bt, Lt, A)
    t = jnp.tanh(ws_ref[...][:, None, :] + uh)                     # (Bt, Lt, A)
    score = jnp.sum(t * wa1_ref[...], axis=-1) + ba1_ref[0, 0]     # (Bt, Lt)
    e = jnp.exp(score) * mask_ref[...]                             # (Bt, Lt), unnormalized

    # unnormalized chunk straight into the resident output block (full-width, lane-dense store)
    e_ref[l] = e

    # online accumulation; kernel is HBM-bound so the VPU has slack — stay in f32
    den_scr[...] += jnp.sum(e, axis=-1, keepdims=True)             # (Bt, 1)
    acc_scr[...] += jnp.sum(e[:, :, None] * xs_ref[...].astype(jnp.float32), axis=1)  # (Bt, H)

    # ---- finalize: normalize both outputs once ----
    @pl.when(l == n_l - 1)
    def _():
        inv = pl.reciprocal(den_scr[...], approx=True)             # EUP slot
        inv = inv * (2.0 - den_scr[...] * inv)                     # one Newton step -> ~f32 accuracy
        e_ref[...] = e_ref[...] * inv[None]                        # (nL,Bt,Lt) * (1,Bt,1)
        att_ref[...] = (acc_scr[...] * inv).astype(att_ref.dtype)


def _round_up(x, m):
    return ((x + m - 1) // m) * m


def precompute_uh(xs_h, params, dtype=None):
    """uh = ha(xs_h): decode-step invariant, hoisted out of the per-step kernel.

    Returned batch-major (B, L, A) so the kernel streams lane-dense chunks.
    Pass dtype=jnp.bfloat16 for the production bandwidth-bound path.
    """
    uh = jnp.einsum("lbh,ha->bla", xs_h, params["wha"]) + params["bha"][0]
    return uh if dtype is None else uh.astype(dtype)


def attention_pallas(s_tm1, xs_h, uh, xs_mask, params, *,
                     b_tile=64, l_tile=256, vmem_limit_bytes=None):
    L, B, H = xs_h.shape
    A = params["wsa"].shape[1]
    assert uh.shape == (B, L, A)
    if xs_mask is None:
        xs_mask = jnp.ones((L, B), jnp.float32)

    # lane-dense tiles: L chunks on lanes (multiple of 128), batch on sublanes (multiple of 8)
    l_tile = max(128, min(l_tile, _round_up(L, 128)))
    b_tile = max(8, min(b_tile, _round_up(B, 8)))
    assert l_tile % 128 == 0 and b_tile % 8 == 0

    B_pad = _round_up(B, b_tile)
    L_pad = _round_up(L, l_tile)
    n_b = B_pad // b_tile
    n_l = L_pad // l_tile

    # ---- hoisted per-decode-step projection: ws = sa(s_tm1) (tiny matmul, stays in XLA) ----
    ws = (s_tm1 @ params["wsa"] + params["bsa"][0]).astype(jnp.float32)

    # ---- layout plumbing: batch-major, padded to tile multiples ----
    xs_bl = jnp.transpose(xs_h, (1, 0, 2))                                  # (B, L, H)
    xs_p = jnp.zeros((B_pad, L_pad, H), xs_h.dtype).at[:B, :L].set(xs_bl)
    uh_p = jnp.zeros((B_pad, L_pad, A), uh.dtype).at[:B, :L].set(uh)
    ws_p = jnp.zeros((B_pad, A), jnp.float32).at[:B].set(ws)

    mask_bl = jnp.transpose(xs_mask, (1, 0)).astype(jnp.float32)            # (B, L)
    mask_p = jnp.zeros((B_pad, L_pad), jnp.float32).at[:B, :L].set(mask_bl)
    if B_pad > B:
        # padded batch rows: one unmasked position so their (discarded) rows avoid 0/0 NaNs
        mask_p = mask_p.at[B:, 0].set(1.0)

    if vmem_limit_bytes is None:
        in_bytes = max(jnp.dtype(xs_h.dtype).itemsize, jnp.dtype(uh.dtype).itemsize)
        stream = 2 * b_tile * l_tile * ((A + H) * in_bytes + 4)     # uh + xs + mask, double-buffered
        resident = 2 * b_tile * (n_l * l_tile + H + A) * 4          # e block, attend, ws
        interm = b_tile * l_tile * (A + H) * 4                      # f32 tanh / weighted-sum temps
        est = stream + resident + interm + b_tile * (H + 1) * 4
        # v7x has 64 MiB VMEM/TC (v5e/v6e: 128 MiB) — cap the default; override for bigger tiles.
        vmem_limit_bytes = int(min(max(est * 3 // 2 + (4 << 20), 32 << 20), 64 << 20))

    e_p, att_p = pl.pallas_call(
        attention_kernel,
        out_shape=(
            jax.ShapeDtypeStruct((n_l, B_pad, l_tile), jnp.float32),   # e chunks, lane-dense
            jax.ShapeDtypeStruct((B_pad, H), s_tm1.dtype),             # attend
        ),
        grid_spec=pltpu.PrefetchScalarGridSpec(
            num_scalar_prefetch=0,
            grid=(n_b, n_l),
            in_specs=[
                pl.BlockSpec((b_tile, A), lambda b, l: (b, 0)),              # ws = sa(s_tm1)
                pl.BlockSpec((b_tile, l_tile, A), lambda b, l: (b, l, 0)),   # uh (streamed over L)
                pl.BlockSpec((b_tile, l_tile, H), lambda b, l: (b, l, 0)),   # xs_h (streamed over L)
                pl.BlockSpec((b_tile, l_tile), lambda b, l: (b, l)),         # mask (streamed over L)
                pl.BlockSpec((1, A), lambda b, l: (0, 0)),                   # W_a1 (row vector)
                pl.BlockSpec((1, 1), lambda b, l: (0, 0)),                   # b_a1
            ],
            out_specs=[
                pl.BlockSpec((n_l, b_tile, l_tile), lambda b, l: (0, b, 0)), # e: resident over l
                pl.BlockSpec((b_tile, H), lambda b, l: (b, 0)),              # attend: resident over l
            ],
            scratch_shapes=[
                pltpu.VMEM((b_tile, H), jnp.float32),   # attend accumulator
                pltpu.VMEM((b_tile, 1), jnp.float32),   # exp-sum denominator
            ],
        ),
        compiler_params=pltpu.CompilerParams(
            dimension_semantics=("parallel", "arbitrary"),
            vmem_limit_bytes=vmem_limit_bytes),
    )(ws_p, uh_p, xs_p, mask_p, params["wa1"], params["ba1"])

    # back to the module layout: e_ij (L, B), attend (B, H)
    e_ij = jnp.transpose(e_p, (0, 2, 1)).reshape(L_pad, B_pad)[:L, :B]
    attend = att_p[:B]
    return e_ij, attend


def attention_ref(s_tm1, xs_h, xs_mask, params):
    """Pure-JAX reference mirroring the PyTorch forward."""
    ws = s_tm1 @ params["wsa"] + params["bsa"][0]                        # (B, A)
    uh = jnp.einsum("lbh,ha->lba", xs_h, params["wha"]) + params["bha"][0]
    t = jnp.tanh(ws[None] + uh)                                          # (L, B, A)
    e = jnp.einsum("lba,a->lb", t, params["wa1"][0]) + params["ba1"][0, 0]
    e = jnp.exp(e)
    e = e * xs_mask
    e = e / e.sum(0, keepdims=True)
    attend = (e[..., None] * xs_h).sum(0)
    return e, attend


def init_params(key, dec_hid_size, align_size):
    ks = jax.random.split(key, 6)
    scale_h = 1.0 / jnp.sqrt(dec_hid_size)
    scale_a = 1.0 / jnp.sqrt(align_size)
    return {
        # sa: Linear(dec_hid_size, align_size)
        "wsa": jax.random.uniform(ks[0], (dec_hid_size, align_size), jnp.float32, -scale_h, scale_h),
        "bsa": jax.random.uniform(ks[1], (1, align_size), jnp.float32, -scale_h, scale_h),
        # ha: Linear(dec_hid_size, align_size)  (used only in precompute_uh)
        "wha": jax.random.uniform(ks[2], (dec_hid_size, align_size), jnp.float32, -scale_h, scale_h),
        "bha": jax.random.uniform(ks[3], (1, align_size), jnp.float32, -scale_h, scale_h),
        # a1: Linear(align_size, 1)  (weight stored as (1, align_size) row vector)
        "wa1": jax.random.uniform(ks[4], (1, align_size), jnp.float32, -scale_a, scale_a),
        "ba1": jax.random.uniform(ks[5], (1, 1), jnp.float32, -scale_a, scale_a),
    }


if __name__ == "__main__":
    # src_len, batch, dec_hid_size, align_size.  Small, but lane-dense and sized so the grid
    # has multiple blocks on both axes: grid = (2 batch blocks, 2 L chunks) with b_tile=8,
    # l_tile=128 (production defaults are larger; they are clamped to the padded extents here).
    L, B, H, A = 200, 12, 128, 128

    key = jax.random.PRNGKey(0)
    k_s, k_x, k_p = jax.random.split(key, 3)

    s_tm1 = jax.random.normal(k_s, (B, H), jnp.float32)
    xs_h = jax.random.normal(k_x, (L, B, H), jnp.float32)
    # deterministic padding mask: per-sentence source lengths
    lengths = jnp.array([200, 163, 121, 96, 187, 74, 55, 140, 35, 118, 88, 102], jnp.int32)
    xs_mask = (jnp.arange(L)[:, None] < lengths[None, :]).astype(jnp.float32)

    params = init_params(k_p, H, A)
    e_gold, att_gold = attention_ref(s_tm1, xs_h, xs_mask, params)

    # f32 inputs: tight numeric parity with the reference
    uh32 = precompute_uh(xs_h, params)
    e32, a32 = attention_pallas(s_tm1, xs_h, uh32, xs_mask, params, b_tile=8, l_tile=128)
    jax.block_until_ready((e32, a32))
    assert jnp.allclose(e32, e_gold, atol=1e-4, rtol=1e-4), "e_ij mismatch (f32)"
    assert jnp.allclose(a32, att_gold, atol=1e-4, rtol=1e-4), "attend mismatch (f32)"

    # bf16 streamed inputs (production, HBM-bandwidth-bound path); in-kernel math stays f32
    uh16 = precompute_uh(xs_h, params, dtype=jnp.bfloat16)
    e16, a16 = attention_pallas(s_tm1, xs_h.astype(jnp.bfloat16), uh16, xs_mask, params,
                                b_tile=8, l_tile=128)
    jax.block_until_ready((e16, a16))
    assert jnp.allclose(e16, e_gold, atol=2e-2, rtol=2e-2), "e_ij mismatch (bf16)"
    assert jnp.allclose(a16, att_gold, atol=2e-2, rtol=2e-2), "attend mismatch (bf16)"

    print("KERNEL_OK")
</pallas_src>

<mosaic_0001>
module attributes {stable_mosaic.version = 11 : i64} {
  func.func @attention_kernel(%arg0: i32, %arg1: i32, %arg2: memref<8x128xf32, #tpu.memory_space<vmem>>, %arg3: memref<8x128x128xf32, #tpu.memory_space<vmem>>, %arg4: memref<8x128x128xf32, #tpu.memory_space<vmem>>, %arg5: memref<8x128xf32, #tpu.memory_space<vmem>>, %arg6: memref<1x128xf32, #tpu.memory_space<vmem>>, %arg7: memref<1x1xf32, #tpu.memory_space<vmem>>, %arg8: memref<2x8x128xf32, #tpu.memory_space<vmem>>, %arg9: memref<8x128xf32, #tpu.memory_space<vmem>>, %arg10: memref<8x128xf32, #tpu.memory_space<vmem>>, %arg11: memref<8x1xf32, #tpu.memory_space<vmem>>) attributes {dimension_semantics = [#tpu.dimension_semantics<parallel>, #tpu.dimension_semantics<arbitrary>], iteration_bounds = array<i64: 2, 2>, scalar_prefetch = 0 : i64, scratch_operands = 2 : i64, tpu.core_type = #tpu.core_type<tc>, window_params = [{transform_indices = @transform_0, window_bounds = array<i64: 8, 128>}, {transform_indices = @transform_1, window_bounds = array<i64: 8, 128, 128>}, {transform_indices = @transform_2, window_bounds = array<i64: 8, 128, 128>}, {transform_indices = @transform_3, window_bounds = array<i64: 8, 128>}, {pipeline_mode = #tpu.pipeline_mode<synchronous>, transform_indices = @transform_4, window_bounds = array<i64: 1, 128>}, {pipeline_mode = #tpu.pipeline_mode<synchronous>, transform_indices = @transform_5, window_bounds = array<i64: 1, 1>}, {transform_indices = @transform_6, window_bounds = array<i64: 2, 8, 128>}, {transform_indices = @transform_7, window_bounds = array<i64: 8, 128>}]} {
    %c0_i32 = arith.constant 0 : i32
    %0 = arith.cmpi eq, %arg1, %c0_i32 : i32
    %1 = arith.extui %0 : i1 to i32
    %c0_i32_0 = arith.constant 0 : i32
    %2 = arith.cmpi ne, %1, %c0_i32_0 : i32
    scf.if %2 {
      %cst_27 = arith.constant 0.000000e+00 : f32
      %41 = vector.broadcast %cst_27 : f32 to vector<8x128xf32>
      %c0_28 = arith.constant 0 : index
      %c0_29 = arith.constant 0 : index
      %42 = vector.load %arg10[%c0_28, %c0_29] : memref<8x128xf32, #tpu.memory_space<vmem>>, vector<8x128xf32>
      tpu.vector_store %arg10[%c0_28, %c0_29], %41 {strides = array<i32>} : memref<8x128xf32, #tpu.memory_space<vmem>>, vector<8x128xf32>,
      %cst_30 = arith.constant 0.000000e+00 : f32
      %43 = vector.broadcast %cst_30 : f32 to vector<8x1xf32>
      %c0_31 = arith.constant 0 : index
      %c0_32 = arith.constant 0 : index
      %44 = vector.load %arg11[%c0_31, %c0_32] : memref<8x1xf32, #tpu.memory_space<vmem>>, vector<8x1xf32>
      tpu.vector_store %arg11[%c0_31, %c0_32], %43 {strides = array<i32>} : memref<8x1xf32, #tpu.memory_space<vmem>>, vector<8x1xf32>,
    } else {
    }
    %c0 = arith.constant 0 : index
    %c0_1 = arith.constant 0 : index
    %c0_2 = arith.constant 0 : index
    %3 = vector.load %arg3[%c0, %c0_1, %c0_2] : memref<8x128x128xf32, #tpu.memory_space<vmem>>, vector<8x128x128xf32>
    %c0_3 = arith.constant 0 : index
    %c0_4 = arith.constant 0 : index
    %4 = vector.load %arg2[%c0_3, %c0_4] : memref<8x128xf32, #tpu.memory_space<vmem>>, vector<8x128xf32>
    %5 = vector.shape_cast %4 : vector<8x128xf32> to vector<8x1x128xf32>
    %6 = vector.broadcast %5 : vector<8x1x128xf32> to vector<8x128x128xf32>
    %7 = arith.addf %6, %3 : vector<8x128x128xf32>
    %8 = math.tanh %7 : vector<8x128x128xf32>
    %c0_5 = arith.constant 0 : index
    %c0_6 = arith.constant 0 : index
    %9 = vector.load %arg6[%c0_5, %c0_6] : memref<1x128xf32, #tpu.memory_space<vmem>>, vector<1x128xf32>
    %10 = vector.shape_cast %9 : vector<1x128xf32> to vector<1x1x128xf32>
    %11 = vector.broadcast %10 : vector<1x1x128xf32> to vector<8x128x128xf32>
    %12 = arith.mulf %8, %11 : vector<8x128x128xf32>
    %cst = arith.constant dense<0.000000e+00> : vector<8x128xf32>
    %13 = vector.multi_reduction <add>, %12, %cst [2] : vector<8x128x128xf32> to vector<8x128xf32>
    %c0_7 = arith.constant 0 : index
    %c0_8 = arith.constant 0 : index
    %14 = vector.load %arg7[%c0_7, %c0_8] : memref<1x1xf32, #tpu.memory_space<vmem>>, vector<1x1xf32>
    %15 = vector.extract %14[0, 0] : f32 from vector<1x1xf32>
    %16 = vector.broadcast %15 : f32 to vector<8x128xf32>
    %17 = arith.addf %13, %16 : vector<8x128xf32>
    %18 = math.exp %17 : vector<8x128xf32>
    %c0_9 = arith.constant 0 : index
    %c0_10 = arith.constant 0 : index
    %19 = vector.load %arg5[%c0_9, %c0_10] : memref<8x128xf32, #tpu.memory_space<vmem>>, vector<8x128xf32>
    %20 = arith.mulf %18, %19 : vector<8x128xf32>
    %21 = arith.index_cast %arg1 : i32 to index
    %c0_11 = arith.constant 0 : index
    %c0_12 = arith.constant 0 : index
    %22 = vector.load %arg8[%21, %c0_11, %c0_12] : memref<2x8x128xf32, #tpu.memory_space<vmem>>, vector<1x8x128xf32>
    %23 = vector.shape_cast %22 : vector<1x8x128xf32> to vector<8x128xf32>
    %24 = vector.shape_cast %20 : vector<8x128xf32> to vector<1x8x128xf32>
    tpu.vector_store %arg8[%21, %c0_11, %c0_12], %24 {strides = array<i32>} : memref<2x8x128xf32, #tpu.memory_space<vmem>>, vector<1x8x128xf32>,
    %c0_13 = arith.constant 0 : index
    %c0_14 = arith.constant 0 : index
    %25 = vector.load %arg11[%c0_13, %c0_14] : memref<8x1xf32, #tpu.memory_space<vmem>>, vector<8x1xf32>
    %cst_15 = arith.constant dense<0.000000e+00> : vector<8xf32>
    %26 = vector.multi_reduction <add>, %20, %cst_15 [1] : vector<8x128xf32> to vector<8xf32>
    %27 = vector.shape_cast %26 : vector<8xf32> to vector<8x1xf32>
    %28 = arith.addf %25, %27 : vector<8x1xf32>
    %c0_16 = arith.constant 0 : index
    %c0_17 = arith.constant 0 : index
    %29 = vector.load %arg11[%c0_16, %c0_17] : memref<8x1xf32, #tpu.memory_space<vmem>>, vector<8x1xf32>
    tpu.vector_store %arg11[%c0_16, %c0_17], %28 {strides = array<i32>} : memref<8x1xf32, #tpu.memory_space<vmem>>, vector<8x1xf32>,
    %c0_18 = arith.constant 0 : index
    %c0_19 = arith.constant 0 : index
    %30 = vector.load %arg10[%c0_18, %c0_19] : memref<8x128xf32, #tpu.memory_space<vmem>>, vector<8x128xf32>
    %31 = vector.shape_cast %20 : vector<8x128xf32> to vector<8x128x1xf32>
    %c0_20 = arith.constant 0 : index
    %c0_21 = arith.constant 0 : index
    %c0_22 = arith.constant 0 : index
    %32 = vector.load %arg4[%c0_20, %c0_21, %c0_22] : memref<8x128x128xf32, #tpu.memory_space<vmem>>, vector<8x128x128xf32>
    %33 = vector.broadcast %31 : vector<8x128x1xf32> to vector<8x128x128xf32>
    %34 = arith.mulf %33, %32 : vector<8x128x128xf32>
    %cst_23 = arith.constant dense<0.000000e+00> : vector<8x128xf32>
    %35 = vector.multi_reduction <add>, %34, %cst_23 [1] : vector<8x128x128xf32> to vector<8x128xf32>
    %36 = arith.addf %30, %35 : vector<8x128xf32>
    %c0_24 = arith.constant 0 : index
    %c0_25 = arith.constant 0 : index
    %37 = vector.load %arg10[%c0_24, %c0_25] : memref<8x128xf32, #tpu.memory_space<vmem>>, vector<8x128xf32>
    tpu.vector_store %arg10[%c0_24, %c0_25], %36 {strides = array<i32>} : memref<8x128xf32, #tpu.memory_space<vmem>>, vector<8x128xf32>,
    %c1_i32 = arith.constant 1 : i32
    %38 = arith.cmpi eq, %arg1, %c1_i32 : i32
    %39 = arith.extui %38 : i1 to i32
    %c0_i32_26 = arith.constant 0 : i32
    %40 = arith.cmpi ne, %39, %c0_i32_26 : i32
    scf.if %40 {
      %c0_27 = arith.constant 0 : index
      %c0_28 = arith.constant 0 : index
      %41 = vector.load %arg11[%c0_27, %c0_28] : memref<8x1xf32, #tpu.memory_space<vmem>>, vector<8x1xf32>
      %42 = tpu.reciprocal %41 {approx = true} : vector<8x1xf32> -> vector<8x1xf32>
      %c0_29 = arith.constant 0 : index
      %c0_30 = arith.constant 0 : index
      %43 = vector.load %arg11[%c0_29, %c0_30] : memref<8x1xf32, #tpu.memory_space<vmem>>, vector<8x1xf32>
      %44 = arith.mulf %43, %42 : vector<8x1xf32>
      %cst_31 = arith.constant 2.000000e+00 : f32
      %45 = vector.broadcast %cst_31 : f32 to vector<8x1xf32>
      %46 = arith.subf %45, %44 : vector<8x1xf32>
      %47 = arith.mulf %42, %46 : vector<8x1xf32>
      %c0_32 = arith.constant 0 : index
      %c0_33 = arith.constant 0 : index
      %c0_34 = arith.constant 0 : index
      %48 = vector.load %arg8[%c0_32, %c0_33, %c0_34] : memref<2x8x128xf32, #tpu.memory_space<vmem>>, vector<2x8x128xf32>
      %49 = vector.shape_cast %47 : vector<8x1xf32> to vector<1x8x1xf32>
      %50 = vector.broadcast %49 : vector<1x8x1xf32> to vector<2x8x128xf32>
      %51 = arith.mulf %48, %50 : vector<2x8x128xf32>
      %c0_35 = arith.constant 0 : index
      %c0_36 = arith.constant 0 : index
      %c0_37 = arith.constant 0 : index
      %52 = vector.load %arg8[%c0_35, %c0_36, %c0_37] : memref<2x8x128xf32, #tpu.memory_space<vmem>>, vector<2x8x128xf32>
      tpu.vector_store %arg8[%c0_35, %c0_36, %c0_37], %51 {strides = array<i32>} : memref<2x8x128xf32, #tpu.memory_space<vmem>>, vector<2x8x128xf32>,
      %c0_38 = arith.constant 0 : index
      %c0_39 = arith.constant 0 : index
      %53 = vector.load %arg10[%c0_38, %c0_39] : memref<8x128xf32, #tpu.memory_space<vmem>>, vector<8x128xf32>
      %54 = vector.broadcast %47 : vector<8x1xf32> to vector<8x128xf32>
      %55 = arith.mulf %53, %54 : vector<8x128xf32>
      %c0_40 = arith.constant 0 : index
      %c0_41 = arith.constant 0 : index
      %56 = vector.load %arg9[%c0_40, %c0_41] : memref<8x128xf32, #tpu.memory_space<vmem>>, vector<8x128xf32>
      tpu.vector_store %arg9[%c0_40, %c0_41], %55 {strides = array<i32>} : memref<8x128xf32, #tpu.memory_space<vmem>>, vector<8x128xf32>,
    } else {
    }
    return
  }
  func.func @transform_0(%arg0: i32, %arg1: i32) -> (i32, i32) {
    %c0_i32 = arith.constant 0 : i32
    %c0_i32_0 = arith.constant 0 : i32
    return %arg0, %c0_i32 : i32, i32
  }
  func.func @transform_1(%arg0: i32, %arg1: i32) -> (i32, i32, i32) {
    %c0_i32 = arith.constant 0 : i32
    %c0_i32_0 = arith.constant 0 : i32
    return %arg0, %arg1, %c0_i32 : i32, i32, i32
  }
  func.func @transform_2(%arg0: i32, %arg1: i32) -> (i32, i32, i32) {
    %c0_i32 = arith.constant 0 : i32
    %c0_i32_0 = arith.constant 0 : i32
    return %arg0, %arg1, %c0_i32 : i32, i32, i32
  }
  func.func @transform_3(%arg0: i32, %arg1: i32) -> (i32, i32) {
    %c0_i32 = arith.constant 0 : i32
    return %arg0, %arg1 : i32, i32
  }
  func.func @transform_4(%arg0: i32, %arg1: i32) -> (i32, i32) {
    %c0_i32 = arith.constant 0 : i32
    %c0_i32_0 = arith.constant 0 : i32
    %c0_i32_1 = arith.constant 0 : i32
    return %c0_i32, %c0_i32_0 : i32, i32
  }
  func.func @transform_5(%arg0: i32, %arg1: i32) -> (i32, i32) {
    %c0_i32 = arith.constant 0 : i32
    %c0_i32_0 = arith.constant 0 : i32
    %c0_i32_1 = arith.constant 0 : i32
    return %c0_i32, %c0_i32_0 : i32, i32
  }
  func.func @transform_6(%arg0: i32, %arg1: i32) -> (i32, i32, i32) {
    %c0_i32 = arith.constant 0 : i32
    %c0_i32_0 = arith.constant 0 : i32
    %c0_i32_1 = arith.constant 0 : i32
    return %c0_i32, %arg0, %c0_i32_0 : i32, i32, i32
  }
  func.func @transform_7(%arg0: i32, %arg1: i32) -> (i32, i32) {
    %c0_i32 = arith.constant 0 : i32
    %c0_i32_0 = arith.constant 0 : i32
    return %arg0, %c0_i32 : i32, i32
  }
}

</mosaic_0001>

<bundles_post_ra>
// kernel: tpu_custom_call.1
= control target key start
LH: loop header
LB: loop body
LE: loop exit
PB: predicated region body
PF: predicated region fallthrough
CT: control target
= control target key end

     0   :  { %s8089_s0 = inlined_call_operand.hbm [shape: f32[16,128], index: 0, kind: input, shape index: {}]   ;;  %s8090_s1 = inlined_call_operand.hbm [shape: f32[16,256,128], index: 1, kind: input, shape index: {}]   ;;  %s8091_s2 = inlined_call_operand.hbm [shape: f32[16,256,128], index: 2, kind: input, shape index: {}]   ;;  %s8092_s3 = inlined_call_operand.hbm [shape: f32[16,256], index: 3, kind: input, shape index: {}]   ;;  %s8093_s4 = inlined_call_operand.hbm [shape: f32[1,128], index: 4, kind: input, shape index: {}]   ;;  %s8094_s5 = inlined_call_operand.<no memory space> [shape: f32[1,1], index: 5, kind: input, shape index: {}]   ;;  %s8095_s6 = inlined_call_operand.hbm [shape: f32[2,16,128], index: 6, kind: output, shape index: {0}]   ;;  %s8096_s7 = inlined_call_operand.hbm [shape: f32[16,128], index: 7, kind: output, shape index: {1}]  }
   0x1   :  { %8111 = sst [smem:[#allocation161_spill]] %s8089_s0  ;;  %v13_v0 = vstv %s8094_s5 }
   0x2   :  { %8112 = sst [smem:[#allocation162_spill]] %s8090_s1  ;;  %14 = vst [vmem:[#allocation4] sm:$0x1] %v13_v0 }
   0x3   :  { %8113 = sst [smem:[#allocation163_spill]] %s8091_s2 }
   0x4   :  { %8114 = sst [smem:[#allocation164_spill]] %s8093_s4 }
   0x5   :  { %8115 = sst [smem:[#allocation165_spill]] %s8095_s6 }
   0x6   :  { %8116 = sst [smem:[#allocation166_spill]] %s8096_s7 }
   0x7   :  { %15 = vsyncpa [#allocation6], 0 }
   0x8   :  { %17 = vsyncpa [#allocation6 + $0x1], 0 }
   0x9   :  { %18 = vsyncpa [#allocation9], 0 }
   0xa   :  { %20 = vsyncpa [#allocation9 + $0x1], 0 }
   0xb   :  { %21 = vsyncpa [#allocation12], 0 }
   0xc   :  { %23 = vsyncpa [#allocation12 + $0x1], 0 }
   0xd   :  { %24 = vsyncpa [#allocation7], 0 }
   0xe   :  { %26 = vsyncpa [#allocation7 + $0x1], 0 }
   0xf   :  { %27 = vsyncpa [#allocation16], 0 }
  0x10   :  { %29 = vsyncpa [#allocation16 + $0x1], 0  ;;  %s5546_s26 = smov 0   ;;  %s5548_s27 = smov 0  }
  0x11   :  { %s5550_s28 = smov 0   ;;  %s5552_s29 = smov 0  }
  0x12   :  { %s5554_s5 = smov 0   ;;  %s5556_s30 = smov 0  }
  0x13   :  { %s5558_s8 = smov 0   ;;  %s5560_s9 = smov 0  }
  0x14   :  { %s5562_s10 = smov 0   ;;  %s5564_s11 = smov 0  }
  0x15   :  { %s5566_s12 = smov 0  }
  0x16 LB: > { %8117 = sst [smem:[#allocation29_spill]] %s5454_s29  ;;  %s5602_s13 = sadd.s32 4294967295, %s5482_s12   ;;  %s5482_s12 = sphi %s5566_s12, %s35_s12   ;;  %s5478_s11 = sphi %s5564_s11, %s8456_s11   ;;  %s5474_s10 = sphi %s5562_s10, %s8455_s10   ;;  %s5470_s9 = sphi %s5560_s9, %s8454_s9   ;;  %s5466_s8 = sphi %s5558_s8, %s8453_s8   ;;  %s5462_s30 = sphi %s5556_s30, %s8452_s30   ;;  %s5458_s5 = sphi %s5554_s5, %s8451_s5   ;;  %s5454_s29 = sphi %s5552_s29, %s8450_s29   ;;  %s5450_s28 = sphi %s5550_s28, %s8449_s28   ;;  %s5446_s27 = sphi %s5548_s27, %s8448_s27   ;;  %s5442_s26 = sphi %s5546_s26, %s8447_s26  }
  0x17   : > { %s4395_s14 = sadd.s32 4294967294, %s5482_s12   ;;  %s44_s15 = sadd.s32 1, %s5474_s10 }
  0x18   : > { %s47_s16 = sadd.s32 1, %s5478_s11  ;;  %p45_p0 = scmp.ge.s32.totalorder %s44_s15, 2 }
  0x19   : > { %s54_s17 = sadd.s32 1, %s5462_s30  ;;  %p61_p1 = scmp.ne.s32.totalorder %s5462_s30, %s5458_s5 }
  0x1a   : > { %p62_p2 = scmp.eq.s32.totalorder %s5482_s12, 0  ;;  %s8458_s15 = smov (%p45_p0, %s44_s15), 0 }
  0x1b   : > { %8118 = sst [smem:[#allocation30_spill]] %s8458_s15  ;;  %s8460_s16 = smov (!%p45_p0, %s47_s16), %s5478_s11 }
  0x1c   : > { %p5619_p3 = por %p62_p2, %p61_p1  ;;  %p8099_p4 = scmp.ne.s32.totalorder %s5458_s5, %s5454_s29 }
  0x1d   : > { %p49_p5 = scmp.ge.s32.totalorder %s8460_s16, 2  ;;  %p68_p6 = scmp.eq.s32.totalorder %s5602_s13, 0 }
  0x1e   : > { %s78_s19 = ssub.s32 %s5474_s10, %s8458_s15  ;;  %s82_s20 = sadd.s32 1, %s5450_s28 }
  0x1f   : > { %s8462_s16 = smov (%p49_p5, %s8460_s16), 0  ;;  %p5636_p7 = por %p68_p6, %p8099_p4 }
  0x20   : > { %8120 = sst [smem:[#allocation31_spill]] %s8462_s16  ;;  %p89_p8 = scmp.ne.s32.totalorder %s5450_s28, %s5446_s27 }
  0x21   : > { %s8121_s21 = scalar_select %p5636_p7, 1, 0 }
  0x22   : > { %s51_s22 = ssub.s32 %s5478_s11, %s8462_s16  ;;  %p95_p9 = scmp.ne.s32.totalorder %s5446_s27, %s5442_s26 }
  0x23   : > { %p52_p10 = scmp.eq.s32.totalorder %s51_s22, 0  ;;  %s79_s23 = sor.u32 %s78_s19, %s51_s22 }
  0x24   : > { %p80_p11 = scmp.eq.s32.totalorder %s79_s23, 0  ;;  %p5648_p12 = por %p89_p8, %p62_p2 }
  0x25   : > { %s5653_s25 = scalar_select %p52_p10, %s5462_s30, %s54_s17  }
  0x26   : > { %s5656_s15 = scalar_select %p80_p11, %s5450_s28, %s82_s20  }
  0x27   : > { %8123 = sst [smem:[#allocation32_spill]] %s5653_s25  ;;  %p5660_p13 = por %p95_p9, %p68_p6 }
  0x28   : > { %8124 = sst [smem:[#allocation33_spill]] %s5656_s15  ;;  %p217_p0 = scmp.eq.s32.totalorder %s5602_s13, 3 }
  0x29   : > { %p223_p5 = scmp.eq.s32.totalorder %s4395_s14, 3  ;;  %p4396_p4 = scmp.ge.s32.totalorder %s5482_s12, 1 }
  0x2a   : > { %p5669_p7 = por %p217_p0, %p61_p1  ;;  %p256_p2 = scmp.lt.s32.totalorder %s5482_s12, 5 }
  0x2b   : > { %p8128_p8 = scmp.ne.s32.totalorder %s5458_s5, %s5454_s29  ;;  %s8132_s4 = sld [smem:[#allocation164_spill]] }
  0x2c   : > { %s8126_s26 = scalar_select %p5669_p7, 1, 0 }
  0x2d   : > { %p5677_p10 = por %p223_p5, %p8128_p8  ;;  %p5681_p11 = pnand %p4396_p4, %p256_p2 }
  0x2e   : > { %8127 = sst [smem:[#allocation34_spill]] %s8126_s26  ;;  %s5484_s23 = smov [#allocation13]  }
  0x2f   : > { %s8129_s17 = scalar_select %p5677_p10, 1, 0 }
  0x30   : > { %p4469_p1 = pneg %p5681_p11  ;;  %s270_s16 = sshll.u32 %s5484_s23, 4  ;;  %s271_s16 = int_to_ptr.vmem [resolvable:$true] %s270_s16 }
  0x31   : > { %8130 = sst [smem:[#allocation35_spill]] %s8129_s17  ;;  %s268_s14 = sshll.u32 %s8132_s4, 4  ;;  %s269_s14 = int_to_ptr.hbm [resolvable:$true] %s268_s14 }
  0x32   : > { %p4470_p9 = pnand %p4469_p1, %p68_p6  ;;  %p4398_p0 = scmp.ge.s32.totalorder %s5482_s12, 4 }
  0x33   : > { %s284_s25 = sand.u32 (!%p4398_p0), 1, %s5462_s30   ;;  %s4400_s15 = sshll.u32 (!%p4398_p0), %s5478_s11, 3 }
  0x34   : > { %4472 = dma.hbm_to_vmem [thread:$0]  (!%p4470_p9), %s269_s14, 16, %s271_s16, [#allocation12]  }
  0x35   : > { %280 = sbr.rel (%p4398_p0) target bundleno = 99 (0x63), region = 24  ;;  %s4399_s20 = sshll.u32 (!%p4398_p0), %s284_s25, 3 }
  0x36   : > { %s8133_s0 = sld [smem:[#allocation161_spill]] (!%p4398_p0)  ;;  %s288_s23 = scalar_lea.vmem (!%p4398_p0), [#allocation5], %s4399_s20 }
  0x37   : > { %s296_s6 = sshll.u32 (!%p4398_p0), %s288_s23, 4  ;;  %s285_s26 = scalar_lea.sflag (!%p4398_p0), [#allocation6], %s284_s25  ;;  %s297_s6 = int_to_ptr.vmem [resolvable:$true] %s296_s6 }
  0x3c   : > { %s292_s17 = scalar_lea.hbm %s8133_s0, %s4400_s15 }
  0x3d   : > { %s294_s29 = sshll.u32 %s292_s17, 4  ;;  %s295_s29 = int_to_ptr.hbm [resolvable:$true] %s294_s29 }
  0x3e   : > { %4441 = dma.hbm_to_vmem [thread:$0]  (%p5619_p3), %s295_s29, 128, %s297_s6, %s285_s26  }
  0x3f   : > { %s8107_s14 = sand.u32 1, %s5450_s28   ;;  %s4403_s15 = sshll.u32 %s5474_s10, 4 }
  0x40   : > { %s5704_s4 = sshll.u32 %s8107_s14, 10  ;;  %s4435_s17 = sshll.u32 %s5478_s11, 8 }
  0x41   : > { %s5708_s25 = sadd.s32 %s4435_s17, %s4403_s15  ;;  %s307_s6 = scalar_lea.vmem [#allocation8], %s5704_s4 }
  0x42   : > { %s330_s29 = sshll.u32 %s307_s6, 4  ;;  %s4405_s18 = sshll.u32 %s5708_s25, 3  ;;  %s331_s29 = int_to_ptr.vmem [resolvable:$true] %s330_s29 }
  0x43   : > { %s8134_s1 = sld [smem:[#allocation162_spill]]  ;;  %s5485_s23 = smov 4096  }
  0x44   : > { %4443 = sst [smem:[#allocation18]] (%p5648_p12), %s5485_s23  ;;  %s5486_s16 = smov 2048  }
  0x45   : > { %s4442_s14 = scalar_select %p5648_p12, [#allocation0], [#allocation21] }
  0x46   : > { %4444 = sst [smem:[#allocation18 + $0x1]] (%p5648_p12), %s5486_s16  ;;  %s5487_s6 = smov 16  }
  0x47   : > { %s320_s15 = sld [smem:[%s4442_s14]]   ;;  %s5488_s25 = smov 128  }
  0x48   : > { %4445 = sst [smem:[#allocation18 + $0x2]] (%p5648_p12), %s5487_s6  ;;  %s5489_s26 = smov 8  }
  0x49   : > { %s315_s22 = scalar_lea.hbm %s8134_s1, %s4405_s18  ;;  %4446 = sst [smem:[#allocation18 + $0x3]] (%p5648_p12), %s5488_s25 }
  0x4a   : > { %s328_s17 = sshll.u32 %s315_s22, 4  ;;  %4447 = sst [smem:[#allocation18 + $0x4]] (%p5648_p12), %s5488_s25  ;;  %s329_s17 = int_to_ptr.hbm [resolvable:$true] %s328_s17 }
  0x4b   : > { %4448 = sst [smem:[#allocation18 + $0x5]] (%p5648_p12), %s5489_s26  ;;  %s8135_s14 = sand.u32 1, %s5482_s12  }
  0x4c   : > { %s304_s0 = scalar_lea.sflag [#allocation9], %s8135_s14  ;;  %s5490_s22 = smov [#allocation17]  }
  0x4d   : > { %s4406_s20 = sshll.u32 %s320_s15, 26 }
  0x4e   : > { %s4407_s23 = sadd.s32 134217728, %s4406_s20 }
  0x4f   : > { %4449 = dma.general (%p5648_p12), %s329_s17, 16384, %s331_s29, %s304_s0, %s5490_s22, [#allocation18], %s4407_s23, 0  }
  0x50   : > { %s8136_s2 = sld [smem:[#allocation163_spill]]  ;;  %s357_s26 = scalar_lea.vmem [#allocation10], %s5704_s4 }
  0x51   : > { %s4450_s25 = scalar_select %p5648_p12, [#allocation0], [#allocation22] }
  0x52   : > { %s380_s20 = sshll.u32 %s357_s26, 4  ;;  %s5491_s29 = smov 4096   ;;  %s381_s20 = int_to_ptr.vmem [resolvable:$true] %s380_s20 }
  0x53   : > { %s370_s14 = sld [smem:[%s4450_s25]]   ;;  %s5492_s1 = smov 2048  }
  0x54   : > { %4451 = sst [smem:[#allocation20]] (%p5648_p12), %s5491_s29  ;;  %s5493_s17 = smov 16  }
  0x55   : > { %4452 = sst [smem:[#allocation20 + $0x1]] (%p5648_p12), %s5492_s1  ;;  %s5495_s22 = smov 8  }
  0x56   : > { %s365_s6 = scalar_lea.hbm %s8136_s2, %s4405_s18  ;;  %4453 = sst [smem:[#allocation20 + $0x2]] (%p5648_p12), %s5493_s17 }
  0x57   : > { %s378_s15 = sshll.u32 %s365_s6, 4  ;;  %s5494_s18 = smov 128   ;;  %s379_s15 = int_to_ptr.hbm [resolvable:$true] %s378_s15 }
  0x58   : > { %4454 = sst [smem:[#allocation20 + $0x3]] (%p5648_p12), %s5494_s18  ;;  %s5496_s16 = smov [#allocation19]  }
  0x59   : > { %s4413_s23 = sshll.u32 %s370_s14, 26  ;;  %4455 = sst [smem:[#allocation20 + $0x4]] (%p5648_p12), %s5494_s18 }
  0x5a   : > { %s4414_s4 = sadd.s32 134217728, %s4413_s23  ;;  %4456 = sst [smem:[#allocation20 + $0x5]] (%p5648_p12), %s5495_s22 }
  0x5b   : > { %4457 = dma.general (%p5648_p12), %s379_s15, 16384, %s381_s20, %s304_s0, %s5496_s16, [#allocation20], %s4414_s4, 0  }
  0x5c   : > { %s8137_s6 = sand.u32 1, %s5450_s28   ;;  %s4416_s26 = sshll.u32 %s5478_s11, 1 }
  0x5d   : > { %s4415_s25 = sshll.u32 %s8137_s6, 3  ;;  %s411_s29 = sadd.s32 %s5474_s10, %s4416_s26 }
  0x5e   : > { %s407_s1 = scalar_lea.vmem [#allocation11], %s4415_s25  ;;  %s4417_s17 = sshll.u32 %s411_s29, 3 }
  0x5f   : > { %s417_s14 = sshll.u32 %s407_s1, 4  ;;  %s413_s2 = scalar_lea.hbm %s8092_s3, %s4417_s17  ;;  %s418_s14 = int_to_ptr.vmem [resolvable:$true] %s417_s14 }
  0x60   : > { %s415_s22 = sshll.u32 %s413_s2, 4  ;;  %s8138_s0 = sand.u32 1, %s5482_s12   ;;  %s416_s22 = int_to_ptr.hbm [resolvable:$true] %s415_s22 }
  0x61   : > { %s404_s15 = scalar_lea.sflag [#allocation12], %s8138_s0 }
  0x62   : > { %4458 = dma.hbm_to_vmem [thread:$0]  (%p5648_p12), %s416_s22, 128, %s418_s14, %s404_s15  }
  0x63 PF: > { %426 = sbr.rel (%p5681_p11) target bundleno = 2067 (0x813), region = 44 }
  0x68   : > { %s5767_s20 = sand.u32 1, %s5458_s5   ;;  %p8139_p3 = scmp.ne.s32.totalorder %s8121_s21, 0 }
  0x69   : > { %s4419_s4 = sshll.u32 %s5767_s20, 3  ;;  %s429_s16 = scalar_lea.sflag [#allocation6], %s5767_s20 }
  0x6a   : > { %s5771_s6 = scalar_lea.vmem [#allocation5], %s4419_s4 }
  0x6b   : > { %5417 = dma.done.wait (%p8139_p3), %s429_s16, 128  }
  0x6c   : > { %5419 = vsyncadd (%p8139_p3), %s429_s16, 4294967168  ;;  %s438_s2 = sand.u32 1, %s5602_s13   ;;  %s440_s24 = sand.u32 1, %s5446_s27  }
  0x6d   : > { %s4420_s19 = sshll.u32 %s440_s24, 10  ;;  %s439_s25 = scalar_lea.sflag [#allocation9], %s438_s2 }
  0x6e   : > { %s5779_s26 = scalar_lea.vmem [#allocation8], %s4420_s19 }
  0x6f   : > { %5421 = dma.done.wait (%p5660_p13), %s439_s25, 32768  }
  0x70   : > { %5423 = vsyncadd (%p5660_p13), %s439_s25, 4294934528  ;;  %s5785_s29 = sshll.u32 %s440_s24, 3  ;;  %s5787_s21 = scalar_lea.vmem [#allocation10], %s4420_s19 }
  0x71   : > { %s459_s1 = scalar_lea.sflag [#allocation12], %s438_s2  ;;  %s462_s14 = scalar_lea.vmem [#allocation11], %s5785_s29 }
  0x72   : > { %5425 = dma.done.wait (%p5660_p13), %s459_s1, 128  }
  0x73   : > { %5427 = vsyncadd (%p5660_p13), %s459_s1, 4294967168 }
  0x74   : > { %5429 = dma.done.wait (%p68_p6), [#allocation12], 16  }
  0x75   : > { %5431 = vsyncadd (%p68_p6), [#allocation12], 4294967280  ;;  %s4424_s17 = sshll.u32 %s5767_s20, 4  ;;  %s5801_s23 = scalar_lea.vmem [#allocation15], %s4419_s4 }
  0x76   : > { %s5799_s18 = scalar_lea.vmem [#allocation14], %s4424_s17  ;;  %p4426_p4 = scmp.ne.s32.totalorder %s5466_s8, 0 }
  0x78   : > { %526 = sbr.rel (%p4426_p4) target bundleno = 128 (0x80), region = 68 }
  0x7d   : > { %vm528_vm0 = vcmask 7168   ;;  %v5497_v1 = vmov 0.0  }
  0x7e   : > { %527 = vst [vmem:[#allocation2] sm:$0xff] %v5497_v1 }
  0x7f   : > { %529 = vst.msk [vmem:[#allocation3] sm:$0xff] %vm528_vm0, %v5497_v1 }
  0x80 PF: > { %v534_v2 = vld [vmem:[%s5779_s26 + $0x20] sm:$0xff]  ;;  %v5806_v3 = vld [vmem:[%s5771_s6] sm:$0xff]  ;;  %v535_v7 = vld [vmem:[%s5779_s26 + $0x28] sm:$0xff]  ;;  %vm3265_vm1 = vcmask 130112   ;;  %vm3269_vm2 = vcmask 195712   ;;  %vm3273_vm3 = vcmask 261312  }
  0x81   : > { %v5809_v4 = vperm.slane %v5806_v3, 0  ;;  %v532_v5 = vld [vmem:[%s5779_s26 + $0x10] sm:$0xff]  ;;  %v530_v6 = vld [vmem:[%s5779_s26] sm:$0xff]  ;;  %v533_v11 = vld [vmem:[%s5779_s26 + $0x18] sm:$0xff]  ;;  %v660_v51 = vrot.slane %v5806_v3, 1  ;;  %vm3277_vm4 = vcmask 326912  }
  0x82   : > { %v531_v12 = vld [vmem:[%s5779_s26 + $0x8] sm:$0xff]  ;;  %v5822_v16 = vld [vmem:[#allocation13] ss:$0 sm:$0xff]  ;;  %v538_v17 = vld [vmem:[%s5779_s26 + $0x40] sm:$0xff]  ;;  %vm3281_vm5 = vcmask 392512   ;;  %vm3285_vm6 = vcmask 458112  }
  0x83   : > { %v687_v8 = vadd.f32 %v5809_v4, %v534_v2  ;;  %v685_v9 = vadd.f32 %v5809_v4, %v532_v5  ;;  %v683_v10 = vadd.f32 %v5809_v4, %v530_v6  ;;  %v688_v13 = vadd.f32 %v5809_v4, %v535_v7  ;;  %v537_v19 = vld [vmem:[%s5779_s26 + $0x38] sm:$0xff]  ;;  %v536_v22 = vld [vmem:[%s5779_s26 + $0x30] sm:$0xff]  ;;  %v539_v37 = vld [vmem:[%s5779_s26 + $0x48] sm:$0xff]  ;;  %s4427_s13 = sshll.u32 %s5466_s8, 3  ;;  %p4428_p6 = scmp.ne.s32.totalorder %s5466_s8, 1 }
  0x84   : > { %v686_v14 = vadd.f32 %v5809_v4, %v533_v11  ;;  %v684_v15 = vadd.f32 %v5809_v4, %v531_v12  ;;  %v691_v25 = vadd.f32 %v5809_v4, %v538_v17  ;;  %v690_v27 = vadd.f32 %v5809_v4, %v537_v19  ;;  %v541_v33 = vld [vmem:[%s5779_s26 + $0x58] sm:$0xff]  ;;  %v540_v35 = vld [vmem:[%s5779_s26 + $0x50] sm:$0xff]  ;;  %v543_v47 = vld [vmem:[%s5779_s26 + $0x68] sm:$0xff]  ;;  %s3556_s22 = scalar_lea.vmem %s5799_s18, %s4427_s13 [#allocation14] }
  0x85   : > { %4713 = vtanh.f32 %v687_v8  ;;  %v689_v29 = vadd.f32 %v5809_v4, %v536_v22  ;;  %v694_v38 = vadd.f32 %v5809_v4, %v541_v33  ;;  %v693_v39 = vadd.f32 %v5809_v4, %v540_v35  ;;  %v544_v45 = vld [vmem:[%s5779_s26 + $0x70] sm:$0xff]  ;;  %v542_v49 = vld [vmem:[%s5779_s26 + $0x60] sm:$0xff]  ;;  %v547_v59 = vld [vmem:[%s5779_s26 + $0x88] sm:$0xff] }
  0x86   : > { %4715 = vtanh.f32 %v685_v9  ;;  %v692_v41 = vadd.f32 %v5809_v4, %v539_v37  ;;  %v697_v50 = vadd.f32 %v5809_v4, %v544_v45  ;;  %v696_v52 = vadd.f32 %v5809_v4, %v543_v47  ;;  %v546_v61 = vld [vmem:[%s5779_s26 + $0x80] sm:$0xff]  ;;  %v545_v63 = vld [vmem:[%s5779_s26 + $0x78] sm:$0xff]  ;;  %v1327_v19 = vld [vmem:[#allocation4] sm:$0x1] }
  0x87   : > { %4717 = vtanh.f32 %v683_v10  ;;  %v695_v54 = vadd.f32 %v5809_v4, %v542_v49  ;;  %v5852_v57 = vperm.slane %v660_v51, 0  ;;  %v698_v5 = vadd.f32 %v5809_v4, %v545_v63  ;;  %v550_v9 = vld [vmem:[%s5779_s26 + $0xa0] sm:$0xff]  ;;  %v549_v11 = vld [vmem:[%s5779_s26 + $0x98] sm:$0xff]  ;;  %4437 = vpush %v1327_v19 }
  0x88   : > { %4719 = vtanh.f32 %v688_v13  ;;  %v548_v13 = vld [vmem:[%s5779_s26 + $0x90] sm:$0xff]  ;;  %v553_v22 = vld [vmem:[%s5779_s26 + $0xb8] sm:$0xff]  ;;  %vm3289_vm7 = vcmask 523712   ;;  %vm3293_vm8 = vcmask 589312   ;;  %vm3297_vm9 = vcmask 654912  }
  0x89   : > { %4721 = vtanh.f32 %v686_v14  ;;  %v700_v0 = vadd.f32 %v5852_v57, %v547_v59  ;;  %v699_v1 = vadd.f32 %v5852_v57, %v546_v61  ;;  %v703_v14 = vadd.f32 %v5852_v57, %v550_v9  ;;  %v562_v61 = vld [vmem:[%s5779_s26 + $0x100] sm:$0xff]  ;;  %v561_v63 = vld [vmem:[%s5779_s26 + $0xf8] sm:$0xff] }
  0x8a   : > { %4723 = vtanh.f32 %v684_v15  ;;  %v702_v4 = vadd.f32 %v5852_v57, %v549_v11  ;;  %v701_v17 = vadd.f32 %v5852_v57, %v548_v13  ;;  %v565_v11 = vld [vmem:[%s5779_s26 + $0x118] sm:$0xff]  ;;  %v564_v13 = vld [vmem:[%s5779_s26 + $0x110] sm:$0xff]  ;;  %vm3301_vm10 = vcmask 720512  }
  0x8b   : > { %v4714_v18 = vpop.eup %4713  ;;  %4725 = vtanh.f32 %v691_v25  ;;  %vm3305_vm11 = vcmask 786112   ;;  %vm3309_vm12 = vcmask 851712   ;;  %vm3313_vm13 = vcmask 917312  }
  0x8c   : > { %v4716_v20 = vpop.eup %4715  ;;  %v947_v21 = vmul.f32 %v4714_v18, %v5822_v16  ;;  %4727 = vtanh.f32 %v690_v27  ;;  %v706_v27 = vadd.f32 %v5852_v57, %v553_v22  ;;  %v568_v22 = vld [vmem:[%s5779_s26 + $0x130] sm:$0xff]  ;;  %vm3317_vm14 = vcmask 982912  }
  0x8d   : > { %v4718_v23 = vpop.eup %4717  ;;  %v945_v24 = vmul.f32 %v4716_v20, %v5822_v16  ;;  %4729 = vtanh.f32 %v689_v29  ;;  %vm3321_vm15 = vcmask 1048512   ;;  %vm3540_vm0 = vcmask 1041409  }
  0x8e   : > { %1079 = vadd.xlane.f32.xlu2 %v947_v21  ;;  %v943_v26 = vmul.f32 %v4718_v23, %v5822_v16  ;;  %v4720_v28 = vpop.eup %4719  ;;  %4731 = vtanh.f32 %v694_v38  ;;  %v554_v38 = vld [vmem:[%s5779_s26 + $0xc0] sm:$0xff] }
  0x8f   : > { %1075 = vadd.xlane.f32.xlu1 %v945_v24  ;;  %v4722_v30 = vpop.eup %4721  ;;  %v948_v32 = vmul.f32 %v4720_v28, %v5822_v16  ;;  %4733 = vtanh.f32 %v693_v39  ;;  %v552_v24 = vld [vmem:[%s5779_s26 + $0xb0] sm:$0xff] }
  0x90   : > { %1071 = vadd.xlane.f32.xlu0 %v943_v26  ;;  %v4724_v31 = vpop.eup %4723  ;;  %v946_v34 = vmul.f32 %v4722_v30, %v5822_v16  ;;  %4735 = vtanh.f32 %v692_v41  ;;  %v551_v26 = vld [vmem:[%s5779_s26 + $0xa8] sm:$0xff]  ;;  %v705_v28 = vadd.f32 %v5852_v57, %v552_v24 }
  0x91   : > { %v944_v36 = vmul.f32 %v4724_v31, %v5822_v16  ;;  %v4726_v40 = vpop.eup %4725  ;;  %4737 = vtanh.f32 %v697_v50  ;;  %v704_v30 = vadd.f32 %v5852_v57, %v551_v26  ;;  %v557_v50 = vld [vmem:[%s5779_s26 + $0xd8] sm:$0xff]  ;;  %v567_v24 = vld [vmem:[%s5779_s26 + $0x128] sm:$0xff]  ;;  %v566_v26 = vld [vmem:[%s5779_s26 + $0x120] sm:$0xff] }
  0x92   : > { %v4728_v42 = vpop.eup %4727  ;;  %v951_v44 = vmul.f32 %v4726_v40, %v5822_v16  ;;  %4739 = vtanh.f32 %v696_v52  ;;  %v661_v52 = vrot.slane %v5806_v3, 2 }
  0x93   : > { %v4730_v43 = vpop.eup %4729  ;;  %v950_v46 = vmul.f32 %v4728_v42, %v5822_v16  ;;  %4741 = vtanh.f32 %v695_v54  ;;  %v707_v42 = vadd.f32 %v5852_v57, %v554_v38  ;;  %v569_v38 = vld [vmem:[%s5779_s26 + $0x138] sm:$0xff] }
  0x94   : > { %v949_v48 = vmul.f32 %v4730_v43, %v5822_v16  ;;  %v4732_v53 = vpop.eup %4731  ;;  %4743 = vtanh.f32 %v700_v0  ;;  %v5900_v59 = vperm.slane %v661_v52, 0 }
  0x95   : > { %v4734_v55 = vpop.eup %4733  ;;  %v954_v58 = vmul.f32 %v4732_v53, %v5822_v16  ;;  %4745 = vtanh.f32 %v699_v1  ;;  %v560_v1 = vld [vmem:[%s5779_s26 + $0xf0] sm:$0xff] }
  0x96   : > { %1081 = vadd.xlane.f32.xlu2 %v948_v32  ;;  %v4736_v56 = vpop.eup %4735  ;;  %v953_v60 = vmul.f32 %v4734_v55, %v5822_v16  ;;  %4747 = vtanh.f32 %v698_v5  ;;  %v710_v55 = vadd.f32 %v5852_v57, %v557_v50  ;;  %v714_v5 = vadd.f32 %v5852_v57, %v561_v63  ;;  %v572_v50 = vld [vmem:[%s5779_s26 + $0x150] sm:$0xff] }
  0x97   : > { %1077 = vadd.xlane.f32.xlu1 %v946_v34  ;;  %v952_v62 = vmul.f32 %v4736_v56, %v5822_v16  ;;  %v4738_v2 = vpop.eup %4737  ;;  %4749 = vtanh.f32 %v703_v14  ;;  %v556_v34 = vld [vmem:[%s5779_s26 + $0xd0] sm:$0xff] }
  0x98   : > { %1073 = vadd.xlane.f32.xlu0 %v944_v36  ;;  %v4740_v6 = vpop.eup %4739  ;;  %v957_v8 = vmul.f32 %v4738_v2, %v5822_v16  ;;  %4751 = vtanh.f32 %v702_v4  ;;  %v555_v36 = vld [vmem:[%s5779_s26 + $0xc8] sm:$0xff]  ;;  %v709_v39 = vadd.f32 %v5852_v57, %v556_v34  ;;  %v715_v2 = vadd.f32 %v5900_v59, %v562_v61 }
  0x99   : > { %v4742_v7 = vpop.eup %4741  ;;  %v956_v10 = vmul.f32 %v4740_v6, %v5822_v16  ;;  %4753 = vtanh.f32 %v701_v17  ;;  %v708_v40 = vadd.f32 %v5852_v57, %v555_v36  ;;  %v563_v4 = vld [vmem:[%s5779_s26 + $0x108] sm:$0xff]  ;;  %v570_v36 = vld [vmem:[%s5779_s26 + $0x140] sm:$0xff] }
  0x9a   : > { %v955_v12 = vmul.f32 %v4742_v7, %v5822_v16  ;;  %v4744_v15 = vpop.eup %4743  ;;  %4755 = vtanh.f32 %v706_v27  ;;  %v713_v7 = vadd.f32 %v5852_v57, %v560_v1  ;;  %v721_v27 = vadd.f32 %v5900_v59, %v568_v22  ;;  %v571_v34 = vld [vmem:[%s5779_s26 + $0x148] sm:$0xff] }
  0x9b   : > { %v4746_v18 = vpop.eup %4745  ;;  %v960_v21 = vmul.f32 %v4744_v15, %v5822_v16  ;;  %4757 = vtanh.f32 %v705_v28  ;;  %v718_v15 = vadd.f32 %v5900_v59, %v565_v11  ;;  %v720_v28 = vadd.f32 %v5900_v59, %v567_v24  ;;  %v583_v22 = vld [vmem:[%s5779_s26 + $0x1a8] sm:$0xff]  ;;  %v582_v24 = vld [vmem:[%s5779_s26 + $0x1a0] sm:$0xff] }
  0x9c   : > { %v4748_v20 = vpop.eup %4747  ;;  %v959_v23 = vmul.f32 %v4746_v18, %v5822_v16  ;;  %4759 = vtanh.f32 %v704_v30  ;;  %v716_v18 = vadd.f32 %v5900_v59, %v563_v4  ;;  %v719_v30 = vadd.f32 %v5900_v59, %v566_v26  ;;  %v581_v26 = vld [vmem:[%s5779_s26 + $0x198] sm:$0xff] }
  0x9d   : > { %v958_v25 = vmul.f32 %v4748_v20, %v5822_v16  ;;  %v4750_v29 = vpop.eup %4749  ;;  %4761 = vtanh.f32 %v709_v39  ;;  %v724_v39 = vadd.f32 %v5900_v59, %v571_v34  ;;  %v586_v34 = vld [vmem:[%s5779_s26 + $0x1c0] sm:$0xff] }
  0x9e   : > { %1087 = vadd.xlane.f32.xlu2 %v951_v44  ;;  %v4752_v31 = vpop.eup %4751  ;;  %v963_v33 = vmul.f32 %v4750_v29, %v5822_v16  ;;  %4763 = vtanh.f32 %v708_v40  ;;  %v723_v40 = vadd.f32 %v5900_v59, %v570_v36  ;;  %v585_v36 = vld [vmem:[%s5779_s26 + $0x1b8] sm:$0xff] }
  0x9f   : > { %1085 = vadd.xlane.f32.xlu1 %v950_v46  ;;  %v4754_v32 = vpop.eup %4753  ;;  %v962_v35 = vmul.f32 %v4752_v31, %v5822_v16  ;;  %v559_v46 = vld [vmem:[%s5779_s26 + $0xe8] sm:$0xff]  ;;  %4765 = vtanh.f32 %v707_v42  ;;  %v722_v42 = vadd.f32 %v5900_v59, %v569_v38  ;;  %v584_v38 = vld [vmem:[%s5779_s26 + $0x1b0] sm:$0xff] }
  0xa0   : > { %1083 = vadd.xlane.f32.xlu0 %v949_v48  ;;  %v961_v37 = vmul.f32 %v4754_v32, %v5822_v16  ;;  %v4756_v41 = vpop.eup %4755  ;;  %v558_v48 = vld [vmem:[%s5779_s26 + $0xe0] sm:$0xff]  ;;  %v712_v51 = vadd.f32 %v5852_v57, %v559_v46 }
  0xa1   : > { %v4758_v43 = vpop.eup %4757  ;;  %v966_v45 = vmul.f32 %v4756_v41, %v5822_v16  ;;  %v711_v53 = vadd.f32 %v5852_v57, %v558_v48  ;;  %v717_v57 = vadd.f32 %v5900_v59, %v564_v13  ;;  %v574_v46 = vld [vmem:[%s5779_s26 + $0x160] sm:$0xff]  ;;  %v573_v48 = vld [vmem:[%s5779_s26 + $0x158] sm:$0xff] }
  0xa2   : > { %v4760_v44 = vpop.eup %4759  ;;  %v965_v47 = vmul.f32 %v4758_v43, %v5822_v16  ;;  %4767 = vtanh.f32 %v712_v51  ;;  %v727_v51 = vadd.f32 %v5900_v59, %v574_v46  ;;  %v726_v52 = vadd.f32 %v5900_v59, %v573_v48  ;;  %v589_v46 = vld [vmem:[%s5779_s26 + $0x1d8] sm:$0xff]  ;;  %v588_v48 = vld [vmem:[%s5779_s26 + $0x1d0] sm:$0xff] }
  0xa3   : > { %v964_v49 = vmul.f32 %v4760_v44, %v5822_v16  ;;  %v4762_v54 = vpop.eup %4761  ;;  %4769 = vtanh.f32 %v711_v53 }
  0xa4   : > { %v4764_v56 = vpop.eup %4763  ;;  %4771 = vtanh.f32 %v710_v55 }
  0xa5   : > { %4773 = vtanh.f32 %v715_v2  ;;  %v662_v2 = vrot.slane %v5806_v3, 3 }
  0xa6   : > { %1093 = vadd.xlane.f32.xlu2 %v954_v58  ;;  %v4766_v58 = vpop.eup %4765  ;;  %4775 = vtanh.f32 %v714_v5 }
  0xa7   : > { %1091 = vadd.xlane.f32.xlu1 %v953_v60  ;;  %v969_v60 = vmul.f32 %v4762_v54, %v5822_v16  ;;  %v967_v0 = vmul.f32 %v4766_v58, %v5822_v16  ;;  %4777 = vtanh.f32 %v713_v7  ;;  %v725_v54 = vadd.f32 %v5900_v59, %v572_v50  ;;  %v587_v50 = vld [vmem:[%s5779_s26 + $0x1c8] sm:$0xff] }
  0xa8   : > { %1089 = vadd.xlane.f32.xlu0 %v952_v62  ;;  %v968_v62 = vmul.f32 %v4764_v56, %v5822_v16  ;;  %v4768_v6 = vpop.eup %4767  ;;  %4779 = vtanh.f32 %v718_v15  ;;  %v578_v15 = vld [vmem:[%s5779_s26 + $0x180] sm:$0xff] }
  0xa9   : > { %4781 = vtanh.f32 %v717_v57 }
  0xaa   : > { %4783 = vtanh.f32 %v716_v18 }
  0xab   : > { %4785 = vtanh.f32 %v721_v27 }
  0xac   : > { %4787 = vtanh.f32 %v720_v28 }
  0xad   : > { %4789 = vtanh.f32 %v719_v30 }
  0xae   : > { %1099 = vadd.xlane.f32.xlu2 %v957_v8  ;;  %v4770_v8 = vpop.eup %4769  ;;  %4791 = vtanh.f32 %v724_v39 }
  0xaf   : > { %1097 = vadd.xlane.f32.xlu1 %v956_v10  ;;  %v4772_v9 = vpop.eup %4771  ;;  %v972_v10 = vmul.f32 %v4768_v6, %v5822_v16  ;;  %4793 = vtanh.f32 %v723_v40 }
  0xb0   : > { %1095 = vadd.xlane.f32.xlu0 %v955_v12  ;;  %v971_v12 = vmul.f32 %v4770_v8, %v5822_v16  ;;  %v970_v14 = vmul.f32 %v4772_v9, %v5822_v16  ;;  %v4774_v17 = vpop.eup %4773  ;;  %4795 = vtanh.f32 %v722_v42 }
  0xb1   : > { %v4776_v19 = vpop.eup %4775  ;;  %4797 = vtanh.f32 %v727_v51 }
  0xb2   : > { %v4778_v20 = vpop.eup %4777  ;;  %4799 = vtanh.f32 %v726_v52 }
  0xb3   : > { %v4780_v29 = vpop.eup %4779  ;;  %4801 = vtanh.f32 %v725_v54 }
  0xb4   : > { %v4782_v31 = vpop.eup %4781 }
  0xb5   : > { %v4784_v32 = vpop.eup %4783 }
  0xb6   : > { %1105 = vadd.xlane.f32.xlu2 %v960_v21  ;;  %v975_v21 = vmul.f32 %v4774_v17, %v5822_v16  ;;  %v4786_v41 = vpop.eup %4785 }
  0xb7   : > { %1103 = vadd.xlane.f32.xlu1 %v959_v23  ;;  %v974_v23 = vmul.f32 %v4776_v19, %v5822_v16  ;;  %v4788_v43 = vpop.eup %4787 }
  0xb8   : > { %1101 = vadd.xlane.f32.xlu0 %v958_v25  ;;  %v973_v25 = vmul.f32 %v4778_v20, %v5822_v16  ;;  %v4790_v44 = vpop.eup %4789  ;;  %s4438_s7 = spop %4437 }
  0xb9   : > { %v4792_v53 = vpop.eup %4791 }
  0xba   : > { %v4794_v55 = vpop.eup %4793  ;;  %v984_v58 = vmul.f32 %v4792_v53, %v5822_v16 }
  0xbb   : > { %v4796_v56 = vpop.eup %4795  ;;  %v983_v61 = vmul.f32 %v4794_v55, %v5822_v16 }
  0xbc   : > { %v982_v63 = vmul.f32 %v4796_v56, %v5822_v16  ;;  %v4798_v6 = vpop.eup %4797 }
  0xbd   : > { %v4800_v8 = vpop.eup %4799  ;;  %v987_v11 = vmul.f32 %v4798_v6, %v5822_v16 }
  0xbe   : > { %1111 = vadd.xlane.f32.xlu2 %v963_v33  ;;  %v978_v33 = vmul.f32 %v4780_v29, %v5822_v16  ;;  %v4802_v9 = vpop.eup %4801  ;;  %v986_v13 = vmul.f32 %v4800_v8, %v5822_v16 }
  0xbf   : > { %1109 = vadd.xlane.f32.xlu1 %v962_v35  ;;  %v977_v35 = vmul.f32 %v4782_v31, %v5822_v16  ;;  %v985_v4 = vmul.f32 %v4802_v9, %v5822_v16 }
  0xc0   : > { %1107 = vadd.xlane.f32.xlu0 %v961_v37  ;;  %v976_v37 = vmul.f32 %v4784_v32, %v5822_v16 }
  0xc6   : > { %1117 = vadd.xlane.f32.xlu2 %v966_v45  ;;  %v981_v45 = vmul.f32 %v4786_v41, %v5822_v16 }
  0xc7   : > { %1115 = vadd.xlane.f32.xlu1 %v965_v47  ;;  %v980_v47 = vmul.f32 %v4788_v43, %v5822_v16 }
  0xc8   : > { %1113 = vadd.xlane.f32.xlu0 %v964_v49  ;;  %v979_v49 = vmul.f32 %v4790_v44, %v5822_v16 }
  0xce   : > { %1123 = vadd.xlane.f32.xlu2 %v969_v60  ;;  %v577_v60 = vld [vmem:[%s5779_s26 + $0x178] sm:$0xff] }
  0xcf   : > { %1121 = vadd.xlane.f32.xlu1 %v968_v62  ;;  %v576_v62 = vld [vmem:[%s5779_s26 + $0x170] sm:$0xff]  ;;  %v730_v1 = vadd.f32 %v5900_v59, %v577_v60 }
  0xd0   : > { %1119 = vadd.xlane.f32.xlu0 %v967_v0  ;;  %v575_v0 = vld [vmem:[%s5779_s26 + $0x168] sm:$0xff]  ;;  %v729_v5 = vadd.f32 %v5900_v59, %v576_v62  ;;  %v592_v60 = vld [vmem:[%s5779_s26 + $0x1f0] sm:$0xff] }
  0xd1   : > { %v728_v7 = vadd.f32 %v5900_v59, %v575_v0  ;;  %4803 = vtanh.f32 %v730_v1  ;;  %v591_v62 = vld [vmem:[%s5779_s26 + $0x1e8] sm:$0xff]  ;;  %v590_v0 = vld [vmem:[%s5779_s26 + $0x1e0] sm:$0xff] }
  0xd2   : > { %4805 = vtanh.f32 %v729_v5 }
  0xd3   : > { %4807 = vtanh.f32 %v728_v7 }
  0xd6   : > { %1129 = vadd.xlane.f32.xlu2 %v972_v10  ;;  %v5957_v10 = vperm.slane %v662_v2, 0  ;;  %v663_v2 = vrot.slane %v5806_v3, 4 }
  0xd7   : > { %1127 = vadd.xlane.f32.xlu1 %v971_v12  ;;  %v580_v12 = vld [vmem:[%s5779_s26 + $0x190] sm:$0xff]  ;;  %v4804_v17 = vpop.eup %4803 }
  0xd8   : > { %1125 = vadd.xlane.f32.xlu0 %v970_v14  ;;  %v579_v14 = vld [vmem:[%s5779_s26 + $0x188] sm:$0xff]  ;;  %v733_v59 = vadd.f32 %v5957_v10, %v580_v12  ;;  %v731_v18 = vadd.f32 %v5957_v10, %v578_v15  ;;  %v4806_v19 = vpop.eup %4805  ;;  %v736_v27 = vadd.f32 %v5957_v10, %v583_v22  ;;  %v735_v28 = vadd.f32 %v5957_v10, %v582_v24  ;;  %v598_v24 = vld [vmem:[%s5779_s26 + $0x220] sm:$0xff] }
  0xd9   : > { %v732_v57 = vadd.f32 %v5957_v10, %v579_v14  ;;  %v4808_v20 = vpop.eup %4807  ;;  %v734_v30 = vadd.f32 %v5957_v10, %v581_v26  ;;  %v739_v39 = vadd.f32 %v5957_v10, %v586_v34  ;;  %v738_v40 = vadd.f32 %v5957_v10, %v585_v36  ;;  %v597_v26 = vld [vmem:[%s5779_s26 + $0x218] sm:$0xff] }
  0xda   : > { %4809 = vtanh.f32 %v733_v59  ;;  %v737_v42 = vadd.f32 %v5957_v10, %v584_v38  ;;  %v742_v51 = vadd.f32 %v5957_v10, %v589_v46  ;;  %v741_v52 = vadd.f32 %v5957_v10, %v588_v48  ;;  %v593_v59 = vld [vmem:[%s5779_s26 + $0x1f8] sm:$0xff]  ;;  %v600_v38 = vld [vmem:[%s5779_s26 + $0x230] sm:$0xff] }
  0xdb   : > { %4811 = vtanh.f32 %v732_v57  ;;  %v740_v54 = vadd.f32 %v5957_v10, %v587_v50  ;;  %v745_v1 = vadd.f32 %v5957_v10, %v592_v60  ;;  %v744_v5 = vadd.f32 %v5957_v10, %v591_v62  ;;  %v601_v36 = vld [vmem:[%s5779_s26 + $0x238] sm:$0xff] }
  0xdc   : > { %4813 = vtanh.f32 %v731_v18  ;;  %v743_v7 = vadd.f32 %v5957_v10, %v590_v0 }
  0xdd   : > { %4815 = vtanh.f32 %v736_v27 }
  0xde   : > { %1135 = vadd.xlane.f32.xlu2 %v975_v21  ;;  %v990_v21 = vmul.f32 %v4804_v17, %v5822_v16  ;;  %4817 = vtanh.f32 %v735_v28  ;;  %v596_v28 = vld [vmem:[%s5779_s26 + $0x210] sm:$0xff] }
  0xdf   : > { %1133 = vadd.xlane.f32.xlu1 %v974_v23  ;;  %v989_v23 = vmul.f32 %v4806_v19, %v5822_v16  ;;  %4819 = vtanh.f32 %v734_v30 }
  0xe0   : > { %1131 = vadd.xlane.f32.xlu0 %v973_v25  ;;  %v988_v25 = vmul.f32 %v4808_v20, %v5822_v16  ;;  %v4810_v29 = vpop.eup %4809  ;;  %4821 = vtanh.f32 %v739_v39  ;;  %v746_v20 = vadd.f32 %v5957_v10, %v593_v59 }
  0xe1   : > { %v4812_v31 = vpop.eup %4811  ;;  %4823 = vtanh.f32 %v738_v40  ;;  %v599_v40 = vld [vmem:[%s5779_s26 + $0x228] sm:$0xff] }
  0xe2   : > { %v4814_v32 = vpop.eup %4813  ;;  %4825 = vtanh.f32 %v737_v42 }
  0xe3   : > { %v4816_v41 = vpop.eup %4815  ;;  %4827 = vtanh.f32 %v742_v51  ;;  %v603_v51 = vld [vmem:[%s5779_s26 + $0x248] sm:$0xff] }
  0xe4   : > { %v4818_v43 = vpop.eup %4817  ;;  %4829 = vtanh.f32 %v741_v52 }
  0xe5   : > { %v4820_v44 = vpop.eup %4819  ;;  %4831 = vtanh.f32 %v740_v54 }
  0xe6   : > { %1141 = vadd.xlane.f32.xlu2 %v978_v33  ;;  %v993_v33 = vmul.f32 %v4810_v29, %v5822_v16  ;;  %v4822_v53 = vpop.eup %4821  ;;  %4833 = vtanh.f32 %v745_v1  ;;  %v606_v1 = vld [vmem:[%s5779_s26 + $0x260] sm:$0xff] }
  0xe7   : > { %1139 = vadd.xlane.f32.xlu1 %v977_v35  ;;  %v992_v35 = vmul.f32 %v4812_v31, %v5822_v16  ;;  %v4824_v55 = vpop.eup %4823  ;;  %4835 = vtanh.f32 %v744_v5 }
  0xe8   : > { %1137 = vadd.xlane.f32.xlu0 %v976_v37  ;;  %v991_v37 = vmul.f32 %v4814_v32, %v5822_v16  ;;  %v4826_v56 = vpop.eup %4825  ;;  %4837 = vtanh.f32 %v743_v7 }
  0xe9   : > { %v4828_v6 = vpop.eup %4827 }
  0xea   : > { %v4830_v8 = vpop.eup %4829  ;;  %v1002_v12 = vmul.f32 %v4828_v6, %v5822_v16  ;;  %v605_v6 = vld [vmem:[%s5779_s26 + $0x258] sm:$0xff] }
  0xeb   : > { %v4832_v9 = vpop.eup %4831  ;;  %v1001_v14 = vmul.f32 %v4830_v8, %v5822_v16  ;;  %v664_v8 = vrot.slane %v5806_v3, 5 }
  0xec   : > { %v1000_v15 = vmul.f32 %v4832_v9, %v5822_v16  ;;  %v4834_v19 = vpop.eup %4833 }
  0xee   : > { %1147 = vadd.xlane.f32.xlu2 %v981_v45  ;;  %v996_v45 = vmul.f32 %v4816_v41, %v5822_v16 }
  0xef   : > { %1145 = vadd.xlane.f32.xlu1 %v980_v47  ;;  %v995_v47 = vmul.f32 %v4818_v43, %v5822_v16 }
  0xf0   : > { %1143 = vadd.xlane.f32.xlu0 %v979_v49  ;;  %v994_v49 = vmul.f32 %v4820_v44, %v5822_v16 }
  0xf6   : > { %1153 = vadd.xlane.f32.xlu2 %v984_v58  ;;  %v999_v58 = vmul.f32 %v4822_v53, %v5822_v16  ;;  %v602_v53 = vld [vmem:[%s5779_s26 + $0x240] sm:$0xff] }
  0xf7   : > { %1151 = vadd.xlane.f32.xlu1 %v983_v61  ;;  %v998_v61 = vmul.f32 %v4824_v55, %v5822_v16 }
  0xf8   : > { %1149 = vadd.xlane.f32.xlu0 %v982_v63  ;;  %v997_v63 = vmul.f32 %v4826_v56, %v5822_v16 }
  0xfe   : > { %1159 = vadd.xlane.f32.xlu2 %v987_v11  ;;  %v6005_v11 = vperm.slane %v663_v2, 0 }
  0xff   : > { %1157 = vadd.xlane.f32.xlu1 %v986_v13  ;;  %v595_v13 = vld [vmem:[%s5779_s26 + $0x208] sm:$0xff] }
 0x100   : > { %1155 = vadd.xlane.f32.xlu0 %v985_v4  ;;  %v594_v4 = vld [vmem:[%s5779_s26 + $0x200] sm:$0xff]  ;;  %v748_v57 = vadd.f32 %v6005_v11, %v595_v13  ;;  %v751_v29 = vadd.f32 %v6005_v11, %v598_v24  ;;  %v750_v10 = vadd.f32 %v6005_v11, %v597_v26  ;;  %v749_v31 = vadd.f32 %v6005_v11, %v596_v28 }
 0x101   : > { %v747_v18 = vadd.f32 %v6005_v11, %v594_v4  ;;  %v754_v41 = vadd.f32 %v6005_v11, %v601_v36  ;;  %v753_v42 = vadd.f32 %v6005_v11, %v600_v38  ;;  %v752_v44 = vadd.f32 %v6005_v11, %v599_v40  ;;  %v6082_v36 = vpop.xlane.xlu2 %1079 }
 0x102   : > { %4839 = vtanh.f32 %v748_v57  ;;  %v756_v55 = vadd.f32 %v6005_v11, %v603_v51  ;;  %v759_v9 = vadd.f32 %v6005_v11, %v606_v1  ;;  %v758_v13 = vadd.f32 %v6005_v11, %v605_v6  ;;  %v610_v57 = vld [vmem:[%s5779_s26 + $0x280] sm:$0xff]  ;;  %8144 = vst [vmem:[#allocation40_spill] sm:$0xff] %v6082_v36 }
 0x103   : > { %v6014_v17 = vpop.xlane.xlu0 %1071  ;;  %4841 = vtanh.f32 %v747_v18  ;;  %v609_v18 = vld [vmem:[%s5779_s26 + $0x278] sm:$0xff] }
 0x104   : > { %4843 = vtanh.f32 %v746_v20  ;;  %v608_v20 = vld [vmem:[%s5779_s26 + $0x270] sm:$0xff] }
 0x105   : > { %4845 = vtanh.f32 %v751_v29  ;;  %v613_v29 = vld [vmem:[%s5779_s26 + $0x298] sm:$0xff] }
 0x106   : > { %1165 = vadd.xlane.f32.xlu2 %v990_v21  ;;  %v4836_v21 = vpop.eup %4835  ;;  %4847 = vtanh.f32 %v750_v10 }
 0x107   : > { %1163 = vadd.xlane.f32.xlu1 %v989_v23  ;;  %v4838_v22 = vpop.eup %4837  ;;  %v1005_v23 = vmul.f32 %v4834_v19, %v5822_v16  ;;  %4849 = vtanh.f32 %v749_v31 }
 0x108   : > { %1161 = vadd.xlane.f32.xlu0 %v988_v25  ;;  %v1004_v25 = vmul.f32 %v4836_v21, %v5822_v16  ;;  %v1003_v27 = vmul.f32 %v4838_v22, %v5822_v16  ;;  %v4840_v30 = vpop.eup %4839  ;;  %4851 = vtanh.f32 %v754_v41 }
 0x109   : > { %v4842_v32 = vpop.eup %4841  ;;  %4853 = vtanh.f32 %v753_v42  ;;  %v616_v42 = vld [vmem:[%s5779_s26 + $0x2b0] sm:$0xff] }
 0x10a   : > { %v4844_v34 = vpop.eup %4843  ;;  %4855 = vtanh.f32 %v752_v44  ;;  %v615_v44 = vld [vmem:[%s5779_s26 + $0x2a8] sm:$0xff] }
 0x10b   : > { %v1006_v39 = vmul.f32 %v4844_v34, %v5822_v16  ;;  %v4846_v43 = vpop.eup %4845 }
 0x10c   : > { %v1011_v48 = vmul.f32 %v4846_v43, %v5822_v16 }
 0x10e   : > { %1171 = vadd.xlane.f32.xlu2 %v993_v33  ;;  %v6027_v33 = vpop.xlane.xlu0 %1073 }
 0x10f   : > { %1169 = vadd.xlane.f32.xlu1 %v992_v35  ;;  %8140 = vst [vmem:[#allocation36_spill] sm:$0xff] %v6027_v33  ;;  %v1008_v35 = vmul.f32 %v4840_v30, %v5822_v16  ;;  %v612_v30 = vld [vmem:[%s5779_s26 + $0x290] sm:$0xff] }
 0x110   : > { %1167 = vadd.xlane.f32.xlu0 %v991_v37  ;;  %v1007_v37 = vmul.f32 %v4842_v32, %v5822_v16  ;;  %v611_v32 = vld [vmem:[%s5779_s26 + $0x288] sm:$0xff] }
 0x116   : > { %1177 = vadd.xlane.f32.xlu2 %v996_v45  ;;  %v4848_v45 = vpop.eup %4847 }
 0x117   : > { %1175 = vadd.xlane.f32.xlu1 %v995_v47  ;;  %v4850_v46 = vpop.eup %4849  ;;  %v6038_v47 = vpop.xlane.xlu0 %1083  ;;  %v1010_v50 = vmul.f32 %v4848_v45, %v5822_v16 }
 0x118   : > { %1173 = vadd.xlane.f32.xlu0 %v994_v49  ;;  %8141 = vst [vmem:[#allocation37_spill] sm:$0xff] %v6038_v47  ;;  %v604_v49 = vld [vmem:[%s5779_s26 + $0x250] sm:$0xff]  ;;  %v1009_v52 = vmul.f32 %v4850_v46, %v5822_v16  ;;  %v4852_v56 = vpop.eup %4851  ;;  %v614_v46 = vld [vmem:[%s5779_s26 + $0x2a0] sm:$0xff] }
 0x119   : > { %v757_v54 = vadd.f32 %v6005_v11, %v604_v49  ;;  %v4854_v60 = vpop.eup %4853  ;;  %v1014_v62 = vmul.f32 %v4852_v56, %v5822_v16 }
 0x11a   : > { %v1013_v0 = vmul.f32 %v4854_v60, %v5822_v16 }
 0x11b   : > { %4857 = vtanh.f32 %v757_v54  ;;  %v6096_v54 = vpop.xlane.xlu2 %1081 }
 0x11c   : > { %4859 = vtanh.f32 %v756_v55  ;;  %v6100_v55 = vld [vmem:[#allocation13] ss:$0 sm:$0xff] }
 0x11e   : > { %1183 = vadd.xlane.f32.xlu2 %v999_v58  ;;  %v755_v58 = vadd.f32 %v6005_v11, %v602_v53 }
 0x11f   : > { %1181 = vadd.xlane.f32.xlu1 %v998_v61  ;;  %v4856_v61 = vpop.eup %4855  ;;  %v6053_v2 = vpop.xlane.xlu0 %1089 }
 0x120   : > { %1179 = vadd.xlane.f32.xlu0 %v997_v63  ;;  %v607_v63 = vld [vmem:[%s5779_s26 + $0x268] sm:$0xff]  ;;  %4861 = vtanh.f32 %v755_v58  ;;  %8142 = vst [vmem:[#allocation38_spill] sm:$0xff] %v6053_v2  ;;  %v1012_v5 = vmul.f32 %v4856_v61, %v5822_v16  ;;  %v618_v61 = vld [vmem:[%s5779_s26 + $0x2c0] sm:$0xff] }
 0x121   : > { %v760_v7 = vadd.f32 %v6005_v11, %v607_v63  ;;  %v619_v58 = vld [vmem:[%s5779_s26 + $0x2c8] sm:$0xff]  ;;  %v617_v63 = vld [vmem:[%s5779_s26 + $0x2b8] sm:$0xff] }
 0x123   : > { %4863 = vtanh.f32 %v760_v7 }
 0x124   : > { %4865 = vtanh.f32 %v759_v9 }
 0x125   : > { %4867 = vtanh.f32 %v758_v13  ;;  %v6113_v13 = vpop.xlane.xlu2 %1087 }
 0x126   : > { %1189 = vadd.xlane.f32.xlu2 %v1002_v12  ;;  %v4858_v12 = vpop.eup %4857 }
 0x127   : > { %1187 = vadd.xlane.f32.xlu1 %v1001_v14  ;;  %v4860_v14 = vpop.eup %4859  ;;  %v1017_v59 = vmul.f32 %v4858_v12, %v5822_v16  ;;  %v6070_v22 = vpop.xlane.xlu0 %1095  ;;  %v622_v12 = vld [vmem:[%s5779_s26 + $0x2e0] sm:$0xff] }
 0x128   : > { %1185 = vadd.xlane.f32.xlu0 %v1000_v15  ;;  %v4862_v4 = vpop.eup %4861  ;;  %v6061_v15 = vperm.slane %v664_v8, 0  ;;  %v1016_v3 = vmul.f32 %v4860_v14, %v5822_v16  ;;  %8143 = vst [vmem:[#allocation39_spill] sm:$0xff] %v6070_v22 }
 0x129   : > { %v1015_v19 = vmul.f32 %v4862_v4, %v5822_v16  ;;  %v4864_v24 = vpop.eup %4863  ;;  %v621_v4 = vld [vmem:[%s5779_s26 + $0x2d8] sm:$0xff] }
 0x12a   : > { %v763_v21 = vadd.f32 %v6061_v15, %v610_v57  ;;  %v4866_v26 = vpop.eup %4865  ;;  %v1020_v28 = vmul.f32 %v4864_v24, %v5822_v16  ;;  %v766_v34 = vadd.f32 %v6061_v15, %v613_v29  ;;  %v768_v49 = vadd.f32 %v6061_v15, %v615_v44  ;;  %v624_v29 = vld [vmem:[%s5779_s26 + $0x2f0] sm:$0xff] }
 0x12b   : > { %v1019_v10 = vmul.f32 %v4866_v26, %v5822_v16  ;;  %v767_v51 = vadd.f32 %v6061_v15, %v614_v46  ;;  %v771_v1 = vadd.f32 %v6061_v15, %v618_v61  ;;  %v770_v6 = vadd.f32 %v6061_v15, %v617_v63  ;;  %v628_v46 = vld [vmem:[%s5779_s26 + $0x310] sm:$0xff] }
 0x12c   : > { %4869 = vtanh.f32 %v763_v21 }
 0x12e   : > { %1195 = vadd.xlane.f32.xlu2 %v1005_v23  ;;  %v762_v23 = vadd.f32 %v6005_v11, %v609_v18  ;;  %v620_v18 = vld [vmem:[%s5779_s26 + $0x2d0] sm:$0xff] }
 0x12f   : > { %1193 = vadd.xlane.f32.xlu1 %v1004_v25  ;;  %v761_v25 = vadd.f32 %v6005_v11, %v608_v20  ;;  %v765_v11 = vadd.f32 %v6061_v15, %v612_v30  ;;  %v774_v20 = vadd.f32 %v6061_v15, %v621_v4  ;;  %v623_v30 = vld [vmem:[%s5779_s26 + $0x2e8] sm:$0xff] }
 0x130   : > { %1191 = vadd.xlane.f32.xlu0 %v1003_v27  ;;  %v4868_v27 = vpop.eup %4867  ;;  %4871 = vtanh.f32 %v762_v23  ;;  %v773_v23 = vadd.f32 %v6061_v15, %v620_v18 }
 0x131   : > { %4873 = vtanh.f32 %v761_v25  ;;  %v1018_v31 = vmul.f32 %v4868_v27, %v5822_v16  ;;  %v625_v27 = vld [vmem:[%s5779_s26 + $0x2f8] sm:$0xff] }
 0x132   : > { %4875 = vtanh.f32 %v766_v34  ;;  %v6136_v34 = vld [vmem:[%s5771_s6] sm:$0xff] }
 0x133   : > { %4877 = vtanh.f32 %v765_v11  ;;  %v665_v11 = vrot.slane %v6136_v34, 6 }
 0x135   : > { %v6145_v44 = vperm.slane %v665_v11, 0 }
 0x136   : > { %1201 = vadd.xlane.f32.xlu2 %v1008_v35  ;;  %v4870_v35 = vpop.eup %4869 }
 0x137   : > { %1199 = vadd.xlane.f32.xlu1 %v1007_v37  ;;  %v764_v37 = vadd.f32 %v6061_v15, %v611_v32  ;;  %v4872_v38 = vpop.eup %4871  ;;  %v1023_v41 = vmul.f32 %v4870_v35, %v5822_v16  ;;  %v778_v32 = vadd.f32 %v6061_v15, %v625_v27 }
 0x138   : > { %1197 = vadd.xlane.f32.xlu0 %v1006_v39  ;;  %v6085_v39 = vpop.xlane.xlu0 %1101  ;;  %v4874_v40 = vpop.eup %4873  ;;  %v1022_v43 = vmul.f32 %v4872_v38, %v5822_v16  ;;  %v777_v38 = vadd.f32 %v6061_v15, %v624_v29 }
 0x139   : > { %8145 = vst [vmem:[#allocation41_spill] sm:$0xff] %v6085_v39  ;;  %4879 = vtanh.f32 %v764_v37  ;;  %v1021_v45 = vmul.f32 %v4874_v40, %v5822_v16 }
 0x13e   : > { %1207 = vadd.xlane.f32.xlu2 %v1011_v48  ;;  %v769_v48 = vadd.f32 %v6061_v15, %v616_v42 }
 0x13f   : > { %1205 = vadd.xlane.f32.xlu1 %v1010_v50  ;;  %v4876_v50 = vpop.eup %4875 }
 0x140   : > { %1203 = vadd.xlane.f32.xlu0 %v1009_v52  ;;  %v4878_v52 = vpop.eup %4877  ;;  %4881 = vtanh.f32 %v769_v48  ;;  %v6098_v16 = vpop.xlane.xlu0 %1107  ;;  %v1026_v56 = vmul.f32 %v6100_v55, %v4876_v50 }
 0x141   : > { %v4880_v53 = vpop.eup %4879  ;;  %8146 = vst [vmem:[#allocation42_spill] sm:$0xff] %v6098_v16  ;;  %4883 = vtanh.f32 %v768_v49  ;;  %v1025_v60 = vmul.f32 %v6100_v55, %v4878_v52  ;;  %v627_v49 = vld [vmem:[%s5779_s26 + $0x308] sm:$0xff] }
 0x142   : > { %4885 = vtanh.f32 %v767_v51  ;;  %v626_v51 = vld [vmem:[%s5779_s26 + $0x300] sm:$0xff]  ;;  %v780_v52 = vadd.f32 %v6145_v44, %v627_v49 }
 0x146   : > { %1213 = vadd.xlane.f32.xlu2 %v1014_v62  ;;  %v1024_v62 = vmul.f32 %v6100_v55, %v4880_v53 }
 0x147   : > { %1211 = vadd.xlane.f32.xlu1 %v1013_v0  ;;  %v772_v0 = vadd.f32 %v6061_v15, %v619_v58  ;;  %v779_v58 = vadd.f32 %v6145_v44, %v626_v51 }
 0x148   : > { %1209 = vadd.xlane.f32.xlu0 %v1012_v5  ;;  %v4882_v5 = vpop.eup %4881  ;;  %v6119_v57 = vpop.xlane.xlu0 %1113 }
 0x149   : > { %v4884_v7 = vpop.eup %4883  ;;  %4887 = vtanh.f32 %v772_v0  ;;  %v1029_v9 = vmul.f32 %v6100_v55, %v4882_v5  ;;  %8148 = vst [vmem:[#allocation44_spill] sm:$0xff] %v6119_v57 }
 0x14a   : > { %v4886_v8 = vpop.eup %4885  ;;  %4889 = vtanh.f32 %v771_v1  ;;  %v1028_v14 = vmul.f32 %v6100_v55, %v4884_v7  ;;  %v631_v1 = vld [vmem:[%s5779_s26 + $0x328] sm:$0xff] }
 0x14b   : > { %4891 = vtanh.f32 %v770_v6  ;;  %v630_v6 = vld [vmem:[%s5779_s26 + $0x320] sm:$0xff] }
 0x14e   : > { %1219 = vadd.xlane.f32.xlu2 %v1017_v59  ;;  %v6117_v59 = vpop.xlane.xlu1 %1075 }
 0x14f   : > { %1217 = vadd.xlane.f32.xlu1 %v1016_v3  ;;  %8147 = vst [vmem:[#allocation43_spill] sm:$0xff] %v6117_v59  ;;  %v1027_v3 = vmul.f32 %v6100_v55, %v4886_v8  ;;  %v4888_v21 = vpop.eup %4887  ;;  %v629_v8 = vld [vmem:[%s5779_s26 + $0x318] sm:$0xff] }
 0x150   : > { %1215 = vadd.xlane.f32.xlu0 %v1015_v19  ;;  %v775_v19 = vadd.f32 %v6061_v15, %v622_v12  ;;  %v4890_v24 = vpop.eup %4889  ;;  %v1032_v26 = vmul.f32 %v6100_v55, %v4888_v21  ;;  %v6141_v37 = vpop.xlane.xlu0 %1119  ;;  %v783_v12 = vadd.f32 %v6145_v44, %v630_v6  ;;  %v782_v4 = vadd.f32 %v6145_v44, %v629_v8 }
 0x151   : > { %v4892_v25 = vpop.eup %4891  ;;  %8150 = vst [vmem:[#allocation46_spill] sm:$0xff] %v6141_v37 }
 0x152   : > { %4893 = vtanh.f32 %v775_v19 }
 0x153   : > { %4895 = vtanh.f32 %v774_v20 }
 0x154   : > { %4897 = vtanh.f32 %v773_v23 }
 0x155   : > { %4899 = vtanh.f32 %v778_v32 }
 0x156   : > { %1225 = vadd.xlane.f32.xlu2 %v1020_v28  ;;  %v1031_v28 = vmul.f32 %v6100_v55, %v4890_v24  ;;  %v6139_v35 = vpop.xlane.xlu1 %1077  ;;  %4901 = vtanh.f32 %v777_v38  ;;  %v634_v24 = vld [vmem:[%s5779_s26 + $0x340] sm:$0xff] }
 0x157   : > { %1223 = vadd.xlane.f32.xlu1 %v1019_v10  ;;  %v1030_v10 = vmul.f32 %v6100_v55, %v4892_v25  ;;  %8149 = vst [vmem:[#allocation45_spill] sm:$0xff] %v6139_v35  ;;  %v787_v29 = vadd.f32 %v6145_v44, %v634_v24 }
 0x158   : > { %1221 = vadd.xlane.f32.xlu0 %v1018_v31  ;;  %v6132_v31 = vpop.xlane.xlu2 %1093  ;;  %v4894_v40 = vpop.eup %4893 }
 0x159   : > { %v4896_v42 = vpop.eup %4895 }
 0x15a   : > { %v1034_v48 = vmul.f32 %v6100_v55, %v4896_v42 }
 0x15e   : > { %1231 = vadd.xlane.f32.xlu2 %v1023_v41  ;;  %v776_v41 = vadd.f32 %v6061_v15, %v623_v30  ;;  %v781_v15 = vadd.f32 %v6145_v44, %v628_v46  ;;  %v6158_v61 = vpop.xlane.xlu1 %1085 }
 0x15f   : > { %1229 = vadd.xlane.f32.xlu1 %v1022_v43  ;;  %v4898_v43 = vpop.eup %4897  ;;  %8151 = vst [vmem:[#allocation47_spill] sm:$0xff] %v6158_v61 }
 0x160   : > { %1227 = vadd.xlane.f32.xlu0 %v1021_v45  ;;  %v1035_v45 = vmul.f32 %v6100_v55, %v4894_v40  ;;  %4903 = vtanh.f32 %v776_v41  ;;  %v1033_v50 = vmul.f32 %v6100_v55, %v4898_v43  ;;  %v4900_v53 = vpop.eup %4899  ;;  %v637_v41 = vld [vmem:[%s5779_s26 + $0x358] sm:$0xff] }
 0x161   : > { %4905 = vtanh.f32 %v781_v15  ;;  %v1038_v0 = vmul.f32 %v6100_v55, %v4900_v53  ;;  %v790_v51 = vadd.f32 %v6145_v44, %v637_v41 }
 0x162   : > { %4907 = vtanh.f32 %v780_v52 }
 0x163   : > { %4909 = vtanh.f32 %v779_v58 }
 0x166   : > { %1237 = vadd.xlane.f32.xlu2 %v1026_v56  ;;  %v6155_v56 = vpop.xlane.xlu2 %1099  ;;  %v6173_v20 = vpop.xlane.xlu1 %1091 }
 0x167   : > { %1235 = vadd.xlane.f32.xlu1 %v1025_v60  ;;  %v4902_v60 = vpop.eup %4901  ;;  %8153 = vst [vmem:[#allocation49_spill] sm:$0xff] %v6173_v20 }
 0x168   : > { %1233 = vadd.xlane.f32.xlu0 %v1024_v62  ;;  %v6160_v62 = vpop.xlane.xlu0 %1125  ;;  %v4904_v63 = vpop.eup %4903  ;;  %v1037_v5 = vmul.f32 %v6100_v55, %v4902_v60 }
 0x169   : > { %8152 = vst [vmem:[#allocation48_spill] sm:$0xff] %v6160_v62  ;;  %v1036_v7 = vmul.f32 %v6100_v55, %v4904_v63 }
 0x16e   : > { %1243 = vadd.xlane.f32.xlu2 %v1029_v9  ;;  %v784_v9 = vadd.f32 %v6145_v44, %v631_v1  ;;  %v6171_v19 = vpop.xlane.xlu2 %1105  ;;  %v6192_v46 = vpop.xlane.xlu1 %1097 }
 0x16f   : > { %1241 = vadd.xlane.f32.xlu1 %v1028_v14  ;;  %v4906_v14 = vpop.eup %4905  ;;  %8155 = vst [vmem:[#allocation51_spill] sm:$0xff] %v6192_v46 }
 0x170   : > { %1239 = vadd.xlane.f32.xlu0 %v1027_v3  ;;  %v4908_v3 = vpop.eup %4907  ;;  %4911 = vtanh.f32 %v784_v9  ;;  %v6175_v21 = vpop.xlane.xlu0 %1131  ;;  %v1041_v23 = vmul.f32 %v6100_v55, %v4906_v14 }
 0x171   : > { %v4910_v18 = vpop.eup %4909  ;;  %8154 = vst [vmem:[#allocation50_spill] sm:$0xff] %v6175_v21  ;;  %4913 = vtanh.f32 %v783_v12  ;;  %v1040_v25 = vmul.f32 %v6100_v55, %v4908_v3  ;;  %v666_v12 = vrot.slane %v6136_v34, 7 }
 0x172   : > { %4915 = vtanh.f32 %v782_v4  ;;  %v1039_v27 = vmul.f32 %v6100_v55, %v4910_v18 }
 0x173   : > { %4917 = vtanh.f32 %v787_v29  ;;  %v642_v29 = vld [vmem:[%s5779_s26 + $0x380] sm:$0xff] }
 0x176   : > { %1249 = vadd.xlane.f32.xlu2 %v1032_v26  ;;  %v633_v26 = vld [vmem:[%s5779_s26 + $0x338] sm:$0xff]  ;;  %v4912_v30 = vpop.eup %4911  ;;  %v6188_v42 = vpop.xlane.xlu2 %1111 }
 0x177   : > { %1247 = vadd.xlane.f32.xlu1 %v1031_v28  ;;  %v632_v28 = vld [vmem:[%s5779_s26 + $0x330] sm:$0xff]  ;;  %v4914_v11 = vpop.eup %4913  ;;  %v1044_v40 = vmul.f32 %v6100_v55, %v4912_v30  ;;  %v6211_v14 = vpop.xlane.xlu1 %1103  ;;  %v641_v30 = vld [vmem:[%s5779_s26 + $0x378] sm:$0xff] }
 0x178   : > { %1245 = vadd.xlane.f32.xlu0 %v1030_v10  ;;  %v786_v10 = vadd.f32 %v6145_v44, %v633_v26  ;;  %v785_v32 = vadd.f32 %v6145_v44, %v632_v28  ;;  %v4916_v38 = vpop.eup %4915  ;;  %v1043_v43 = vmul.f32 %v6100_v55, %v4914_v11  ;;  %8157 = vst [vmem:[#allocation53_spill] sm:$0xff] %v6211_v14  ;;  %v6217_v26 = vperm.slane %v666_v12, 0 }
 0x179   : > { %v1042_v49 = vmul.f32 %v6100_v55, %v4916_v38  ;;  %v4918_v52 = vpop.eup %4917  ;;  %v794_v41 = vadd.f32 %v6145_v44, %v641_v30 }
 0x17a   : > { %4919 = vtanh.f32 %v786_v10  ;;  %v1047_v63 = vmul.f32 %v6100_v55, %v4918_v52  ;;  %v795_v11 = vadd.f32 %v6217_v26, %v642_v29 }
 0x17b   : > { %4921 = vtanh.f32 %v785_v32 }
 0x17c   : > { %4923 = vtanh.f32 %v790_v51 }
 0x17e   : > { %1255 = vadd.xlane.f32.xlu2 %v1035_v45  ;;  %v636_v45 = vld [vmem:[%s5779_s26 + $0x350] sm:$0xff]  ;;  %v6207_v8 = vpop.xlane.xlu2 %1117 }
 0x17f   : > { %1253 = vadd.xlane.f32.xlu1 %v1034_v48  ;;  %v6194_v48 = vpop.xlane.xlu0 %1137  ;;  %v789_v15 = vadd.f32 %v6145_v44, %v636_v45  ;;  %v6230_v45 = vpop.xlane.xlu1 %1109 }
 0x180   : > { %1251 = vadd.xlane.f32.xlu0 %v1033_v50  ;;  %8156 = vst [vmem:[#allocation52_spill] sm:$0xff] %v6194_v48  ;;  %v635_v50 = vld [vmem:[%s5779_s26 + $0x348] sm:$0xff]  ;;  %v4920_v58 = vpop.eup %4919 }
 0x181   : > { %v788_v53 = vadd.f32 %v6145_v44, %v635_v50  ;;  %v4922_v60 = vpop.eup %4921  ;;  %4925 = vtanh.f32 %v789_v15  ;;  %v1046_v1 = vmul.f32 %v6100_v55, %v4920_v58  ;;  %8159 = vst [vmem:[#allocation55_spill] sm:$0xff] %v6230_v45  ;;  %v646_v15 = vld [vmem:[%s5779_s26 + $0x3a0] sm:$0xff] }
 0x182   : > { %v1045_v6 = vmul.f32 %v6100_v55, %v4922_v60  ;;  %v4924_v18 = vpop.eup %4923  ;;  %v644_v60 = vld [vmem:[%s5779_s26 + $0x390] sm:$0xff] }
 0x183   : > { %4927 = vtanh.f32 %v788_v53  ;;  %v1050_v34 = vmul.f32 %v6100_v55, %v4924_v18  ;;  %v645_v53 = vld [vmem:[%s5779_s26 + $0x398] sm:$0xff] }
 0x184   : > { %v649_v18 = vld [vmem:[%s5779_s26 + $0x3b8] sm:$0xff] }
 0x186   : > { %1261 = vadd.xlane.f32.xlu2 %v1038_v0  ;;  %v640_v0 = vld [vmem:[%s5779_s26 + $0x370] sm:$0xff] }
 0x187   : > { %1259 = vadd.xlane.f32.xlu1 %v1037_v5  ;;  %v639_v5 = vld [vmem:[%s5779_s26 + $0x368] sm:$0xff]  ;;  %v793_v9 = vadd.f32 %v6145_v44, %v640_v0  ;;  %v6213_v4 = vpop.xlane.xlu0 %1143  ;;  %v4926_v24 = vpop.eup %4925 }
 0x188   : > { %1257 = vadd.xlane.f32.xlu0 %v1036_v7  ;;  %v638_v7 = vld [vmem:[%s5779_s26 + $0x360] sm:$0xff]  ;;  %8158 = vst [vmem:[#allocation54_spill] sm:$0xff] %v6213_v4  ;;  %v792_v3 = vadd.f32 %v6145_v44, %v639_v5  ;;  %v1049_v28 = vmul.f32 %v6100_v55, %v4926_v24  ;;  %v648_v24 = vld [vmem:[%s5779_s26 + $0x3b0] sm:$0xff] }
 0x189   : > { %4929 = vtanh.f32 %v793_v9  ;;  %v6245_v9 = vpop.xlane.xlu1 %1115 }
 0x18a   : > { %4931 = vtanh.f32 %v792_v3  ;;  %8161 = vst [vmem:[#allocation57_spill] sm:$0xff] %v6245_v9 }
 0x18e   : > { %1267 = vadd.xlane.f32.xlu2 %v1041_v23  ;;  %v791_v23 = vadd.f32 %v6145_v44, %v638_v7  ;;  %v799_v44 = vadd.f32 %v6217_v26, %v646_v15 }
 0x18f   : > { %1265 = vadd.xlane.f32.xlu1 %v1040_v25  ;;  %v4928_v25 = vpop.eup %4927 }
 0x190   : > { %1263 = vadd.xlane.f32.xlu0 %v1039_v27  ;;  %v643_v27 = vld [vmem:[%s5779_s26 + $0x388] sm:$0xff]  ;;  %4933 = vtanh.f32 %v791_v23  ;;  %v1048_v10 = vmul.f32 %v6100_v55, %v4928_v25  ;;  %v4930_v38 = vpop.eup %4929 }
 0x191   : > { %v796_v32 = vadd.f32 %v6217_v26, %v643_v27  ;;  %v1053_v51 = vmul.f32 %v6100_v55, %v4930_v38  ;;  %v802_v27 = vadd.f32 %v6217_v26, %v649_v18  ;;  %v652_v38 = vld [vmem:[%s5779_s26 + $0x3d0] sm:$0xff]  ;;  %v654_v18 = vld [vmem:[%s5779_s26 + $0x3e0] sm:$0xff] }
 0x193   : > { %4935 = vtanh.f32 %v796_v32 }
 0x194   : > { %4937 = vtanh.f32 %v795_v11 }
 0x195   : > { %4939 = vtanh.f32 %v794_v41 }
 0x196   : > { %1273 = vadd.xlane.f32.xlu2 %v1044_v40  ;;  %v6227_v40 = vpop.xlane.xlu2 %1123  ;;  %4941 = vtanh.f32 %v799_v44 }
 0x197   : > { %1271 = vadd.xlane.f32.xlu1 %v1043_v43  ;;  %v4932_v43 = vpop.eup %4931 }
 0x198   : > { %1269 = vadd.xlane.f32.xlu0 %v1042_v49  ;;  %v6232_v49 = vpop.xlane.xlu0 %1149  ;;  %v4934_v50 = vpop.eup %4933  ;;  %v1052_v52 = vmul.f32 %v6100_v55, %v4932_v43 }
 0x199   : > { %8160 = vst [vmem:[#allocation56_spill] sm:$0xff] %v6232_v49  ;;  %v1051_v58 = vmul.f32 %v6100_v55, %v4934_v50  ;;  %v4936_v0 = vpop.eup %4935  ;;  %v651_v50 = vld [vmem:[%s5779_s26 + $0x3c8] sm:$0xff] }
 0x19a   : > { %v4938_v5 = vpop.eup %4937  ;;  %v1056_v3 = vmul.f32 %v6100_v55, %v4936_v0 }
 0x19b   : > { %v1055_v23 = vmul.f32 %v6100_v55, %v4938_v5 }
 0x19e   : > { %1279 = vadd.xlane.f32.xlu2 %v1047_v63  ;;  %v798_v63 = vadd.f32 %v6217_v26, %v645_v53  ;;  %v6243_v7 = vpop.xlane.xlu2 %1129  ;;  %v650_v53 = vld [vmem:[%s5779_s26 + $0x3c0] sm:$0xff] }
 0x19f   : > { %1277 = vadd.xlane.f32.xlu1 %v1046_v1  ;;  %v797_v1 = vadd.f32 %v6217_v26, %v644_v60  ;;  %v804_v60 = vadd.f32 %v6217_v26, %v651_v50 }
 0x1a0   : > { %1275 = vadd.xlane.f32.xlu0 %v1045_v6  ;;  %v4940_v6 = vpop.eup %4939  ;;  %v6247_v12 = vpop.xlane.xlu0 %1155  ;;  %4943 = vtanh.f32 %v798_v63  ;;  %v803_v63 = vadd.f32 %v6217_v26, %v650_v53  ;;  %v657_v53 = vld [vmem:[%s5779_s26 + $0x3f8] sm:$0xff] }
 0x1a1   : > { %8162 = vst [vmem:[#allocation58_spill] sm:$0xff] %v6247_v12  ;;  %4945 = vtanh.f32 %v797_v1  ;;  %v1054_v25 = vmul.f32 %v6100_v55, %v4940_v6  ;;  %v4942_v29 = vpop.eup %4941  ;;  %v655_v6 = vld [vmem:[%s5779_s26 + $0x3e8] sm:$0xff] }
 0x1a2   : > { %4947 = vtanh.f32 %v802_v27  ;;  %v1059_v11 = vmul.f32 %v6100_v55, %v4942_v29  ;;  %v808_v27 = vadd.f32 %v6217_v26, %v655_v6 }
 0x1a6   : > { %1285 = vadd.xlane.f32.xlu2 %v1050_v34  ;;  %v647_v34 = vld [vmem:[%s5779_s26 + $0x3a8] sm:$0xff]  ;;  %v4944_v30 = vpop.eup %4943  ;;  %v6260_v41 = vpop.xlane.xlu2 %1135 }
 0x1a7   : > { %1283 = vadd.xlane.f32.xlu1 %v1049_v28  ;;  %v801_v28 = vadd.f32 %v6217_v26, %v648_v24  ;;  %v4946_v32 = vpop.eup %4945  ;;  %v1058_v43 = vmul.f32 %v6100_v55, %v4944_v30  ;;  %v653_v24 = vld [vmem:[%s5779_s26 + $0x3d8] sm:$0xff] }
 0x1a8   : > { %1281 = vadd.xlane.f32.xlu0 %v1048_v10  ;;  %v800_v10 = vadd.f32 %v6217_v26, %v647_v34  ;;  %v6266_v15 = vpop.xlane.xlu0 %1161  ;;  %v4948_v44 = vpop.eup %4947 }
 0x1a9   : > { %4949 = vtanh.f32 %v801_v28  ;;  %8164 = vst [vmem:[#allocation60_spill] sm:$0xff] %v6266_v15  ;;  %v1062_v5 = vmul.f32 %v6100_v55, %v4948_v44  ;;  %v810_v44 = vadd.f32 %v6217_v26, %v657_v53 }
 0x1aa   : > { %4951 = vtanh.f32 %v800_v10  ;;  %v807_v10 = vadd.f32 %v6217_v26, %v654_v18 }
 0x1ae   : > { %1291 = vadd.xlane.f32.xlu2 %v1053_v51  ;;  %v6264_v51 = vpop.xlane.xlu1 %1121  ;;  %v6279_v34 = vpop.xlane.xlu2 %1141 }
 0x1af   : > { %1289 = vadd.xlane.f32.xlu1 %v1052_v52  ;;  %8163 = vst [vmem:[#allocation59_spill] sm:$0xff] %v6264_v51  ;;  %v1057_v52 = vmul.f32 %v6100_v55, %v4946_v32  ;;  %v4950_v0 = vpop.eup %4949 }
 0x1b0   : > { %1287 = vadd.xlane.f32.xlu0 %v1051_v58  ;;  %v805_v58 = vadd.f32 %v6217_v26, %v652_v38  ;;  %v4952_v1 = vpop.eup %4951  ;;  %v6284_v29 = vpop.xlane.xlu0 %1167 }
 0x1b1   : > { %8166 = vst [vmem:[#allocation62_spill] sm:$0xff] %v6284_v29 }
 0x1b2   : > { %4953 = vtanh.f32 %v805_v58 }
 0x1b3   : > { %4955 = vtanh.f32 %v804_v60  ;;  %v656_v60 = vld [vmem:[%s5779_s26 + $0x3f0] sm:$0xff] }
 0x1b4   : > { %4957 = vtanh.f32 %v803_v63 }
 0x1b5   : > { %4959 = vtanh.f32 %v808_v27 }
 0x1b6   : > { %1297 = vadd.xlane.f32.xlu2 %v1056_v3  ;;  %v1061_v3 = vmul.f32 %v6100_v55, %v4950_v0  ;;  %v6282_v28 = vpop.xlane.xlu1 %1127  ;;  %4961 = vtanh.f32 %v807_v10  ;;  %v6299_v0 = vpop.xlane.xlu2 %1147 }
 0x1b7   : > { %1295 = vadd.xlane.f32.xlu1 %v1055_v23  ;;  %v1060_v23 = vmul.f32 %v6100_v55, %v4952_v1  ;;  %8165 = vst [vmem:[#allocation61_spill] sm:$0xff] %v6282_v28  ;;  %v809_v1 = vadd.f32 %v6217_v26, %v656_v60 }
 0x1b8   : > { %1293 = vadd.xlane.f32.xlu0 %v1054_v25  ;;  %v8108_v25 = vlaneseq  ;;  %v4954_v32 = vpop.eup %4953  ;;  %v6307_v18 = vpop.xlane.xlu0 %1173 }
 0x1b9   : > { %v4956_v38 = vpop.eup %4955  ;;  %v1065_v50 = vmul.f32 %v6100_v55, %v4954_v32  ;;  %8168 = vst [vmem:[#allocation64_spill] sm:$0xff] %v6307_v18 }
 0x1ba   : > { %v6288_v30 = vshrl.u32 %v8108_v25, 7 }
 0x1bc   : > { %4590 = vset.pattern.permute.xlu2 %v6288_v30  ;;  %4629 = vset.pattern.permute.xlu0 %v6288_v30  ;;  %v6390_v29 = vadd.s32 48, %v6288_v30 }
 0x1be   : > { %1303 = vadd.xlane.f32.xlu2 %v1059_v11  ;;  %v806_v11 = vadd.f32 %v6217_v26, %v653_v24 }
 0x1bf   : > { %1301 = vadd.xlane.f32.xlu1 %v1058_v43  ;;  %v4958_v43 = vpop.eup %4957 }
 0x1c0   : > { %1299 = vadd.xlane.f32.xlu0 %v1057_v52  ;;  %v1064_v52 = vmul.f32 %v6100_v55, %v4956_v38  ;;  %4963 = vtanh.f32 %v806_v11  ;;  %v1063_v58 = vmul.f32 %v6100_v55, %v4958_v43  ;;  %v4960_v63 = vpop.eup %4959  ;;  %v6313_v11 = vpop.xlane.xlu2 %1153 }
 0x1c1   : > { %v4962_v6 = vpop.eup %4961  ;;  %v1068_v24 = vmul.f32 %v6100_v55, %v4960_v63  ;;  %4965 = vtanh.f32 %v810_v44  ;;  %v6317_v43 = vpop.xlane.xlu0 %1179  ;;  %v6329_v44 = vld [vmem:[%s462_s14] sm:$0xff] }
 0x1c2   : > { %v1067_v27 = vmul.f32 %v6100_v55, %v4962_v6  ;;  %4967 = vtanh.f32 %v809_v1  ;;  %8170 = vst [vmem:[#allocation66_spill] sm:$0xff] %v6317_v43  ;;  %v6332_v63 = vperm.slane %v6329_v44, 0 }
 0x1c6   : > { %1309 = vadd.xlane.f32.xlu2 %v1062_v5  ;;  %v6303_v5 = vadd.s32 16, %v6288_v30 }
 0x1c7   : > { %1307 = vadd.xlane.f32.xlu1 %v1061_v3  ;;  %v6305_v3 = vpop.xlane.xlu1 %1133 }
 0x1c8   : > { %1305 = vadd.xlane.f32.xlu0 %v1060_v23  ;;  %8167 = vst [vmem:[#allocation63_spill] sm:$0xff] %v6305_v3  ;;  %v4964_v23 = vpop.eup %4963  ;;  %4591 = vset.pattern.permute.xlu1 %v6303_v5  ;;  %v6321_v53 = vpop.xlane.xlu2 %1159 }
 0x1c9   : > { %v1066_v26 = vmul.f32 %v6100_v55, %v4964_v23  ;;  %v4966_v10 = vpop.eup %4965  ;;  %v6325_v60 = vpop.xlane.xlu0 %1185 }
 0x1ca   : > { %v4968_v32 = vpop.eup %4967  ;;  %8172 = vst [vmem:[#allocation68_spill] sm:$0xff] %v6325_v60 }
 0x1ce   : > { %1315 = vadd.xlane.f32.xlu2 %v1065_v50  ;;  %v1070_v50 = vmul.f32 %v6100_v55, %v4966_v10 }
 0x1cf   : > { %1313 = vadd.xlane.f32.xlu1 %v1064_v52  ;;  %v6315_v38 = vpop.xlane.xlu1 %1139  ;;  %v1069_v52 = vmul.f32 %v6100_v55, %v4968_v32  ;;  %v6342_v55 = vperm.slane %v6329_v44, 3  ;;  %v6357_v32 = vadd.s32 40, %v6288_v30 }
 0x1d0   : > { %1311 = vadd.xlane.f32.xlu0 %v1063_v58  ;;  %8169 = vst [vmem:[#allocation65_spill] sm:$0xff] %v6315_v38  ;;  %v6334_v1 = vpop.xlane.xlu2 %1165 }
 0x1d1   : > { %v6338_v23 = vpop.xlane.xlu0 %1191 }
 0x1d2   : > { %8174 = vst [vmem:[#allocation70_spill] sm:$0xff] %v6338_v23  ;;  %v6369_v23 = vadd.s32 32, %v6288_v30 }
 0x1d6   : > { %1321 = vadd.xlane.f32.xlu2 %v1068_v24  ;;  %v6345_v24 = vadd.s32 24, %v6288_v30 }
 0x1d7   : > { %1319 = vadd.xlane.f32.xlu1 %v1067_v27  ;;  %v6323_v58 = vpop.xlane.xlu1 %1145 }
 0x1d8   : > { %1317 = vadd.xlane.f32.xlu0 %v1066_v26  ;;  %8171 = vst [vmem:[#allocation67_spill] sm:$0xff] %v6323_v58  ;;  %v6349_v27 = vpop.xlane.xlu2 %1171  ;;  %v6435_v58 = vadd.s32 88, %v6288_v30 }
 0x1d9   : > { %v6353_v10 = vpop.xlane.xlu0 %1197 }
 0x1da   : > { %8176 = vst [vmem:[#allocation72_spill] sm:$0xff] %v6353_v10  ;;  %v6375_v10 = vadd.s32 80, %v6288_v30 }
 0x1df   : > { %1325 = vadd.xlane.f32.xlu1 %v1070_v50  ;;  %v6336_v6 = vpop.xlane.xlu1 %1151 }
 0x1e0   : > { %1323 = vadd.xlane.f32.xlu0 %v1069_v52  ;;  %8173 = vst [vmem:[#allocation69_spill] sm:$0xff] %v6336_v6  ;;  %v6362_v50 = vpop.xlane.xlu2 %1177 }
 0x1e1   : > { %v6366_v25 = vpop.xlane.xlu0 %1203 }
 0x1e2   : > { %8178 = vst [vmem:[#allocation74_spill] sm:$0xff] %v6366_v25  ;;  %v6385_v25 = vadd.s32 56, %v6288_v30 }
 0x1e7   : > { %v6351_v26 = vpop.xlane.xlu1 %1157 }
 0x1e8   : > { %8175 = vst [vmem:[#allocation71_spill] sm:$0xff] %v6351_v26  ;;  %v6377_v60 = vpop.xlane.xlu2 %1183 }
 0x1e9   : > { %v6381_v18 = vpop.xlane.xlu0 %1209 }
 0x1ea   : > { %8180 = vst [vmem:[#allocation76_spill] sm:$0xff] %v6381_v18  ;;  %v6402_v18 = vadd.s32 120, %v6288_v30 }
 0x1ee   : > { %1721 = vperm.xlu2 %4590, %v6332_v63  }
 0x1ef   : > { %v6364_v52 = vpop.xlane.xlu1 %1163 }
 0x1f0   : > { %8177 = vst [vmem:[#allocation73_spill] sm:$0xff] %v6364_v52  ;;  %v6393_v15 = vpop.xlane.xlu2 %1189 }
 0x1f4   : > { %2012 = vperm.xlu0 %4629, %v6342_v55  }
 0x1f6   : > { %4592 = vset.pattern.permute.xlu2 %v6345_v24 }
 0x1f7   : > { %v6379_v43 = vpop.xlane.xlu1 %1169 }
 0x1f8   : > { %1733 = vperm.xlu1 %4591, %v6332_v63   ;;  %8179 = vst [vmem:[#allocation75_spill] sm:$0xff] %v6379_v43  ;;  %v6397_v43 = vpop.xlane.xlu0 %1215  ;;  %v6406_v12 = vpop.xlane.xlu2 %1195 }
 0x1f9   : > { %8182 = vst [vmem:[#allocation78_spill] sm:$0xff] %v6397_v43  ;;  %v6414_v43 = vadd.s32 72, %v6288_v30 }
 0x1fc   : > { %4634 = vset.pattern.permute.xlu0 %v6357_v32 }
 0x1fe   : > { %1739 = vperm.xlu2 %4592, %v6332_v63  }
 0x1ff   : > { %v6395_v52 = vpop.xlane.xlu1 %1175 }
 0x200   : > { %4594 = vset.pattern.permute.xlu1 %v6357_v32  ;;  %8181 = vst [vmem:[#allocation77_spill] sm:$0xff] %v6395_v52  ;;  %v6410_v49 = vpop.xlane.xlu0 %1221  ;;  %v6419_v52 = vpop.xlane.xlu2 %1201 }
 0x201   : > { %8184 = vst [vmem:[#allocation80_spill] sm:$0xff] %v6410_v49  ;;  %v6427_v49 = vadd.s32 96, %v6288_v30 }
 0x204   : > { %2042 = vperm.xlu0 %4634, %v6342_v55  }
 0x206   : > { %4593 = vset.pattern.permute.xlu2 %v6369_v23 }
 0x207   : > { %v6408_v26 = vpop.xlane.xlu1 %1181 }
 0x208   : > { %1751 = vperm.xlu1 %4594, %v6332_v63   ;;  %8183 = vst [vmem:[#allocation79_spill] sm:$0xff] %v6408_v26  ;;  %v6423_v4 = vpop.xlane.xlu0 %1227  ;;  %v6432_v26 = vperm.slane %v6329_v44, 4  ;;  %v6437_v48 = vpop.xlane.xlu2 %1207 }
 0x209   : > { %8186 = vst [vmem:[#allocation82_spill] sm:$0xff] %v6423_v4 }
 0x20c   : > { %4639 = vset.pattern.permute.xlu0 %v6375_v10 }
 0x20e   : > { %1745 = vperm.xlu2 %4593, %v6332_v63  }
 0x20f   : > { %v6421_v6 = vpop.xlane.xlu1 %1187 }
 0x210   : > { %4596 = vset.pattern.permute.xlu1 %v6385_v25  ;;  %8185 = vst [vmem:[#allocation81_spill] sm:$0xff] %v6421_v6  ;;  %v6441_v4 = vpop.xlane.xlu0 %1233  ;;  %v6447_v38 = vpop.xlane.xlu2 %1213 }
 0x211   : > { %8188 = vst [vmem:[#allocation84_spill] sm:$0xff] %v6441_v4  ;;  %v6456_v4 = vadd.s32 112, %v6288_v30 }
 0x214   : > { %2072 = vperm.xlu0 %4639, %v6342_v55  }
 0x216   : > { %4595 = vset.pattern.permute.xlu2 %v6390_v29 }
 0x217   : > { %v6439_v6 = vpop.xlane.xlu1 %1193 }
 0x218   : > { %1763 = vperm.xlu1 %4596, %v6332_v63   ;;  %8187 = vst [vmem:[#allocation83_spill] sm:$0xff] %v6439_v6  ;;  %v6451_v3 = vpop.xlane.xlu0 %1239  ;;  %v6460_v6 = vpop.xlane.xlu2 %1219 }
 0x219   : > { %8190 = vst [vmem:[#allocation86_spill] sm:$0xff] %v6451_v3  ;;  %v6469_v3 = vadd.s32 8, %v6288_v30 }
 0x21c   : > { %4644 = vset.pattern.permute.xlu0 %v6402_v18 }
 0x21e   : > { %1757 = vperm.xlu2 %4595, %v6332_v63  }
 0x21f   : > { %v6449_v21 = vpop.xlane.xlu1 %1199 }
 0x220   : > { %4598 = vset.pattern.permute.xlu1 %v6375_v10  ;;  %8189 = vst [vmem:[#allocation85_spill] sm:$0xff] %v6449_v21  ;;  %v6464_v28 = vpop.xlane.xlu0 %1245  ;;  %v6473_v21 = vpop.xlane.xlu2 %1225 }
 0x221   : > { %8192 = vst [vmem:[#allocation88_spill] sm:$0xff] %v6464_v28  ;;  %v6481_v28 = vperm.slane %v6329_v44, 1 }
 0x224   : > { %2102 = vperm.xlu0 %4644, %v6342_v55  }
 0x226   : > { %4597 = vset.pattern.permute.xlu2 %v6414_v43 }
 0x227   : > { %v6462_v62 = vpop.xlane.xlu1 %1205 }
 0x228   : > { %1781 = vperm.xlu1 %4598, %v6332_v63   ;;  %8191 = vst [vmem:[#allocation87_spill] sm:$0xff] %v6462_v62  ;;  %v6477_v51 = vpop.xlane.xlu0 %1251  ;;  %v6485_v62 = vpop.xlane.xlu2 %1231 }
 0x229   : > { %8194 = vst [vmem:[#allocation90_spill] sm:$0xff] %v6477_v51  ;;  %v6495_v51 = vperm.slane %v6329_v44, 5 }
 0x22c   : > { %4649 = vset.pattern.permute.xlu0 %v6369_v23 }
 0x22e   : > { %1775 = vperm.xlu2 %4597, %v6332_v63  }
 0x22f   : > { %v6475_v37 = vpop.xlane.xlu1 %1211 }
 0x230   : > { %4600 = vset.pattern.permute.xlu1 %v6427_v49  ;;  %8193 = vst [vmem:[#allocation89_spill] sm:$0xff] %v6475_v37  ;;  %v6489_v9 = vpop.xlane.xlu0 %1257  ;;  %v6498_v37 = vpop.xlane.xlu2 %1237 }
 0x231   : > { %8196 = vst [vmem:[#allocation92_spill] sm:$0xff] %v6489_v9  ;;  %v6507_v9 = vadd.s32 64, %v6288_v30 }
 0x234   : > { %2133 = vperm.xlu0 %4649, %v6432_v26  }
 0x236   : > { %4599 = vset.pattern.permute.xlu2 %v6435_v58 }
 0x237   : > { %v6487_v57 = vpop.xlane.xlu1 %1217 }
 0x238   : > { %1793 = vperm.xlu1 %4600, %v6332_v63   ;;  %8195 = vst [vmem:[#allocation91_spill] sm:$0xff] %v6487_v57  ;;  %v6502_v45 = vpop.xlane.xlu0 %1263  ;;  %v6511_v57 = vpop.xlane.xlu2 %1243 }
 0x239   : > { %8198 = vst [vmem:[#allocation94_spill] sm:$0xff] %v6502_v45 }
 0x23a   : > { %8199 = vst [vmem:[#allocation95_spill] sm:$0xff] %v6511_v57 }
 0x23c   : > { %4654 = vset.pattern.permute.xlu0 %v6414_v43 }
 0x23e   : > { %1787 = vperm.xlu2 %4599, %v6332_v63  }
 0x23f   : > { %v6500_v16 = vpop.xlane.xlu1 %1223 }
 0x240   : > { %4602 = vset.pattern.permute.xlu1 %v6402_v18  ;;  %8197 = vst [vmem:[#allocation93_spill] sm:$0xff] %v6500_v16  ;;  %v6515_v14 = vpop.xlane.xlu0 %1269  ;;  %v6521_v45 = vpop.xlane.xlu2 %1249 }
 0x241   : > { %8201 = vst [vmem:[#allocation97_spill] sm:$0xff] %v6515_v14  ;;  %v6531_v14 = vadd.s32 104, %v6288_v30 }
 0x242   : > { %8202 = vst [vmem:[#allocation98_spill] sm:$0xff] %v6521_v45 }
 0x244   : > { %2163 = vperm.xlu0 %4654, %v6432_v26  }
 0x246   : > { %4601 = vset.pattern.permute.xlu2 %v6456_v4 }
 0x247   : > { %v6513_v39 = vpop.xlane.xlu1 %1229 }
 0x248   : > { %1811 = vperm.xlu1 %4602, %v6332_v63   ;;  %8200 = vst [vmem:[#allocation96_spill] sm:$0xff] %v6513_v39  ;;  %v6525_v22 = vpop.xlane.xlu0 %1275  ;;  %v6533_v39 = vpop.xlane.xlu2 %1255 }
 0x249   : > { %8204 = vst [vmem:[#allocation100_spill] sm:$0xff] %v6525_v22 }
 0x24a   : > { %8205 = vst [vmem:[#allocation101_spill] sm:$0xff] %v6533_v39 }
 0x24c   : > { %4659 = vset.pattern.permute.xlu0 %v6456_v4 }
 0x24e   : > { %1805 = vperm.xlu2 %4601, %v6332_v63  }
 0x24f   : > { %v6523_v16 = vpop.xlane.xlu1 %1235 }
 0x250   : > { %4604 = vset.pattern.permute.xlu1 %v6469_v3  ;;  %8203 = vst [vmem:[#allocation99_spill] sm:$0xff] %v6523_v16  ;;  %v6537_v2 = vpop.xlane.xlu0 %1281  ;;  %v6543_v22 = vpop.xlane.xlu2 %1261 }
 0x251   : > { %8207 = vst [vmem:[#allocation103_spill] sm:$0xff] %v6537_v2 }
 0x252   : > { %8208 = vst [vmem:[#allocation104_spill] sm:$0xff] %v6543_v22 }
 0x254   : > { %2193 = vperm.xlu0 %4659, %v6432_v26  }
 0x256   : > { %4603 = vset.pattern.permute.xlu2 %v6288_v30 }
 0x257   : > { %v6535_v46 = vpop.xlane.xlu1 %1241 }
 0x258   : > { %1824 = vperm.xlu1 %4604, %v6481_v28   ;;  %8206 = vst [vmem:[#allocation102_spill] sm:$0xff] %v6535_v46  ;;  %v6547_v20 = vpop.xlane.xlu0 %1287  ;;  %v6553_v2 = vpop.xlane.xlu2 %1267 }
 0x259   : > { %8210 = vst [vmem:[#allocation106_spill] sm:$0xff] %v6547_v20 }
 0x25a   : > { %8211 = vst [vmem:[#allocation107_spill] sm:$0xff] %v6553_v2  ;;  %v6698_v2 = vstv %s4438_s7 }
 0x25b   : > { %v1335_v45 = vadd.f32 %v6698_v2, %v6096_v54  ;;  %v8109_v54 = vmov 0  }
 0x25c   : > { %4664 = vset.pattern.permute.xlu0 %v6345_v24 }
 0x25e   : > { %1818 = vperm.xlu2 %4603, %v6481_v28  }
 0x25f   : > { %v6545_v16 = vpop.xlane.xlu1 %1247 }
 0x260   : > { %4606 = vset.pattern.permute.xlu1 %v6369_v23  ;;  %8209 = vst [vmem:[#allocation105_spill] sm:$0xff] %v6545_v16  ;;  %v6557_v47 = vpop.xlane.xlu0 %1293  ;;  %v6563_v20 = vpop.xlane.xlu2 %1273 }
 0x261   : > { %8213 = vst [vmem:[#allocation109_spill] sm:$0xff] %v6557_v47  ;;  %v6573_v47 = vperm.slane %v6329_v44, 6 }
 0x262   : > { %8214 = vst [vmem:[#allocation110_spill] sm:$0xff] %v6563_v20 }
 0x264   : > { %2224 = vperm.xlu0 %4664, %v6495_v51  }
 0x266   : > { %4605 = vset.pattern.permute.xlu2 %v6345_v24 }
 0x267   : > { %v6555_v46 = vpop.xlane.xlu1 %1253 }
 0x268   : > { %1842 = vperm.xlu1 %4606, %v6481_v28   ;;  %8212 = vst [vmem:[#allocation108_spill] sm:$0xff] %v6555_v46  ;;  %v6567_v61 = vpop.xlane.xlu0 %1299  ;;  %v6575_v46 = vpop.xlane.xlu2 %1279 }
 0x269   : > { %8216 = vst [vmem:[#allocation112_spill] sm:$0xff] %v6567_v61  ;;  %v6586_v61 = vperm.slane %v6329_v44, 2 }
 0x26a   : > { %8217 = vst [vmem:[#allocation113_spill] sm:$0xff] %v6575_v46 }
 0x26c   : > { %4665 = vset.pattern.permute.xlu0 %v6507_v9 }
 0x26e   : > { %1836 = vperm.xlu2 %4605, %v6481_v28  }
 0x26f   : > { %v6565_v16 = vpop.xlane.xlu1 %1259 }
 0x270   : > { %4608 = vset.pattern.permute.xlu1 %v6390_v29  ;;  %8215 = vst [vmem:[#allocation111_spill] sm:$0xff] %v6565_v16  ;;  %v6579_v36 = vpop.xlane.xlu0 %1305  ;;  %v6588_v16 = vpop.xlane.xlu2 %1285 }
 0x271   : > { %8219 = vst [vmem:[#allocation115_spill] sm:$0xff] %v6579_v36 }
 0x272   : > { %8220 = vst [vmem:[#allocation116_spill] sm:$0xff] %v6588_v16 }
 0x274   : > { %1769 = vperm.xlu0 %4665, %v6332_v63  }
 0x276   : > { %4607 = vset.pattern.permute.xlu2 %v6357_v32 }
 0x277   : > { %v6577_v35 = vpop.xlane.xlu1 %1265 }
 0x278   : > { %1854 = vperm.xlu1 %4608, %v6481_v28   ;;  %8218 = vst [vmem:[#allocation114_spill] sm:$0xff] %v6577_v35  ;;  %v6592_v59 = vpop.xlane.xlu0 %1311  ;;  %v6598_v36 = vpop.xlane.xlu2 %1291 }
 0x279   : > { %8222 = vst [vmem:[#allocation118_spill] sm:$0xff] %v6592_v59 }
 0x27a   : > { %8223 = vst [vmem:[#allocation119_spill] sm:$0xff] %v6598_v36 }
 0x27c   : > { %2254 = vperm.xlu0 %4665, %v6495_v51  }
 0x27e   : > { %1848 = vperm.xlu2 %4607, %v6481_v28  }
 0x27f   : > { %v6590_v33 = vpop.xlane.xlu1 %1271 }
 0x280   : > { %4610 = vset.pattern.permute.xlu1 %v6414_v43  ;;  %8221 = vst [vmem:[#allocation117_spill] sm:$0xff] %v6590_v33  ;;  %v6602_v46 = vpop.xlane.xlu0 %1317  ;;  %v6608_v59 = vpop.xlane.xlu2 %1297 }
 0x281   : > { %8225 = vst [vmem:[#allocation121_spill] sm:$0xff] %v6602_v46 }
 0x282   : > { %8226 = vst [vmem:[#allocation122_spill] sm:$0xff] %v6608_v59 }
 0x284   : > { %4670 = vset.pattern.permute.xlu0 %v6531_v14 }
 0x286   : > { %4609 = vset.pattern.permute.xlu2 %v6507_v9 }
 0x287   : > { %v6600_v35 = vpop.xlane.xlu1 %1277 }
 0x288   : > { %1872 = vperm.xlu1 %4610, %v6481_v28   ;;  %8224 = vst [vmem:[#allocation120_spill] sm:$0xff] %v6600_v35  ;;  %v6612_v16 = vpop.xlane.xlu0 %1323  ;;  %v6617_v46 = vpop.xlane.xlu2 %1303 }
 0x289   : > { %8228 = vst [vmem:[#allocation124_spill] sm:$0xff] %v6612_v16 }
 0x28a   : > { %8229 = vst [vmem:[#allocation125_spill] sm:$0xff] %v6617_v46 }
 0x28c   : > { %1799 = vperm.xlu0 %4670, %v6332_v63  }
 0x28e   : > { %1866 = vperm.xlu2 %4609, %v6481_v28  }
 0x28f   : > { %v6610_v33 = vpop.xlane.xlu1 %1283 }
 0x290   : > { %4612 = vset.pattern.permute.xlu1 %v6435_v58  ;;  %8227 = vst [vmem:[#allocation123_spill] sm:$0xff] %v6610_v33  ;;  %v6621_v36 = vpop.permute.xlu0 %2012  ;;  %v6627_v16 = vpop.xlane.xlu2 %1309 }
 0x291   : > { %8231 = vst [vmem:[#allocation127_spill] sm:$0xff] %v6621_v36 }
 0x292   : > { %8232 = vst [vmem:[#allocation128_spill] sm:$0xff] %v6627_v16 }
 0x294   : > { %2284 = vperm.xlu0 %4670, %v6495_v51  }
 0x296   : > { %4611 = vset.pattern.permute.xlu2 %v6375_v10 }
 0x297   : > { %v6619_v35 = vpop.xlane.xlu1 %1289 }
 0x298   : > { %1884 = vperm.xlu1 %4612, %v6481_v28   ;;  %8230 = vst [vmem:[#allocation126_spill] sm:$0xff] %v6619_v35  ;;  %v6631_v59 = vpop.permute.xlu0 %2042 }
 0x29c   : > { %4675 = vset.pattern.permute.xlu0 %v6303_v5 }
 0x29e   : > { %1878 = vperm.xlu2 %4611, %v6481_v28  }
 0x29f   : > { %v6629_v33 = vpop.xlane.xlu1 %1295 }
 0x2a0   : > { %4614 = vset.pattern.permute.xlu1 %v6456_v4  ;;  %8233 = vst [vmem:[#allocation129_spill] sm:$0xff] %v6629_v33  ;;  %v6636_v35 = vpop.permute.xlu0 %2072 }
 0x2a1   : > { %8234 = vst [vmem:[#allocation130_spill] sm:$0xff] %v6636_v35 }
 0x2a4   : > { %1830 = vperm.xlu0 %4675, %v6481_v28  }
 0x2a6   : > { %4613 = vset.pattern.permute.xlu2 %v6531_v14 }
 0x2a7   : > { %v6641_v36 = vpop.xlane.xlu1 %1301 }
 0x2a8   : > { %1902 = vperm.xlu1 %4614, %v6481_v28   ;;  %8236 = vst [vmem:[#allocation132_spill] sm:$0xff] %v6641_v36  ;;  %v6645_v33 = vpop.permute.xlu0 %2102 }
 0x2a9   : > { %8237 = vst [vmem:[#allocation133_spill] sm:$0xff] %v6645_v33 }
 0x2ac   : > { %2315 = vperm.xlu0 %4675, %v6573_v47  }
 0x2ae   : > { %1896 = vperm.xlu2 %4613, %v6481_v28  }
 0x2af   : > { %v6651_v46 = vpop.xlane.xlu1 %1307 }
 0x2b0   : > { %4616 = vset.pattern.permute.xlu1 %v6288_v30  ;;  %8239 = vst [vmem:[#allocation135_spill] sm:$0xff] %v6651_v46  ;;  %v6655_v35 = vpop.permute.xlu0 %2133 }
 0x2b4   : > { %4680 = vset.pattern.permute.xlu0 %v6385_v25 }
 0x2b6   : > { %4615 = vset.pattern.permute.xlu2 %v6402_v18 }
 0x2b7   : > { %v6661_v33 = vpop.xlane.xlu1 %1313 }
 0x2b8   : > { %1915 = vperm.xlu1 %4616, %v6586_v61   ;;  %8240 = vst [vmem:[#allocation136_spill] sm:$0xff] %v6661_v33 }
 0x2bc   : > { %1860 = vperm.xlu0 %4680, %v6481_v28  }
 0x2be   : > { %1908 = vperm.xlu2 %4615, %v6481_v28  }
 0x2c0   : > { %4618 = vset.pattern.permute.xlu1 %v6345_v24 }
 0x2c4   : > { %2345 = vperm.xlu0 %4680, %v6573_v47  }
 0x2c6   : > { %4617 = vset.pattern.permute.xlu2 %v6303_v5 }
 0x2c8   : > { %1933 = vperm.xlu1 %4618, %v6586_v61  }
 0x2cc   : > { %4685 = vset.pattern.permute.xlu0 %v6427_v49 }
 0x2ce   : > { %1927 = vperm.xlu2 %4617, %v6586_v61  }
 0x2d0   : > { %4620 = vset.pattern.permute.xlu1 %v6357_v32 }
 0x2d4   : > { %1890 = vperm.xlu0 %4685, %v6481_v28   ;;  %v6639_v28 = vpop.xlane.xlu2 %1315 }
 0x2d5   : > { %8235 = vst [vmem:[#allocation131_spill] sm:$0xff] %v6639_v28  ;;  %v6671_v28 = vpop.xlane.xlu1 %1319 }
 0x2d6   : > { %4619 = vset.pattern.permute.xlu2 %v6369_v23  ;;  %8243 = vst [vmem:[#allocation139_spill] sm:$0xff] %v6671_v28 }
 0x2d8   : > { %1945 = vperm.xlu1 %4620, %v6586_v61  }
 0x2dc   : > { %2375 = vperm.xlu0 %4685, %v6573_v47   ;;  %v6649_v16 = vpop.xlane.xlu2 %1321 }
 0x2dd   : > { %8238 = vst [vmem:[#allocation134_spill] sm:$0xff] %v6649_v16  ;;  %v6665_v16 = vpop.permute.xlu0 %2163 }
 0x2de   : > { %1939 = vperm.xlu2 %4619, %v6586_v61   ;;  %8241 = vst [vmem:[#allocation137_spill] sm:$0xff] %v6665_v16  ;;  %v6681_v16 = vpop.xlane.xlu1 %1325 }
 0x2df   : > { %8246 = vst [vmem:[#allocation142_spill] sm:$0xff] %v6681_v16 }
 0x2e0   : > { %4622 = vset.pattern.permute.xlu1 %v6507_v9 }
 0x2e4   : > { %4690 = vset.pattern.permute.xlu0 %v6469_v3  ;;  %v1722_v36 = vpop.permute.xlu2 %1721 }
 0x2e6   : > { %4621 = vset.pattern.permute.xlu2 %v6385_v25 }
 0x2e8   : > { %1963 = vperm.xlu1 %4622, %v6586_v61  }
 0x2ec   : > { %1727 = vperm.xlu0 %4690, %v6332_v63   ;;  %v6659_v63 = vperm.slane %v6329_v44, 7  ;;  %v6669_v46 = vpop.permute.xlu2 %1739  ;;  %v6674_v44 = vpop.permute.xlu0 %2193 }
 0x2ed   : > { %8242 = vst [vmem:[#allocation138_spill] sm:$0xff] %v6669_v46 }
 0x2ee   : > { %1957 = vperm.xlu2 %4621, %v6586_v61   ;;  %8244 = vst [vmem:[#allocation140_spill] sm:$0xff] %v6674_v44  ;;  %v6690_v44 = vpop.permute.xlu1 %1733 }
 0x2ef   : > { %8249 = vst [vmem:[#allocation145_spill] sm:$0xff] %v6690_v44 }
 0x2f0   : > { %4624 = vset.pattern.permute.xlu1 %v6375_v10 }
 0x2f4   : > { %1921 = vperm.xlu0 %4690, %v6586_v61   ;;  %v6678_v33 = vpop.permute.xlu2 %1745  ;;  %v6684_v20 = vpop.permute.xlu0 %2224 }
 0x2f5   : > { %8245 = vst [vmem:[#allocation141_spill] sm:$0xff] %v6678_v33 }
 0x2f6   : > { %4623 = vset.pattern.permute.xlu2 %v6414_v43  ;;  %8247 = vst [vmem:[#allocation143_spill] sm:$0xff] %v6684_v20  ;;  %v1752_v33 = vpop.permute.xlu1 %1751 }
 0x2f8   : > { %1975 = vperm.xlu1 %4624, %v6586_v61  }
 0x2fc   : > { %2406 = vperm.xlu0 %4690, %v6659_v63   ;;  %v6687_v28 = vpop.permute.xlu2 %1757  ;;  %v1770_v46 = vpop.permute.xlu0 %1769 }
 0x2fd   : > { %8248 = vst [vmem:[#allocation144_spill] sm:$0xff] %v6687_v28  ;;  %v1330_v28 = vadd.f32 %v6698_v2, %v6014_v17 }
 0x2fe   : > { %1969 = vperm.xlu2 %4623, %v6586_v61   ;;  %v6706_v39 = vpop.permute.xlu1 %1763 }
 0x2ff   : > { %v1458_v44 = vmul.f32 1.442695, %v1330_v28  ;;  %8252 = vst [vmem:[#allocation148_spill] sm:$0xff] %v6706_v39 }
 0x300   : > { %4626 = vset.pattern.permute.xlu1 %v6531_v14 }
 0x301   : > { %4969 = vpow2.f32 %v1458_v44  ;;  %v1338_v44 = vadd.f32 %v6698_v2, %v6113_v13  ;;  %v1341_v13 = vadd.f32 %v6698_v2, %v6132_v31 }
 0x304   : > { %4695 = vset.pattern.permute.xlu0 %v6390_v29  ;;  %v6695_v16 = vpop.permute.xlu2 %1775  ;;  %v6702_v22 = vpop.permute.xlu0 %2254 }
 0x305   : > { %8250 = vst [vmem:[#allocation146_spill] sm:$0xff] %v6695_v16 }
 0x306   : > { %4625 = vset.pattern.permute.xlu2 %v6427_v49  ;;  %8251 = vst [vmem:[#allocation147_spill] sm:$0xff] %v6702_v22  ;;  %v6715_v28 = vpop.permute.xlu1 %1781 }
 0x307   : > { %v4970_v17 = vpop.eup %4969  ;;  %8254 = vst [vmem:[#allocation150_spill] sm:$0xff] %v6715_v28 }
 0x308   : > { %1993 = vperm.xlu1 %4626, %v6586_v61   ;;  %v2620_v39 = vmul.f32 %v4970_v17, %v1722_v36 }
 0x30c   : > { %1951 = vperm.xlu0 %4695, %v6586_v61   ;;  %v1788_v16 = vpop.permute.xlu2 %1787  ;;  %v6711_v57 = vpop.permute.xlu0 %1799 }
 0x30d   : > { %8253 = vst [vmem:[#allocation149_spill] sm:$0xff] %v6711_v57  ;;  %v1474_v57 = vmul.f32 1.442695, %v1338_v44 }
 0x30e   : > { %1987 = vperm.xlu2 %4625, %v6586_v61  }
 0x310   : > { %4628 = vset.pattern.permute.xlu1 %v6402_v18 }
 0x314   : > { %2436 = vperm.xlu0 %4695, %v6659_v63   ;;  %v1806_v22 = vpop.permute.xlu2 %1805  ;;  %v6720_v20 = vpop.permute.xlu0 %2284 }
 0x315   : > { %8255 = vst [vmem:[#allocation151_spill] sm:$0xff] %v6720_v20 }
 0x316   : > { %4627 = vset.pattern.permute.xlu2 %v6456_v4 }
 0x318   : > { %2005 = vperm.xlu1 %4628, %v6586_v61  }
 0x31c   : > { %4700 = vset.pattern.permute.xlu0 %v6435_v58  ;;  %v6727_v28 = vpop.permute.xlu2 %1818 }
 0x31d   : > { %8256 = vst [vmem:[#allocation152_spill] sm:$0xff] %v6727_v28 }
 0x31e   : > { %1999 = vperm.xlu2 %4627, %v6586_v61  }
 0x320   : > { %4631 = vset.pattern.permute.xlu1 %v6303_v5 }
 0x324   : > { %1981 = vperm.xlu0 %4700, %v6586_v61   ;;  %v1468_v61 = vmul.f32 1.442695, %v1335_v45  ;;  %v6724_v45 = vpop.permute.xlu1 %1793  ;;  %v6737_v44 = vpop.permute.xlu2 %1836 }
 0x325   : > { %8258 = vst [vmem:[#allocation154_spill] sm:$0xff] %v6737_v44 }
 0x326   : > { %4630 = vset.pattern.permute.xlu2 %v6469_v3  ;;  %4971 = vpow2.f32 %v1468_v61  ;;  %v6731_v61 = vpop.permute.xlu0 %1830 }
 0x327   : > { %4973 = vpow2.f32 %v1474_v57  ;;  %8257 = vst [vmem:[#allocation153_spill] sm:$0xff] %v6731_v61 }
 0x328   : > { %2024 = vperm.xlu1 %4631, %v6342_v55  }
 0x32c   : > { %2466 = vperm.xlu0 %4700, %v6659_v63   ;;  %v4972_v36 = vpop.eup %4971 }
 0x32d   : > { %v2625_v17 = vmul.f32 %v4972_v36, %v1752_v33  ;;  %v4974_v20 = vpop.eup %4973  ;;  %v1344_v33 = vadd.f32 %v6698_v2, %v6155_v56 }
 0x32e   : > { %2018 = vperm.xlu2 %4630, %v6342_v55   ;;  %v2628_v28 = vmul.f32 %v4974_v20, %v1770_v46  ;;  %v6742_v36 = vpop.permute.xlu0 %2315  ;;  %v1347_v20 = vadd.f32 %v6698_v2, %v6171_v19 }
 0x32f   : > { %v1486_v57 = vmul.f32 1.442695, %v1344_v33 }
 0x330   : > { %4633 = vset.pattern.permute.xlu1 %v6369_v23  ;;  %v1492_v56 = vmul.f32 1.442695, %v1347_v20 }
 0x334   : > { %4709 = vset.pattern.permute.xlu0 %v8109_v54  ;;  %v6734_v54 = vpop.permute.xlu1 %1811 }
 0x335   : > { %2877 = vperm.xlu0 %4709, %v2620_v39   ;;  %v1480_v39 = vmul.f32 1.442695, %v1341_v13 }
 0x336   : > { %4632 = vset.pattern.permute.xlu2 %v6345_v24 }
 0x337   : > { %4975 = vpow2.f32 %v1480_v39 }
 0x338   : > { %2036 = vperm.xlu1 %4633, %v6342_v55   ;;  %4977 = vpow2.f32 %v1486_v57 }
 0x339   : > { %4979 = vpow2.f32 %v1492_v56 }
 0x33c   : > { %v1825_v31 = vpop.permute.xlu1 %1824 }
 0x33d   : > { %2892 = vperm.xlu0 %4709, %v2625_v17   ;;  %v6745_v17 = vpop.permute.xlu2 %1848  ;;  %v4976_v13 = vpop.eup %4975 }
 0x33e   : > { %2030 = vperm.xlu2 %4632, %v6342_v55   ;;  %v2631_v61 = vmul.f32 %v4976_v13, %v1788_v16  ;;  %v4978_v39 = vpop.eup %4977  ;;  %v1350_v16 = vadd.f32 %v6698_v2, %v6188_v42 }
 0x33f   : > { %v2634_v33 = vmul.f32 %v4978_v39, %v1806_v22  ;;  %v4980_v57 = vpop.eup %4979  ;;  %v1353_v22 = vadd.f32 %v6698_v2, %v6207_v8 }
 0x340   : > { %4636 = vset.pattern.permute.xlu1 %v6385_v25  ;;  %v1498_v19 = vmul.f32 1.442695, %v1350_v16  ;;  %v2637_v20 = vmul.f32 %v4980_v57, %v1825_v31  ;;  %v1356_v31 = vadd.f32 %v6698_v2, %v6227_v40 }
 0x341   : > { %v1504_v42 = vmul.f32 1.442695, %v1353_v22 }
 0x342   : > { %4981 = vpow2.f32 %v1498_v19  ;;  %v1510_v8 = vmul.f32 1.442695, %v1356_v31 }
 0x343   : > { %4983 = vpow2.f32 %v1504_v42 }
 0x344   : > { %v1843_v46 = vpop.permute.xlu1 %1842  ;;  %4985 = vpow2.f32 %v1510_v8 }
 0x345   : > { %2901 = vperm.xlu0 %4709, %v2628_v28   ;;  %v1861_v28 = vpop.permute.xlu0 %1860  ;;  %v6751_v44 = vpop.permute.xlu2 %1866 }
 0x346   : > { %4635 = vset.pattern.permute.xlu2 %v6390_v29  ;;  %8259 = vst [vmem:[#allocation155_spill] sm:$0xff] %v6751_v44 }
 0x348   : > { %2054 = vperm.xlu1 %4636, %v6342_v55  }
 0x34d   : > { %2910 = vperm.xlu0 %4709, %v2631_v61   ;;  %v6756_v61 = vpop.permute.xlu1 %1854  ;;  %v6759_v13 = vpop.permute.xlu0 %2345 }
 0x34e   : > { %2048 = vperm.xlu2 %4635, %v6342_v55   ;;  %8260 = vst [vmem:[#allocation156_spill] sm:$0xff] %v6759_v13  ;;  %v1879_v56 = vpop.permute.xlu2 %1878 }
 0x350   : > { %4638 = vset.pattern.permute.xlu1 %v6414_v43 }
 0x355   : > { %2919 = vperm.xlu0 %4709, %v2634_v33   ;;  %v6764_v39 = vpop.permute.xlu1 %1872  ;;  %v4982_v33 = vpop.eup %4981 }
 0x356   : > { %4637 = vset.pattern.permute.xlu2 %v6507_v9  ;;  %v6767_v16 = vpop.permute.xlu0 %1890  ;;  %v2640_v44 = vmul.f32 %v4982_v33, %v1843_v46  ;;  %v1897_v19 = vpop.permute.xlu2 %1896  ;;  %v1359_v46 = vadd.f32 %v6698_v2, %v6243_v7 }
 0x358   : > { %2066 = vperm.xlu1 %4638, %v6342_v55   ;;  %v1516_v40 = vmul.f32 1.442695, %v1359_v46 }
 0x35a   : > { %4987 = vpow2.f32 %v1516_v40 }
 0x35d   : > { %2928 = vperm.xlu0 %4709, %v2637_v20   ;;  %v6772_v57 = vpop.permute.xlu1 %1884  ;;  %v4984_v20 = vpop.eup %4983 }
 0x35e   : > { %2060 = vperm.xlu2 %4637, %v6342_v55   ;;  %v6775_v22 = vpop.permute.xlu0 %2375  ;;  %v2643_v13 = vmul.f32 %v4984_v20, %v1861_v28  ;;  %v6779_v42 = vpop.permute.xlu2 %1908  ;;  %v1362_v28 = vadd.f32 %v6698_v2, %v6260_v41 }
 0x35f   : > { %8261 = vst [vmem:[#allocation157_spill] sm:$0xff] %v6775_v22  ;;  %v4986_v33 = vpop.eup %4985 }
 0x360   : > { %4641 = vset.pattern.permute.xlu1 %v6427_v49  ;;  %v2646_v31 = vmul.f32 %v4986_v33, %v1879_v56  ;;  %v1522_v7 = vmul.f32 1.442695, %v1362_v28  ;;  %v4988_v46 = vpop.eup %4987  ;;  %v1365_v56 = vadd.f32 %v6698_v2, %v6279_v34 }
 0x361   : > { %v2649_v22 = vmul.f32 %v4988_v46, %v1897_v19  ;;  %v1368_v19 = vadd.f32 %v6698_v2, %v6299_v0 }
 0x362   : > { %4989 = vpow2.f32 %v1522_v7  ;;  %v1528_v33 = vmul.f32 1.442695, %v1365_v56 }
 0x364   : > { %4991 = vpow2.f32 %v1528_v33 }
 0x365   : > { %2937 = vperm.xlu0 %4709, %v2640_v44   ;;  %v6782_v44 = vpop.permute.xlu1 %1902 }
 0x366   : > { %4640 = vset.pattern.permute.xlu2 %v6435_v58  ;;  %v6787_v8 = vpop.permute.xlu0 %1727  ;;  %v6789_v20 = vpop.permute.xlu2 %1927 }
 0x367   : > { %8262 = vst [vmem:[#allocation158_spill] sm:$0xff] %v6789_v20 }
 0x368   : > { %2084 = vperm.xlu1 %4641, %v6342_v55   ;;  %v4990_v28 = vpop.eup %4989 }
 0x36d   : > { %2946 = vperm.xlu0 %4709, %v2643_v13   ;;  %v1916_v13 = vpop.permute.xlu1 %1915 }
 0x36e   : > { %2078 = vperm.xlu2 %4640, %v6342_v55   ;;  %v6795_v40 = vpop.permute.xlu2 %1939  ;;  %v6797_v41 = vpop.permute.xlu0 %1921  ;;  %v2652_v20 = vmul.f32 %v4990_v28, %v1916_v13  ;;  %v1371_v13 = vadd.f32 %v6698_v2, %v6313_v11 }
 0x370   : > { %4643 = vset.pattern.permute.xlu1 %v6456_v4 }
 0x375   : > { %2955 = vperm.xlu0 %4709, %v2646_v31   ;;  %v1934_v31 = vpop.permute.xlu1 %1933 }
 0x376   : > { %4642 = vset.pattern.permute.xlu2 %v6531_v14  ;;  %v6804_v34 = vpop.permute.xlu2 %1957  ;;  %v6808_v46 = vpop.permute.xlu0 %2406 }
 0x377   : > { %8263 = vst [vmem:[#allocation159_spill] sm:$0xff] %v6804_v34 }
 0x378   : > { %2096 = vperm.xlu1 %4643, %v6342_v55  }
 0x37d   : > { %2964 = vperm.xlu0 %4709, %v2649_v22   ;;  %v1534_v22 = vmul.f32 1.442695, %v1368_v19  ;;  %v6806_v7 = vpop.permute.xlu1 %1945 }
 0x37e   : > { %2090 = vperm.xlu2 %4642, %v6342_v55   ;;  %v4992_v55 = vpop.eup %4991  ;;  %v1970_v0 = vpop.permute.xlu2 %1969 }
 0x37f   : > { %v2655_v56 = vmul.f32 %v4992_v55, %v1934_v31  ;;  %4993 = vpow2.f32 %v1534_v22  ;;  %v1952_v28 = vpop.permute.xlu0 %1951  ;;  %v1374_v31 = vadd.f32 %v6698_v2, %v6321_v53 }
 0x380   : > { %4646 = vset.pattern.permute.xlu1 %v6469_v3 }
 0x381   : > { %v1546_v11 = vmul.f32 1.442695, %v1374_v31 }
 0x385   : > { %2973 = vperm.xlu0 %4709, %v2652_v20   ;;  %v1540_v20 = vmul.f32 1.442695, %v1371_v13  ;;  %v6814_v33 = vpop.permute.xlu1 %1963  ;;  %v4994_v19 = vpop.eup %4993 }
 0x386   : > { %4645 = vset.pattern.permute.xlu2 %v6288_v30  ;;  %8264 = vst [vmem:[#allocation160_spill] sm:$0xff] %v6814_v33  ;;  %v2658_v34 = vmul.f32 %v4994_v19, %v1952_v28  ;;  %v1988_v22 = vpop.permute.xlu2 %1987  ;;  %v1377_v33 = vadd.f32 %v6698_v2, %v6334_v1 }
 0x387   : > { %4995 = vpow2.f32 %v1540_v20 }
 0x388   : > { %2115 = vperm.xlu1 %4646, %v6432_v26   ;;  %4997 = vpow2.f32 %v1546_v11  ;;  %v1552_v20 = vmul.f32 1.442695, %v1377_v33 }
 0x38a   : > { %4999 = vpow2.f32 %v1552_v20 }
 0x38d   : > { %2982 = vperm.xlu0 %4709, %v2655_v56   ;;  %v6820_v55 = vpop.permute.xlu1 %1975  ;;  %v4996_v56 = vpop.eup %4995 }
 0x38e   : > { %2109 = vperm.xlu2 %4645, %v6432_v26   ;;  %v2661_v13 = vmul.f32 %v4996_v56, %v1970_v0  ;;  %v6826_v53 = vpop.permute.xlu2 %1999  ;;  %v4998_v28 = vpop.eup %4997  ;;  %v1380_v0 = vadd.f32 %v6698_v2, %v6349_v27 }
 0x38f   : > { %v2664_v19 = vmul.f32 %v4998_v28, %v1988_v22 }
 0x390   : > { %4648 = vset.pattern.permute.xlu1 %v6345_v24  ;;  %v1558_v1 = vmul.f32 1.442695, %v1380_v0  ;;  %v5000_v33 = vpop.eup %4999  ;;  %v1386_v0 = vadd.f32 %v6698_v2, %v6377_v60 }
 0x392   : > { %5001 = vpow2.f32 %v1558_v1  ;;  %v1570_v1 = vmul.f32 1.442695, %v1386_v0 }
 0x395   : > { %2991 = vperm.xlu0 %4709, %v2658_v34   ;;  %v6828_v34 = vpop.permute.xlu1 %1993 }
 0x396   : > { %4647 = vset.pattern.permute.xlu2 %v6303_v5  ;;  %v6834_v31 = vpop.permute.xlu2 %2018 }
 0x398   : > { %2127 = vperm.xlu1 %4648, %v6432_v26   ;;  %v5002_v28 = vpop.eup %5001 }
 0x39d   : > { %3000 = vperm.xlu0 %4709, %v2661_v13   ;;  %v2006_v11 = vpop.permute.xlu1 %2005  ;;  %v1383_v13 = vadd.f32 %v6698_v2, %v6362_v50 }
 0x39e   : > { %2121 = vperm.xlu2 %4647, %v6432_v26   ;;  %v2667_v56 = vmul.f32 %v5000_v33, %v2006_v11  ;;  %v6840_v27 = vpop.permute.xlu2 %2030  ;;  %v1389_v33 = vadd.f32 %v6698_v2, %v6393_v15 }
 0x39f   : > { %v1564_v22 = vmul.f32 1.442695, %v1383_v13 }
 0x3a0   : > { %4651 = vset.pattern.permute.xlu1 %v6390_v29  ;;  %v1576_v13 = vmul.f32 1.442695, %v1389_v33 }
 0x3a1   : > { %5003 = vpow2.f32 %v1564_v22 }
 0x3a2   : > { %5005 = vpow2.f32 %v1570_v1 }
 0x3a3   : > { %5007 = vpow2.f32 %v1576_v13 }
 0x3a5   : > { %3009 = vperm.xlu0 %4709, %v2664_v19   ;;  %v2025_v20 = vpop.permute.xlu1 %2024 }
 0x3a6   : > { %4650 = vset.pattern.permute.xlu2 %v6357_v32  ;;  %v2670_v19 = vmul.f32 %v5002_v28, %v2025_v20 }
 0x3a7   : > { %v5004_v11 = vpop.eup %5003 }
 0x3a8   : > { %2145 = vperm.xlu1 %4651, %v6432_v26   ;;  %v6846_v50 = vpop.permute.xlu2 %2048  ;;  %v5006_v22 = vpop.eup %5005 }
 0x3a9   : > { %v5008_v28 = vpop.eup %5007 }
 0x3ad   : > { %3018 = vperm.xlu0 %4709, %v2667_v56   ;;  %v2673_v56 = vmul.f32 %v5004_v11, %v6631_v59  ;;  %v6856_v59 = vpop.permute.xlu1 %2036  ;;  %v1392_v11 = vadd.f32 %v6698_v2, %v6406_v12 }
 0x3ae   : > { %2139 = vperm.xlu2 %4650, %v6432_v26  }
 0x3af   : > { %v1582_v33 = vmul.f32 1.442695, %v1392_v11 }
 0x3b0   : > { %4653 = vset.pattern.permute.xlu1 %v6507_v9 }
 0x3b1   : > { %5009 = vpow2.f32 %v1582_v33 }
 0x3b5   : > { %3027 = vperm.xlu0 %4709, %v2670_v19  }
 0x3b6   : > { %4652 = vset.pattern.permute.xlu2 %v6385_v25 }
 0x3b7   : > { %v5010_v13 = vpop.eup %5009 }
 0x3b8   : > { %2157 = vperm.xlu1 %4653, %v6432_v26   ;;  %v2061_v60 = vpop.permute.xlu2 %2060 }
 0x3b9   : > { %v2676_v20 = vmul.f32 %v5006_v22, %v2061_v60 }
 0x3ba   : > { %v6860_v0 = vpop.permute.xlu1 %2054 }
 0x3bd   : > { %3036 = vperm.xlu0 %4709, %v2673_v56  }
 0x3be   : > { %2151 = vperm.xlu2 %4652, %v6432_v26  }
 0x3c0   : > { %4656 = vset.pattern.permute.xlu1 %v6435_v58 }
 0x3c5   : > { %3045 = vperm.xlu0 %4709, %v2676_v20   ;;  %v1395_v20 = vadd.f32 %v6698_v2, %v6419_v52 }
 0x3c6   : > { %4655 = vset.pattern.permute.xlu2 %v6375_v10 }
 0x3c7   : > { %v1588_v12 = vmul.f32 1.442695, %v1395_v20 }
 0x3c8   : > { %2175 = vperm.xlu1 %4656, %v6432_v26   ;;  %v2079_v15 = vpop.permute.xlu2 %2078 }
 0x3c9   : > { %v2679_v19 = vmul.f32 %v5008_v28, %v2079_v15  ;;  %5011 = vpow2.f32 %v1588_v12  ;;  %v1398_v28 = vadd.f32 %v6698_v2, %v6437_v48 }
 0x3ca   : > { %v6864_v1 = vpop.permute.xlu1 %2066 }
 0x3cb   : > { %v1594_v15 = vmul.f32 1.442695, %v1398_v28 }
 0x3cd   : > { %3054 = vperm.xlu0 %4709, %v2679_v19   ;;  %5013 = vpow2.f32 %v1594_v15 }
 0x3ce   : > { %2169 = vperm.xlu2 %4655, %v6432_v26  }
 0x3cf   : > { %v5012_v11 = vpop.eup %5011 }
 0x3d0   : > { %4658 = vset.pattern.permute.xlu1 %v6531_v14 }
 0x3d6   : > { %4657 = vset.pattern.permute.xlu2 %v6427_v49 }
 0x3d8   : > { %2187 = vperm.xlu1 %4658, %v6432_v26   ;;  %v6881_v19 = vpop.permute.xlu2 %2090 }
 0x3da   : > { %v6870_v56 = vpop.permute.xlu1 %2084 }
 0x3de   : > { %2181 = vperm.xlu2 %4657, %v6432_v26  }
 0x3e0   : > { %4661 = vset.pattern.permute.xlu1 %v6288_v30 }
 0x3e6   : > { %4660 = vset.pattern.permute.xlu2 %v6402_v18 }
 0x3e8   : > { %2206 = vperm.xlu1 %4661, %v6495_v51  }
 0x3ea   : > { %v2097_v60 = vpop.permute.xlu1 %2096 }
 0x3eb   : > { %v2682_v22 = vmul.f32 %v5010_v13, %v2097_v60  ;;  %v5014_v13 = vpop.eup %5013 }
 0x3ec   : > { %v2688_v48 = vmul.f32 %v5014_v13, %v6655_v35 }
 0x3ed   : > { %3063 = vperm.xlu0 %4709, %v2682_v22   ;;  %v1401_v22 = vadd.f32 %v6698_v2, %v6447_v38 }
 0x3ee   : > { %2199 = vperm.xlu2 %4660, %v6432_v26   ;;  %v6885_v26 = vpop.permute.xlu2 %2109 }
 0x3ef   : > { %v1600_v20 = vmul.f32 1.442695, %v1401_v22 }
 0x3f0   : > { %4663 = vset.pattern.permute.xlu1 %v6303_v5 }
 0x3f1   : > { %5015 = vpow2.f32 %v1600_v20  ;;  %v1407_v20 = vadd.f32 %v6698_v2, %v6473_v21 }
 0x3f6   : > { %4662 = vset.pattern.permute.xlu2 %v6469_v3 }
 0x3f7   : > { %v5016_v35 = vpop.eup %5015 }
 0x3f8   : > { %2218 = vperm.xlu1 %4663, %v6495_v51   ;;  %v6890_v60 = vpop.permute.xlu2 %2121 }
 0x3fa   : > { %v2116_v33 = vpop.permute.xlu1 %2115 }
 0x3fb   : > { %v2685_v52 = vmul.f32 %v5012_v11, %v2116_v33  ;;  %v1404_v11 = vadd.f32 %v6698_v2, %v6460_v6 }
 0x3fd   : > { %3072 = vperm.xlu0 %4709, %v2685_v52   ;;  %v1606_v38 = vmul.f32 1.442695, %v1404_v11 }
 0x3fe   : > { %2212 = vperm.xlu2 %4662, %v6495_v51  }
 0x3ff   : > { %5017 = vpow2.f32 %v1606_v38 }
 0x400   : > { %4667 = vset.pattern.permute.xlu1 %v6357_v32 }
 0x405   : > { %3081 = vperm.xlu0 %4709, %v2688_v48   ;;  %v5018_v33 = vpop.eup %5017 }
 0x406   : > { %4666 = vset.pattern.permute.xlu2 %v6369_v23 }
 0x408   : > { %2236 = vperm.xlu1 %4667, %v6495_v51   ;;  %v6896_v12 = vpop.permute.xlu2 %2139 }
 0x40a   : > { %v6907_v48 = vpop.permute.xlu1 %2127 }
 0x40e   : > { %2230 = vperm.xlu2 %4666, %v6495_v51  }
 0x410   : > { %4669 = vset.pattern.permute.xlu1 %v6385_v25 }
 0x416   : > { %4668 = vset.pattern.permute.xlu2 %v6390_v29 }
 0x418   : > { %2248 = vperm.xlu1 %4669, %v6495_v51   ;;  %v2152_v28 = vpop.permute.xlu2 %2151 }
 0x419   : > { %v2691_v15 = vmul.f32 %v5016_v35, %v2152_v28  ;;  %v1612_v35 = vmul.f32 1.442695, %v1407_v20 }
 0x41a   : > { %v6911_v6 = vpop.permute.xlu1 %2145 }
 0x41b   : > { %3090 = vperm.xlu0 %4709, %v2691_v15   ;;  %5019 = vpow2.f32 %v1612_v35 }
 0x41e   : > { %2242 = vperm.xlu2 %4668, %v6495_v51  }
 0x420   : > { %4672 = vset.pattern.permute.xlu1 %v6375_v10 }
 0x421   : > { %v5020_v15 = vpop.eup %5019 }
 0x426   : > { %4671 = vset.pattern.permute.xlu2 %v6414_v43 }
 0x428   : > { %2266 = vperm.xlu1 %4672, %v6495_v51   ;;  %v2170_v52 = vpop.permute.xlu2 %2169 }
 0x429   : > { %v2694_v13 = vmul.f32 %v5018_v33, %v2170_v52  ;;  %v1410_v33 = vadd.f32 %v6698_v2, %v6485_v62  ;;  %v1413_v52 = vadd.f32 %v6698_v2, %v6498_v37  ;;  %v8265_v37 = vld [vmem:[#allocation143_spill] sm:$0xff] }
 0x42a   : > { %v6915_v22 = vpop.permute.xlu1 %2157 }
 0x42b   : > { %3099 = vperm.xlu0 %4709, %v2694_v13   ;;  %v1618_v21 = vmul.f32 1.442695, %v1410_v33  ;;  %v1624_v13 = vmul.f32 1.442695, %v1413_v52  ;;  %v8266_v33 = vld [vmem:[#allocation95_spill] sm:$0xff] }
 0x42d   : > { %5021 = vpow2.f32 %v1618_v21  ;;  %v1416_v21 = vadd.f32 %v6698_v2, %v8266_v33 }
 0x42e   : > { %2260 = vperm.xlu2 %4671, %v6495_v51   ;;  %5023 = vpow2.f32 %v1624_v13 }
 0x42f   : > { %v1630_v52 = vmul.f32 1.442695, %v1416_v21 }
 0x430   : > { %4674 = vset.pattern.permute.xlu1 %v6427_v49 }
 0x431   : > { %5025 = vpow2.f32 %v1630_v52 }
 0x433   : > { %v5022_v35 = vpop.eup %5021 }
 0x436   : > { %4673 = vset.pattern.permute.xlu2 %v6435_v58 }
 0x438   : > { %2278 = vperm.xlu1 %4674, %v6495_v51   ;;  %v6932_v20 = vpop.permute.xlu2 %2181 }
 0x43a   : > { %v6921_v28 = vpop.permute.xlu1 %2175 }
 0x43e   : > { %2272 = vperm.xlu2 %4673, %v6495_v51  }
 0x440   : > { %4677 = vset.pattern.permute.xlu1 %v6402_v18 }
 0x446   : > { %4676 = vset.pattern.permute.xlu2 %v6456_v4 }
 0x448   : > { %2296 = vperm.xlu1 %4677, %v6495_v51  }
 0x44a   : > { %v2188_v11 = vpop.permute.xlu1 %2187 }
 0x44b   : > { %v2697_v38 = vmul.f32 %v5020_v15, %v2188_v11 }
 0x44d   : > { %3108 = vperm.xlu0 %4709, %v2697_v38  }
 0x44e   : > { %2290 = vperm.xlu2 %4676, %v6495_v51   ;;  %v6936_v51 = vpop.permute.xlu2 %2199 }
 0x450   : > { %4679 = vset.pattern.permute.xlu1 %v6469_v3  ;;  %v5024_v3 = vpop.eup %5023 }
 0x451   : > { %v2703_v11 = vmul.f32 %v5024_v3, %v8265_v37  ;;  %v8268_v3 = vld [vmem:[#allocation98_spill] sm:$0xff] }
 0x452   : > { %v1419_v37 = vadd.f32 %v6698_v2, %v8268_v3 }
 0x456   : > { %4678 = vset.pattern.permute.xlu2 %v6288_v30 }
 0x458   : > { %2309 = vperm.xlu1 %4679, %v6573_v47   ;;  %v6941_v38 = vpop.permute.xlu2 %2212 }
 0x45a   : > { %v2207_v15 = vpop.permute.xlu1 %2206 }
 0x45b   : > { %v2700_v62 = vmul.f32 %v5022_v35, %v2207_v15  ;;  %v5026_v35 = vpop.eup %5025 }
 0x45d   : > { %3117 = vperm.xlu0 %4709, %v2700_v62  }
 0x45e   : > { %2303 = vperm.xlu2 %4678, %v6573_v47  }
 0x460   : > { %4682 = vset.pattern.permute.xlu1 %v6369_v23 }
 0x465   : > { %3126 = vperm.xlu0 %4709, %v2703_v11   ;;  %v1636_v11 = vmul.f32 1.442695, %v1419_v37 }
 0x466   : > { %4681 = vset.pattern.permute.xlu2 %v6345_v24 }
 0x467   : > { %5027 = vpow2.f32 %v1636_v11 }
 0x468   : > { %2327 = vperm.xlu1 %4682, %v6573_v47   ;;  %v6947_v13 = vpop.permute.xlu2 %2230 }
 0x469   : > { %8267 = vst [vmem:[#allocation143_spill] sm:$0xff] %v6947_v13 }
 0x46a   : > { %v6958_v52 = vpop.permute.xlu1 %2218 }
 0x46e   : > { %2321 = vperm.xlu2 %4681, %v6573_v47  }
 0x470   : > { %4684 = vset.pattern.permute.xlu1 %v6390_v29  ;;  %v5028_v29 = vpop.eup %5027 }
 0x476   : > { %4683 = vset.pattern.permute.xlu2 %v6357_v32 }
 0x478   : > { %2339 = vperm.xlu1 %4684, %v6573_v47   ;;  %v2243_v15 = vpop.permute.xlu2 %2242 }
 0x479   : > { %v2706_v62 = vmul.f32 %v5026_v35, %v2243_v15 }
 0x47a   : > { %v6962_v35 = vpop.permute.xlu1 %2236 }
 0x47b   : > { %3135 = vperm.xlu0 %4709, %v2706_v62   ;;  %v8270_v62 = vld [vmem:[#allocation101_spill] sm:$0xff] }
 0x47c   : > { %v1422_v3 = vadd.f32 %v6698_v2, %v8270_v62 }
 0x47e   : > { %2333 = vperm.xlu2 %4683, %v6573_v47   ;;  %v1642_v37 = vmul.f32 1.442695, %v1422_v3  ;;  %v8273_v3 = vld [vmem:[#allocation107_spill] sm:$0xff] }
 0x480   : > { %4687 = vset.pattern.permute.xlu1 %v6414_v43  ;;  %5029 = vpow2.f32 %v1642_v37  ;;  %v1428_v37 = vadd.f32 %v6698_v2, %v8273_v3  ;;  %v8275_v3 = vld [vmem:[#allocation110_spill] sm:$0xff] }
 0x486   : > { %4686 = vset.pattern.permute.xlu2 %v6507_v9 }
 0x488   : > { %2357 = vperm.xlu1 %4687, %v6573_v47   ;;  %v2261_v33 = vpop.permute.xlu2 %2260 }
 0x489   : > { %v2709_v21 = vmul.f32 %v5028_v29, %v2261_v33 }
 0x48a   : > { %v6966_v15 = vpop.permute.xlu1 %2248 }
 0x48b   : > { %3144 = vperm.xlu0 %4709, %v2709_v21   ;;  %8269 = vst [vmem:[#allocation95_spill] sm:$0xff] %v6966_v15  ;;  %v8272_v21 = vld [vmem:[#allocation104_spill] sm:$0xff] }
 0x48c   : > { %v1425_v15 = vadd.f32 %v6698_v2, %v8272_v21 }
 0x48e   : > { %2351 = vperm.xlu2 %4686, %v6573_v47   ;;  %v1648_v62 = vmul.f32 1.442695, %v1425_v15 }
 0x490   : > { %4689 = vset.pattern.permute.xlu1 %v6435_v58  ;;  %v5030_v58 = vpop.eup %5029  ;;  %5031 = vpow2.f32 %v1648_v62 }
 0x496   : > { %4688 = vset.pattern.permute.xlu2 %v6375_v10 }
 0x498   : > { %2369 = vperm.xlu1 %4689, %v6573_v47   ;;  %v6983_v13 = vpop.permute.xlu2 %2272 }
 0x49a   : > { %v6972_v11 = vpop.permute.xlu1 %2266 }
 0x49b   : > { %8271 = vst [vmem:[#allocation98_spill] sm:$0xff] %v6972_v11  ;;  %v1654_v11 = vmul.f32 1.442695, %v1428_v37 }
 0x49d   : > { %5033 = vpow2.f32 %v1654_v11  ;;  %v1431_v11 = vadd.f32 %v6698_v2, %v8275_v3 }
 0x49e   : > { %2363 = vperm.xlu2 %4688, %v6573_v47  }
 0x49f   : > { %v1660_v37 = vmul.f32 1.442695, %v1431_v11 }
 0x4a0   : > { %4692 = vset.pattern.permute.xlu1 %v6456_v4 }
 0x4a1   : > { %5035 = vpow2.f32 %v1660_v37 }
 0x4a6   : > { %4691 = vset.pattern.permute.xlu2 %v6531_v14 }
 0x4a8   : > { %2387 = vperm.xlu1 %4692, %v6573_v47   ;;  %v6987_v15 = vpop.permute.xlu2 %2290 }
 0x4aa   : > { %v2279_v29 = vpop.permute.xlu1 %2278 }
 0x4ab   : > { %v2712_v33 = vmul.f32 %v5030_v58, %v2279_v29  ;;  %v5032_v58 = vpop.eup %5031 }
 0x4ad   : > { %3153 = vperm.xlu0 %4709, %v2712_v33  }
 0x4ae   : > { %2381 = vperm.xlu2 %4691, %v6573_v47  }
 0x4b0   : > { %4694 = vset.pattern.permute.xlu1 %v6288_v30  ;;  %v5034_v30 = vpop.eup %5033 }
 0x4b1   : > { %v2718_v33 = vmul.f32 %v5034_v30, %v6742_v36 }
 0x4b6   : > { %4693 = vset.pattern.permute.xlu2 %v6402_v18 }
 0x4b8   : > { %2400 = vperm.xlu1 %4694, %v6659_v63   ;;  %v6992_v62 = vpop.permute.xlu2 %2303 }
 0x4b9   : > { %8274 = vst [vmem:[#allocation101_spill] sm:$0xff] %v6992_v62 }
 0x4ba   : > { %v2297_v29 = vpop.permute.xlu1 %2296 }
 0x4bb   : > { %v2715_v21 = vmul.f32 %v5032_v58, %v2297_v29  ;;  %v8277_v58 = vld [vmem:[#allocation113_spill] sm:$0xff] }
 0x4bc   : > { %v1434_v29 = vadd.f32 %v6698_v2, %v8277_v58 }
 0x4bd   : > { %3162 = vperm.xlu0 %4709, %v2715_v21  }
 0x4be   : > { %2393 = vperm.xlu2 %4693, %v6573_v47   ;;  %v1666_v21 = vmul.f32 1.442695, %v1434_v29  ;;  %v8284_v29 = vld [vmem:[#allocation43_spill] sm:$0xff] }
 0x4c0   : > { %4697 = vset.pattern.permute.xlu1 %v6345_v24  ;;  %v5036_v24 = vpop.eup %5035  ;;  %5037 = vpow2.f32 %v1666_v21  ;;  %v1332_v21 = vadd.f32 %v6698_v2, %v8284_v29 }
 0x4c5   : > { %3171 = vperm.xlu0 %4709, %v2718_v33  }
 0x4c6   : > { %4696 = vset.pattern.permute.xlu2 %v6303_v5 }
 0x4c8   : > { %2418 = vperm.xlu1 %4697, %v6659_v63   ;;  %v6998_v47 = vpop.permute.xlu2 %2321 }
 0x4c9   : > { %8276 = vst [vmem:[#allocation104_spill] sm:$0xff] %v6998_v47 }
 0x4ca   : > { %v7009_v33 = vpop.permute.xlu1 %2309 }
 0x4cb   : > { %8278 = vst [vmem:[#allocation107_spill] sm:$0xff] %v7009_v33 }
 0x4ce   : > { %2412 = vperm.xlu2 %4696, %v6659_v63  }
 0x4d0   : > { %4699 = vset.pattern.permute.xlu1 %v6357_v32  ;;  %v5038_v32 = vpop.eup %5037 }
 0x4d6   : > { %4698 = vset.pattern.permute.xlu2 %v6369_v23 }
 0x4d8   : > { %2430 = vperm.xlu1 %4699, %v6659_v63   ;;  %v2334_v5 = vpop.permute.xlu2 %2333 }
 0x4d9   : > { %v2721_v36 = vmul.f32 %v5036_v24, %v2334_v5 }
 0x4da   : > { %v7013_v3 = vpop.permute.xlu1 %2327 }
 0x4db   : > { %3180 = vperm.xlu0 %4709, %v2721_v36   ;;  %8279 = vst [vmem:[#allocation110_spill] sm:$0xff] %v7013_v3  ;;  %v8283_v36 = vld [vmem:[#allocation119_spill] sm:$0xff] }
 0x4dc   : > { %v1440_v58 = vadd.f32 %v6698_v2, %v8283_v36 }
 0x4de   : > { %2424 = vperm.xlu2 %4698, %v6659_v63  }
 0x4e0   : > { %4702 = vset.pattern.permute.xlu1 %v6507_v9 }
 0x4e6   : > { %4701 = vset.pattern.permute.xlu2 %v6385_v25  ;;  %v8281_v25 = vld [vmem:[#allocation116_spill] sm:$0xff] }
 0x4e7   : > { %v1437_v11 = vadd.f32 %v6698_v2, %v8281_v25 }
 0x4e8   : > { %2448 = vperm.xlu1 %4702, %v6659_v63   ;;  %v2352_v23 = vpop.permute.xlu2 %2351 }
 0x4e9   : > { %v2724_v30 = vmul.f32 %v5038_v32, %v2352_v23  ;;  %v1672_v37 = vmul.f32 1.442695, %v1437_v11  ;;  %v1462_v32 = vmul.f32 1.442695, %v1332_v21  ;;  %v8287_v11 = vld [vmem:[#allocation40_spill] sm:$0xff] }
 0x4ea   : > { %v7017_v9 = vpop.permute.xlu1 %2339 }
 0x4eb   : > { %3189 = vperm.xlu0 %4709, %v2724_v30   ;;  %8280 = vst [vmem:[#allocation113_spill] sm:$0xff] %v7017_v9  ;;  %5039 = vpow2.f32 %v1672_v37  ;;  %v8286_v30 = vld [vmem:[#allocation36_spill] sm:$0xff]  ;;  %v1334_v37 = vadd.f32 %v6698_v2, %v8287_v11 }
 0x4ec   : > { %v1331_v25 = vadd.f32 %v6698_v2, %v8286_v30 }
 0x4ed   : > { %v1466_v29 = vmul.f32 1.442695, %v1334_v37 }
 0x4ee   : > { %2442 = vperm.xlu2 %4701, %v6659_v63  }
 0x4f0   : > { %4704 = vset.pattern.permute.xlu1 %v6375_v10 }
 0x4f6   : > { %4703 = vset.pattern.permute.xlu2 %v6414_v43  ;;  %v5040_v43 = vpop.eup %5039 }
 0x4f8   : > { %2460 = vperm.xlu1 %4704, %v6659_v63  }
 0x4fa   : > { %v7023_v24 = vpop.permute.xlu1 %2357 }
 0x4fb   : > { %8282 = vst [vmem:[#allocation116_spill] sm:$0xff] %v7023_v24 }
 0x4fe   : > { %2454 = vperm.xlu2 %4703, %v6659_v63  }
 0x500   : > { %4706 = vset.pattern.permute.xlu1 %v6531_v14  ;;  %v1678_v14 = vmul.f32 1.442695, %v1440_v58 }
 0x502   : > { %5041 = vpow2.f32 %v1678_v14  ;;  %v8289_v14 = vld [vmem:[#allocation45_spill] sm:$0xff] }
 0x503   : > { %5043 = vpow2.f32 %v1462_v32  ;;  %v8290_v32 = vld [vmem:[#allocation145_spill] sm:$0xff] }
 0x506   : > { %4705 = vset.pattern.permute.xlu2 %v6427_v49  ;;  %v8285_v49 = vld [vmem:[#allocation122_spill] sm:$0xff] }
 0x507   : > { %v1443_v23 = vadd.f32 %v6698_v2, %v8285_v49 }
 0x508   : > { %2478 = vperm.xlu1 %4706, %v6659_v63  }
 0x50a   : > { %v2370_v10 = vpop.permute.xlu1 %2369 }
 0x50b   : > { %v2727_v5 = vmul.f32 %v5040_v43, %v2370_v10  ;;  %v1684_v43 = vmul.f32 1.442695, %v1443_v23  ;;  %v7040_v10 = vpop.permute.xlu2 %2363  ;;  %v8291_v23 = vld [vmem:[#allocation47_spill] sm:$0xff] }
 0x50c   : > { %8288 = vst [vmem:[#allocation119_spill] sm:$0xff] %v7040_v10  ;;  %v1337_v30 = vadd.f32 %v6698_v2, %v8291_v23 }
 0x50d   : > { %3198 = vperm.xlu0 %4709, %v2727_v5   ;;  %v1460_v5 = vmul.f32 1.442695, %v1331_v25  ;;  %5045 = vpow2.f32 %v1684_v43  ;;  %v8293_v25 = vmov 0  }
 0x50e   : > { %2472 = vperm.xlu2 %4705, %v6659_v63  }
 0x50f   : > { %5047 = vpow2.f32 %v1460_v5  ;;  %v8294_v5 = vld [vmem:[#allocation37_spill] sm:$0xff] }
 0x510   : > { %4708 = vset.pattern.permute.xlu1 %v6402_v18  ;;  %v5042_v18 = vpop.eup %5041  ;;  %5049 = vpow2.f32 %v1466_v29 }
 0x511   : > { %v5044_v21 = vpop.eup %5043 }
 0x512   : > { %v2622_v49 = vmul.f32 %v5044_v21, %v8290_v32 }
 0x513   : > { %v7049_v11 = vpop.permute.xlu2 %2381  ;;  %v5046_v37 = vpop.eup %5045 }
 0x514   : > { %8292 = vst [vmem:[#allocation43_spill] sm:$0xff] %v7049_v11  ;;  %v8311_v11 = vld [vmem:[#allocation149_spill] sm:$0xff] }
 0x516   : > { %4707 = vset.pattern.permute.xlu2 %v6456_v4  ;;  %v1333_v4 = vadd.f32 %v6698_v2, %v8289_v14  ;;  %v8295_v14 = vld [vmem:[#allocation141_spill] sm:$0xff] }
 0x518   : > { %2490 = vperm.xlu1 %4708, %v6659_v63   ;;  %v1464_v43 = vmul.f32 1.442695, %v1333_v4 }
 0x51a   : > { %v2388_v36 = vpop.permute.xlu1 %2387  ;;  %5051 = vpow2.f32 %v1464_v43  ;;  %v8299_v43 = vld [vmem:[#allocation38_spill] sm:$0xff] }
 0x51b   : > { %v2730_v58 = vmul.f32 %v5042_v18, %v2388_v36  ;;  %v2733_v18 = vmul.f32 %v5046_v37, %v6808_v46  ;;  %v5048_v36 = vpop.eup %5047  ;;  %v7060_v23 = vpop.permute.xlu2 %2393 }
 0x51c   : > { %v2621_v21 = vmul.f32 %v5048_v36, %v6787_v8  ;;  %v5050_v29 = vpop.eup %5049  ;;  %8297 = vst [vmem:[#allocation122_spill] sm:$0xff] %v7060_v23  ;;  %v8300_v36 = vld [vmem:[#allocation138_spill] sm:$0xff] }
 0x51d   : > { %3207 = vperm.xlu0 %4709, %v2730_v58   ;;  %v1472_v58 = vmul.f32 1.442695, %v1337_v30  ;;  %v2624_v32 = vmul.f32 %v5050_v29, %v8295_v14  ;;  %v8298_v30 = vld [vmem:[#allocation125_spill] sm:$0xff]  ;;  %v8301_v29 = vld [vmem:[#allocation148_spill] sm:$0xff] }
 0x51e   : > { %2484 = vperm.xlu2 %4707, %v6659_v63   ;;  %v1336_v63 = vadd.f32 %v6698_v2, %v8294_v5  ;;  %v1446_v37 = vadd.f32 %v6698_v2, %v8298_v30  ;;  %v8304_v30 = vld [vmem:[#allocation39_spill] sm:$0xff] }
 0x51f   : > { %5053 = vpow2.f32 %v1472_v58 }
 0x520   : > { %4711 = vset.pattern.permute.xlu1 %v8293_v25  ;;  %v1470_v46 = vmul.f32 1.442695, %v1336_v63  ;;  %v5052_v8 = vpop.eup %5051  ;;  %v1690_v58 = vmul.f32 1.442695, %v1446_v37  ;;  %v8302_v63 = vld [vmem:[#allocation51_spill] sm:$0xff] }
 0x521   : > { %2883 = vperm.xlu1 %4711, %v2622_v49   ;;  %v8296_v49 = vld [vmem:[#allocation49_spill] sm:$0xff]  ;;  %v2623_v5 = vmul.f32 %v5052_v8, %v8300_v36  ;;  %v1342_v8 = vadd.f32 %v6698_v2, %v8304_v30 }
 0x522   : > { %v1340_v4 = vadd.f32 %v6698_v2, %v8296_v49  ;;  %5055 = vpow2.f32 %v1470_v46 }
 0x525   : > { %3216 = vperm.xlu0 %4709, %v2733_v18   ;;  %v1478_v18 = vmul.f32 1.442695, %v1340_v4 }
 0x526   : > { %4710 = vset.pattern.permute.xlu2 %v8293_v25  ;;  %v1339_v25 = vadd.f32 %v6698_v2, %v8299_v43  ;;  %v8305_v43 = vld [vmem:[#allocation144_spill] sm:$0xff] }
 0x527   : > { %2880 = vperm.xlu2 %4710, %v2621_v21   ;;  %v5054_v21 = vpop.eup %5053  ;;  %5057 = vpow2.f32 %v1478_v18 }
 0x528   : > { %v2627_v14 = vmul.f32 %v5054_v21, %v8301_v29  ;;  %v1476_v49 = vmul.f32 1.442695, %v1339_v25  ;;  %v7070_v23 = vpop.permute.xlu2 %2412  ;;  %v5056_v4 = vpop.eup %5055  ;;  %5059 = vpow2.f32 %v1690_v58  ;;  %v8306_v21 = vld [vmem:[#allocation150_spill] sm:$0xff]  ;;  %v8307_v29 = vld [vmem:[#allocation53_spill] sm:$0xff] }
 0x529   : > { %2889 = vperm.xlu1 %4711, %v2624_v32   ;;  %v1343_v32 = vadd.f32 %v6698_v2, %v8302_v63  ;;  %8303 = vst [vmem:[#allocation36_spill] sm:$0xff] %v7070_v23  ;;  %v2626_v37 = vmul.f32 %v5056_v4, %v8305_v43  ;;  %v1346_v25 = vadd.f32 %v6698_v2, %v8307_v29  ;;  %v1482_v63 = vmul.f32 1.442695, %v1342_v8  ;;  %v8309_v4 = vld [vmem:[#allocation41_spill] sm:$0xff]  ;;  %v8312_v8 = vld [vmem:[#allocation55_spill] sm:$0xff] }
 0x52a   : > { %5061 = vpow2.f32 %v1476_v49  ;;  %v1345_v43 = vadd.f32 %v6698_v2, %v8309_v4 }
 0x52b   : > { %v1484_v46 = vmul.f32 1.442695, %v1343_v32  ;;  %v8308_v32 = vld [vmem:[#allocation128_spill] sm:$0xff]  ;;  %v1490_v30 = vmul.f32 1.442695, %v1346_v25 }
 0x52c   : > { %v1449_v49 = vadd.f32 %v6698_v2, %v8308_v32 }
 0x52d   : > { %v5058_v36 = vpop.eup %5057  ;;  %5063 = vpow2.f32 %v1484_v46 }
 0x52e   : > { %v5060_v18 = vpop.eup %5059  ;;  %5065 = vpow2.f32 %v1482_v63  ;;  %v8314_v63 = vld [vmem:[#allocation42_spill] sm:$0xff] }
 0x52f   : > { %2886 = vperm.xlu2 %4710, %v2623_v5   ;;  %v2630_v5 = vmul.f32 %v5058_v36, %v8306_v21  ;;  %v1696_v21 = vmul.f32 1.442695, %v1449_v49  ;;  %5067 = vpow2.f32 %v1490_v30 }
 0x530   : > { %v5062_v58 = vpop.eup %5061 }
 0x531   : > { %2898 = vperm.xlu1 %4711, %v2627_v14   ;;  %5069 = vpow2.f32 %v1696_v21 }
 0x533   : > { %v5064_v46 = vpop.eup %5063 }
 0x534   : > { %v2633_v29 = vmul.f32 %v5064_v46, %v8311_v11  ;;  %v8315_v11 = vld [vmem:[#allocation152_spill] sm:$0xff] }
 0x537   : > { %2895 = vperm.xlu2 %4710, %v2626_v37   ;;  %v8310_v37 = vld [vmem:[#allocation146_spill] sm:$0xff] }
 0x538   : > { %v2425_v14 = vpop.permute.xlu2 %2424  ;;  %v2629_v36 = vmul.f32 %v5062_v58, %v8310_v37  ;;  %v1348_v58 = vadd.f32 %v6698_v2, %v8314_v63  ;;  %v8316_v37 = vld [vmem:[#allocation57_spill] sm:$0xff] }
 0x539   : > { %v2736_v23 = vmul.f32 %v5060_v18, %v2425_v14  ;;  %2907 = vperm.xlu1 %4711, %v2630_v5   ;;  %v1349_v5 = vadd.f32 %v6698_v2, %v8312_v8  ;;  %v1488_v18 = vmul.f32 1.442695, %v1345_v43  ;;  %v5066_v14 = vpop.eup %5065  ;;  %v1352_v43 = vadd.f32 %v6698_v2, %v8316_v37 }
 0x53a   : > { %v2632_v32 = vmul.f32 %v5066_v14, %v6724_v45  ;;  %v5068_v49 = vpop.eup %5067 }
 0x53b   : > { %3225 = vperm.xlu0 %4709, %v2736_v23   ;;  %v7086_v23 = vpop.permute.xlu0 %2436  ;;  %v1496_v25 = vmul.f32 1.442695, %v1349_v5  ;;  %5071 = vpow2.f32 %v1488_v18  ;;  %v2636_v4 = vmul.f32 %v5068_v49, %v8315_v11  ;;  %v5070_v30 = vpop.eup %5069  ;;  %v1502_v45 = vmul.f32 1.442695, %v1352_v43  ;;  %v8318_v18 = vld [vmem:[#allocation44_spill] sm:$0xff] }
 0x53c   : > { %8313 = vst [vmem:[#allocation40_spill] sm:$0xff] %v7086_v23  ;;  %v7096_v5 = vpop.permute.xlu1 %2400  ;;  %v1351_v14 = vadd.f32 %v6698_v2, %v8318_v18 }
 0x53d   : > { %5073 = vpow2.f32 %v1496_v25  ;;  %8317 = vst [vmem:[#allocation45_spill] sm:$0xff] %v7096_v5 }
 0x53f   : > { %2904 = vperm.xlu2 %4710, %v2629_v36   ;;  %v1494_v36 = vmul.f32 1.442695, %v1348_v58  ;;  %v8320_v58 = vld [vmem:[#allocation59_spill] sm:$0xff] }
 0x540   : > { %v1355_v11 = vadd.f32 %v6698_v2, %v8320_v58  ;;  %v8327_v58 = vld [vmem:[#allocation48_spill] sm:$0xff] }
 0x541   : > { %2916 = vperm.xlu1 %4711, %v2633_v29   ;;  %v5072_v29 = vpop.eup %5071  ;;  %5075 = vpow2.f32 %v1494_v36  ;;  %v8322_v36 = vld [vmem:[#allocation46_spill] sm:$0xff] }
 0x542   : > { %v2635_v25 = vmul.f32 %v5072_v29, %v6734_v54  ;;  %5077 = vpow2.f32 %v1502_v45  ;;  %v1508_v43 = vmul.f32 1.442695, %v1355_v11  ;;  %v8324_v54 = vld [vmem:[#allocation153_spill] sm:$0xff]  ;;  %v1357_v11 = vadd.f32 %v6698_v2, %v8327_v58 }
 0x543   : > { %v7094_v8 = vpop.permute.xlu0 %1981  ;;  %v5074_v63 = vpop.eup %5073 }
 0x544   : > { %v7104_v37 = vpop.permute.xlu1 %2418 }
 0x545   : > { %8321 = vst [vmem:[#allocation145_spill] sm:$0xff] %v7104_v37  ;;  %v8354_v37 = vld [vmem:[#allocation77_spill] sm:$0xff] }
 0x546   : > { %v1382_v5 = vadd.f32 %v6698_v2, %v8354_v37 }
 0x547   : > { %2913 = vperm.xlu2 %4710, %v2632_v32   ;;  %v8319_v32 = vld [vmem:[#allocation154_spill] sm:$0xff] }
 0x548   : > { %v2443_v46 = vpop.permute.xlu2 %2442  ;;  %v2639_v49 = vmul.f32 %v5074_v63, %v8319_v32 }
 0x549   : > { %v2739_v21 = vmul.f32 %v5070_v30, %v2443_v46  ;;  %2925 = vperm.xlu1 %4711, %v2636_v4   ;;  %v1500_v4 = vmul.f32 1.442695, %v1351_v14  ;;  %v5076_v30 = vpop.eup %5075  ;;  %v1354_v46 = vadd.f32 %v6698_v2, %v8322_v36  ;;  %v8328_v36 = vld [vmem:[#allocation131_spill] sm:$0xff] }
 0x54a   : > { %v2638_v29 = vmul.f32 %v5076_v30, %v8324_v54  ;;  %v5078_v18 = vpop.eup %5077  ;;  %v1452_v30 = vadd.f32 %v6698_v2, %v8328_v36  ;;  %v8331_v36 = vld [vmem:[#allocation50_spill] sm:$0xff] }
 0x54b   : > { %3234 = vperm.xlu0 %4709, %v2739_v21   ;;  %5079 = vpow2.f32 %v1500_v4  ;;  %v7108_v21 = vpop.permute.xlu0 %2466  ;;  %v2642_v45 = vmul.f32 %v5078_v18, %v6756_v61  ;;  %v1506_v63 = vmul.f32 1.442695, %v1354_v46  ;;  %v8329_v18 = vld [vmem:[#allocation63_spill] sm:$0xff] }
 0x54c   : > { %8323 = vst [vmem:[#allocation47_spill] sm:$0xff] %v7108_v21  ;;  %5081 = vpow2.f32 %v1508_v43 }
 0x54d   : > { %5083 = vpow2.f32 %v1506_v63 }
 0x54f   : > { %2922 = vperm.xlu2 %4710, %v2635_v25   ;;  %v8325_v25 = vld [vmem:[#allocation61_spill] sm:$0xff] }
 0x550   : > { %v1358_v14 = vadd.f32 %v6698_v2, %v8325_v25  ;;  %v1702_v25 = vmul.f32 1.442695, %v1452_v30 }
 0x551   : > { %2934 = vperm.xlu1 %4711, %v2639_v49   ;;  %v5080_v32 = vpop.eup %5079  ;;  %v7114_v49 = vpop.permute.xlu1 %2430 }
 0x552   : > { %8326 = vst [vmem:[#allocation37_spill] sm:$0xff] %v7114_v49  ;;  %v1514_v4 = vmul.f32 1.442695, %v1358_v14  ;;  %v2641_v61 = vmul.f32 %v5080_v32, %v6745_v17  ;;  %v5082_v54 = vpop.eup %5081  ;;  %v1360_v17 = vadd.f32 %v6698_v2, %v8331_v36  ;;  %v8332_v32 = vld [vmem:[#allocation155_spill] sm:$0xff] }
 0x553   : > { %v7121_v43 = vpop.permute.xlu0 %2877  ;;  %v2645_v46 = vmul.f32 %v5082_v54, %v6764_v39  ;;  %v5084_v14 = vpop.eup %5083 }
 0x554   : > { %5085 = vpow2.f32 %v1514_v4  ;;  %v8333_v4 = vld [vmem:[#allocation65_spill] sm:$0xff] }
 0x555   : > { %v1364_v30 = vadd.f32 %v6698_v2, %v8333_v4 }
 0x557   : > { %2931 = vperm.xlu2 %4710, %v2638_v29   ;;  %v1512_v29 = vmul.f32 1.442695, %v1357_v11  ;;  %v2644_v11 = vmul.f32 %v5084_v14, %v8332_v32  ;;  %v1526_v36 = vmul.f32 1.442695, %v1364_v30  ;;  %v8335_v14 = vld [vmem:[#allocation134_spill] sm:$0xff]  ;;  %v8336_v32 = vld [vmem:[#allocation52_spill] sm:$0xff] }
 0x559   : > { %2943 = vperm.xlu1 %4711, %v2642_v45   ;;  %v1361_v45 = vadd.f32 %v6698_v2, %v8329_v18  ;;  %5087 = vpow2.f32 %v1512_v29 }
 0x55a   : > { %v7126_v63 = vpop.permute.xlu1 %2448  ;;  %5089 = vpow2.f32 %v1702_v25  ;;  %v5086_v21 = vpop.eup %5085 }
 0x55b   : > { %8330 = vst [vmem:[#allocation141_spill] sm:$0xff] %v7126_v63  ;;  %v1520_v58 = vmul.f32 1.442695, %v1361_v45  ;;  %v2648_v39 = vmul.f32 %v5086_v21, %v6767_v16  ;;  %v7134_v54 = vpop.permute.xlu0 %2892  ;;  %v1455_v16 = vadd.f32 %v6698_v2, %v8335_v14 }
 0x55d   : > { %5091 = vpow2.f32 %v1520_v58 }
 0x55f   : > { %2940 = vperm.xlu2 %4710, %v2641_v61   ;;  %v1518_v61 = vmul.f32 1.442695, %v1360_v17  ;;  %v5088_v29 = vpop.eup %5087  ;;  %v1363_v17 = vadd.f32 %v6698_v2, %v8336_v32 }
 0x560   : > { %v5090_v18 = vpop.eup %5089  ;;  %v2647_v21 = vmul.f32 %v5088_v29, %v6772_v57  ;;  %v8339_v29 = vld [vmem:[#allocation54_spill] sm:$0xff] }
 0x561   : > { %2952 = vperm.xlu1 %4711, %v2645_v46   ;;  %v7136_v46 = vpop.permute.xlu2 %2454  ;;  %5093 = vpow2.f32 %v1518_v61 }
 0x562   : > { %8334 = vst [vmem:[#allocation49_spill] sm:$0xff] %v7136_v46  ;;  %5095 = vpow2.f32 %v1526_v36  ;;  %v8340_v36 = vld [vmem:[#allocation158_spill] sm:$0xff]  ;;  %v8347_v46 = vld [vmem:[#allocation160_spill] sm:$0xff] }
 0x563   : > { %v5092_v58 = vpop.eup %5091  ;;  %v7148_v14 = vpop.permute.xlu0 %2901 }
 0x567   : > { %2949 = vperm.xlu2 %4710, %v2644_v11   ;;  %v2651_v11 = vmul.f32 %v5092_v58, %v6779_v42  ;;  %v5094_v61 = vpop.eup %5093 }
 0x568   : > { %v2650_v42 = vmul.f32 %v5094_v61, %v6782_v44  ;;  %v8343_v61 = vld [vmem:[#allocation56_spill] sm:$0xff] }
 0x569   : > { %2961 = vperm.xlu1 %4711, %v2648_v39   ;;  %v8337_v39 = vld [vmem:[#allocation67_spill] sm:$0xff]  ;;  %v7146_v30 = vpop.permute.xlu2 %2472 }
 0x56a   : > { %v2461_v45 = vpop.permute.xlu1 %2460  ;;  %v1367_v4 = vadd.f32 %v6698_v2, %v8337_v39  ;;  %8338 = vst [vmem:[#allocation125_spill] sm:$0xff] %v7146_v30 }
 0x56b   : > { %v2742_v25 = vmul.f32 %v5090_v18, %v2461_v45  ;;  %v1708_v18 = vmul.f32 1.442695, %v1455_v16  ;;  %v1524_v45 = vmul.f32 1.442695, %v1363_v17  ;;  %v8341_v16 = vld [vmem:[#allocation69_spill] sm:$0xff] }
 0x56c   : > { %v1532_v57 = vmul.f32 1.442695, %v1367_v4  ;;  %v1370_v32 = vadd.f32 %v6698_v2, %v8341_v16  ;;  %v3565_v16 = vld [vmem:[%s5787_s21] sm:$0xff] }
 0x56d   : > { %3243 = vperm.xlu0 %4709, %v2742_v25   ;;  %v1366_v25 = vadd.f32 %v6698_v2, %v8339_v29  ;;  %5097 = vpow2.f32 %v1708_v18 }
 0x56e   : > { %5099 = vpow2.f32 %v1524_v45  ;;  %v1538_v44 = vmul.f32 1.442695, %v1370_v32  ;;  %v1369_v45 = vadd.f32 %v6698_v2, %v8343_v61  ;;  %v8345_v32 = vld [vmem:[#allocation71_spill] sm:$0xff] }
 0x56f   : > { %2958 = vperm.xlu2 %4710, %v2647_v21   ;;  %v5096_v21 = vpop.eup %5095  ;;  %5101 = vpow2.f32 %v1532_v57 }
 0x570   : > { %v2654_v58 = vmul.f32 %v5096_v21, %v8340_v36  ;;  %v8344_v21 = vlaneseq }
 0x571   : > { %2970 = vperm.xlu1 %4711, %v2651_v11   ;;  %v1530_v11 = vmul.f32 1.442695, %v1366_v25 }
 0x572   : > { %v7164_v36 = vand.u32 127, %v8344_v21 }
 0x573   : > { %v5098_v39 = vpop.eup %5097  ;;  %5103 = vpow2.f32 %v1530_v11  ;;  %v1373_v11 = vadd.f32 %v6698_v2, %v8345_v32 }
 0x574   : > { %v5100_v29 = vpop.eup %5099  ;;  %5105 = vpow2.f32 %v1538_v44  ;;  %v7172_v61 = vadd.s32 4294967288, %v7164_v36  ;;  %v7314_v62 = vadd.s32 4294967184, %v7164_v36 }
 0x575   : > { %v2653_v57 = vmul.f32 %v5100_v29, %v6797_v41  ;;  %v5102_v25 = vpop.eup %5101  ;;  %v3262_v29 = vperm.slane %v7121_v43, %v7164_v36  ;;  %v1544_v44 = vmul.f32 1.442695, %v1373_v11 }
 0x577   : > { %2967 = vperm.xlu2 %4710, %v2650_v42   ;;  %v7160_v42 = vpop.permute.xlu0 %2910 }
 0x578   : > { %v7156_v17 = vpop.permute.xlu2 %2484 }
 0x579   : > { %8342 = vst [vmem:[#allocation38_spill] sm:$0xff] %v7156_v17  ;;  %2979 = vperm.xlu1 %4711, %v2654_v58   ;;  %v2657_v58 = vmul.f32 %v5102_v25, %v6806_v7  ;;  %v3821_v7 = vmul.f32 %v3565_v16, %v7121_v43  ;;  %v8348_v43 = vld [vmem:[#allocation73_spill] sm:$0xff] }
 0x57a   : > { %v2479_v4 = vpop.permute.xlu1 %2478  ;;  %v1376_v16 = vadd.f32 %v6698_v2, %v8348_v43  ;;  %v7201_v43 = vadd.s32 4294967280, %v7164_v36 }
 0x57b   : > { %v2745_v18 = vmul.f32 %v5098_v39, %v2479_v4  ;;  %v3566_v39 = vld [vmem:[%s5787_s21 + $0x8] sm:$0xff]  ;;  %v1536_v4 = vmul.f32 1.442695, %v1369_v45 }
 0x57d   : > { %3252 = vperm.xlu0 %4709, %v2745_v18   ;;  %v5104_v18 = vpop.eup %5103  ;;  %5107 = vpow2.f32 %v1536_v4 }
 0x57e   : > { %v2656_v32 = vmul.f32 %v5104_v18, %v6795_v40  ;;  %v5106_v17 = vpop.eup %5105  ;;  %5109 = vpow2.f32 %v1544_v44  ;;  %v1550_v40 = vmul.f32 1.442695, %v1376_v16  ;;  %v8350_v18 = vld [vmem:[#allocation159_spill] sm:$0xff]  ;;  %v8353_v16 = vld [vmem:[#allocation62_spill] sm:$0xff] }
 0x57f   : > { %2976 = vperm.xlu2 %4710, %v2653_v57   ;;  %v7182_v63 = vpop.permute.xlu0 %2919  ;;  %v2660_v49 = vmul.f32 %v5106_v17, %v8347_v46 }
 0x581   : > { %2988 = vperm.xlu1 %4711, %v2657_v58   ;;  %v2881_v41 = vpop.permute.xlu2 %2880  ;;  %v8346_v58 = vld [vmem:[#allocation58_spill] sm:$0xff] }
 0x582   : > { %v3264_v57 = vperm.slane %v2881_v41, %v7172_v61  ;;  %v3822_v25 = vmul.f32 %v3566_v39, %v2881_v41  ;;  %v1372_v30 = vadd.f32 %v6698_v2, %v8346_v58 }
 0x583   : > { %v5108_v11 = vpop.eup %5107 }
 0x584   : > { %v3266_v21 = vsel %vm3265_vm1, %v3264_v57, %v3262_v29  ;;  %v3949_v45 = vadd.f32 %v3822_v25, %v3821_v7  ;;  %v1542_v4 = vmul.f32 1.442695, %v1372_v30  ;;  %v2659_v29 = vmul.f32 %v5108_v11, %v8350_v18  ;;  %v5110_v7 = vpop.eup %5109  ;;  %v8351_v57 = vld [vmem:[#allocation60_spill] sm:$0xff] }
 0x585   : > { %v1375_v46 = vadd.f32 %v6698_v2, %v8351_v57  ;;  %v2663_v17 = vmul.f32 %v5110_v7, %v7094_v8  ;;  %v1378_v11 = vadd.f32 %v6698_v2, %v8353_v16  ;;  %v7206_v8 = vadd.s32 4294967272, %v7164_v36 }
 0x586   : > { %5111 = vpow2.f32 %v1542_v4  ;;  %v3568_v4 = vld [vmem:[%s5787_s21 + $0x18] sm:$0xff] }
 0x587   : > { %2985 = vperm.xlu2 %4710, %v2656_v32   ;;  %5113 = vpow2.f32 %v1550_v40  ;;  %v7195_v44 = vpop.permute.xlu0 %2928  ;;  %v3567_v32 = vld [vmem:[%s5787_s21 + $0x10] sm:$0xff]  ;;  %v1548_v58 = vmul.f32 1.442695, %v1375_v46 }
 0x589   : > { %2997 = vperm.xlu1 %4711, %v2660_v49   ;;  %v2887_v39 = vpop.permute.xlu2 %2886  ;;  %v8352_v49 = vld [vmem:[#allocation75_spill] sm:$0xff]  ;;  %5115 = vpow2.f32 %v1548_v58  ;;  %v1562_v58 = vmul.f32 1.442695, %v1382_v5 }
 0x58a   : > { %v7187_v41 = vpop.permute.xlu1 %2490  ;;  %v1379_v25 = vadd.f32 %v6698_v2, %v8352_v49  ;;  %v3824_v16 = vmul.f32 %v3568_v4, %v2887_v39 }
 0x58b   : > { %8349 = vst [vmem:[#allocation138_spill] sm:$0xff] %v7187_v41 }
 0x58c   : > { %v5112_v18 = vpop.eup %5111 }
 0x58d   : > { %v2662_v46 = vmul.f32 %v5112_v18, %v6820_v55  ;;  %v5114_v49 = vpop.eup %5113 }
 0x58e   : > { %v2666_v24 = vmul.f32 %v5114_v49, %v6826_v53  ;;  %v8355_v53 = vld [vmem:[#allocation64_spill] sm:$0xff] }
 0x58f   : > { %2994 = vperm.xlu2 %4710, %v2659_v29   ;;  %v1556_v29 = vmul.f32 1.442695, %v1379_v25  ;;  %v1554_v25 = vmul.f32 1.442695, %v1378_v11  ;;  %v7226_v37 = vpop.permute.xlu0 %2937  ;;  %v3570_v11 = vld [vmem:[%s5787_s21 + $0x28] sm:$0xff]  ;;  %v5116_v4 = vpop.eup %5115 }
 0x591   : > { %3006 = vperm.xlu1 %4711, %v2663_v17   ;;  %v7197_v30 = vpop.permute.xlu2 %2895  ;;  %v3272_v17 = vperm.slane %v2887_v39, %v7206_v8  ;;  %5117 = vpow2.f32 %v1556_v29 }
 0x592   : > { %5119 = vpow2.f32 %v1554_v25 }
 0x593   : > { %v2884_v40 = vpop.permute.xlu1 %2883  ;;  %5121 = vpow2.f32 %v1562_v58  ;;  %v3573_v58 = vld [vmem:[%s5787_s21 + $0x40] sm:$0xff] }
 0x594   : > { %v3268_v7 = vperm.slane %v2884_v40, %v7201_v43  ;;  %v3823_v57 = vmul.f32 %v3567_v32, %v2884_v40  ;;  %v7218_v40 = vadd.s32 4294967256, %v7164_v36 }
 0x596   : > { %v3270_v41 = vsel %vm3269_vm2, %v3268_v7, %v3266_v21  ;;  %v3950_v23 = vadd.f32 %v3949_v45, %v3823_v57  ;;  %v3569_v21 = vld [vmem:[%s5787_s21 + $0x20] sm:$0xff]  ;;  %v7224_v45 = vadd.s32 4294967264, %v7164_v36  ;;  %v2665_v7 = vmul.f32 %v5116_v4, %v6828_v34  ;;  %v3571_v57 = vld [vmem:[%s5787_s21 + $0x30] sm:$0xff] }
 0x597   : > { %3003 = vperm.xlu2 %4710, %v2662_v46   ;;  %v3274_v32 = vsel %vm3273_vm3, %v3272_v17, %v3270_v41  ;;  %v1381_v41 = vadd.f32 %v6698_v2, %v8355_v53  ;;  %v3280_v5 = vperm.slane %v7134_v54, %v7218_v40  ;;  %v5118_v46 = vpop.eup %5117  ;;  %v3826_v17 = vmul.f32 %v3570_v11, %v7134_v54  ;;  %v8356_v53 = vld [vmem:[#allocation79_spill] sm:$0xff] }
 0x598   : > { %v3951_v55 = vadd.f32 %v3950_v23, %v3824_v16  ;;  %v2669_v34 = vmul.f32 %v5118_v46, %v6834_v31  ;;  %v3827_v54 = vmul.f32 %v3571_v57, %v7197_v30  ;;  %v5120_v9 = vpop.eup %5119  ;;  %v7256_v31 = vadd.s32 4294967240, %v7164_v36 }
 0x599   : > { %3015 = vperm.xlu1 %4711, %v2666_v24   ;;  %v7220_v39 = vpop.permute.xlu2 %2904  ;;  %v7232_v24 = vadd.s32 4294967248, %v7164_v36 }
 0x59b   : > { %v2890_v23 = vpop.permute.xlu1 %2889  ;;  %v3284_v49 = vperm.slane %v7197_v30, %v7232_v24 }
 0x59c   : > { %v3276_v18 = vperm.slane %v2890_v23, %v7224_v45  ;;  %v3825_v29 = vmul.f32 %v3569_v21, %v2890_v23  ;;  %v1385_v21 = vadd.f32 %v6698_v2, %v8356_v53  ;;  %v1560_v23 = vmul.f32 1.442695, %v1381_v41  ;;  %v3572_v41 = vld [vmem:[%s5787_s21 + $0x38] sm:$0xff] }
 0x59e   : > { %v3278_v16 = vsel %vm3277_vm4, %v3276_v18, %v3274_v32  ;;  %v3952_v25 = vadd.f32 %v3951_v55, %v3825_v29  ;;  %v7250_v32 = vadd.s32 4294967232, %v7164_v36  ;;  %v1568_v29 = vmul.f32 1.442695, %v1385_v21  ;;  %v3574_v21 = vld [vmem:[%s5787_s21 + $0x48] sm:$0xff] }
 0x59f   : > { %v3282_v4 = vsel %vm3281_vm5, %v3280_v5, %v3278_v16  ;;  %3012 = vperm.xlu2 %4710, %v2665_v7   ;;  %5123 = vpow2.f32 %v1560_v23  ;;  %v7259_v7 = vpop.permute.xlu0 %2946  ;;  %v7262_v5 = vadd.s32 4294967224, %v7164_v36  ;;  %v8358_v16 = vld [vmem:[#allocation127_spill] sm:$0xff]  ;;  %v5122_v23 = vpop.eup %5121 }
 0x5a0   : > { %v3953_v11 = vadd.f32 %v3952_v25, %v3826_v17  ;;  %v3286_v10 = vsel %vm3285_vm6, %v3284_v49, %v3282_v4  ;;  %v8357_v17 = vld [vmem:[#allocation66_spill] sm:$0xff]  ;;  %v2668_v25 = vmul.f32 %v5120_v9, %v8358_v16  ;;  %v3292_v53 = vperm.slane %v7148_v14, %v7250_v32 }
 0x5a1   : > { %3024 = vperm.xlu1 %4711, %v2669_v34   ;;  %v7252_v55 = vpop.permute.xlu2 %2913  ;;  %v1384_v49 = vadd.f32 %v6698_v2, %v8357_v17  ;;  %v3829_v34 = vmul.f32 %v3573_v58, %v7148_v14  ;;  %v3296_v4 = vperm.slane %v7220_v39, %v7262_v5  ;;  %v2672_v9 = vmul.f32 %v5122_v23, %v6856_v59  ;;  %v3575_v59 = vld [vmem:[%s5787_s21 + $0x50] sm:$0xff] }
 0x5a2   : > { %v3954_v18 = vadd.f32 %v3953_v11, %v3827_v54  ;;  %5125 = vpow2.f32 %v1568_v29  ;;  %v3830_v16 = vmul.f32 %v3574_v21, %v7220_v39 }
 0x5a3   : > { %v2899_v30 = vpop.permute.xlu1 %2898  ;;  %v1566_v3 = vmul.f32 1.442695, %v1384_v49  ;;  %v7294_v49 = vadd.s32 4294967200, %v7164_v36 }
 0x5a4   : > { %v3288_v57 = vperm.slane %v2899_v30, %v7256_v31  ;;  %v3828_v46 = vmul.f32 %v3572_v41, %v2899_v30  ;;  %v8359_v41 = vld [vmem:[#allocation81_spill] sm:$0xff] }
 0x5a5   : > { %v1388_v30 = vadd.f32 %v6698_v2, %v8359_v41  ;;  %v5124_v47 = vpop.eup %5123  ;;  %5127 = vpow2.f32 %v1566_v3  ;;  %v8361_v3 = vld [vmem:[#allocation83_spill] sm:$0xff] }
 0x5a6   : > { %v3290_v54 = vsel %vm3289_vm7, %v3288_v57, %v3286_v10  ;;  %v3955_v11 = vadd.f32 %v3954_v18, %v3828_v46  ;;  %v7282_v10 = vadd.s32 4294967208, %v7164_v36  ;;  %v7288_v57 = vadd.s32 4294967216, %v7164_v36 }
 0x5a7   : > { %v3294_v17 = vsel %vm3293_vm8, %v3292_v53, %v3290_v54  ;;  %3021 = vperm.xlu2 %4710, %v2668_v25   ;;  %v1574_v29 = vmul.f32 1.442695, %v1388_v30  ;;  %v8360_v25 = vld [vmem:[#allocation68_spill] sm:$0xff]  ;;  %v3576_v53 = vld [vmem:[%s5787_s21 + $0x58] sm:$0xff] }
 0x5a8   : > { %v3956_v14 = vadd.f32 %v3955_v11, %v3829_v34  ;;  %v3298_v58 = vsel %vm3297_vm9, %v3296_v4, %v3294_v17  ;;  %v1387_v39 = vadd.f32 %v6698_v2, %v8360_v25  ;;  %v2671_v4 = vmul.f32 %v5124_v47, %v6840_v27  ;;  %v3577_v11 = vld [vmem:[%s5787_s21 + $0x60] sm:$0xff]  ;;  %v5126_v41 = vpop.eup %5125 }
 0x5a9   : > { %3033 = vperm.xlu1 %4711, %v2672_v9   ;;  %v7284_v18 = vpop.permute.xlu2 %2922  ;;  %v3304_v54 = vperm.slane %v7160_v42, %v7282_v10  ;;  %v3832_v30 = vmul.f32 %v3576_v53, %v7160_v42  ;;  %v7302_v9 = vpop.permute.xlu0 %2955  ;;  %v3308_v17 = vperm.slane %v7252_v55, %v7294_v49  ;;  %v1391_v27 = vadd.f32 %v6698_v2, %v8361_v3 }
 0x5aa   : > { %v3957_v46 = vadd.f32 %v3956_v14, %v3830_v16  ;;  %v1572_v47 = vmul.f32 1.442695, %v1387_v39  ;;  %5129 = vpow2.f32 %v1574_v29  ;;  %v3833_v42 = vmul.f32 %v3577_v11, %v7252_v55  ;;  %v3579_v29 = vld [vmem:[%s5787_s21 + $0x70] sm:$0xff] }
 0x5ab   : > { %v2908_v21 = vpop.permute.xlu1 %2907  ;;  %v7318_v39 = vadd.s32 4294967192, %v7164_v36 }
 0x5ac   : > { %v3300_v23 = vperm.slane %v2908_v21, %v7288_v57  ;;  %v3831_v34 = vmul.f32 %v3575_v59, %v2908_v21  ;;  %v2675_v59 = vmul.f32 %v5126_v41, %v6860_v0  ;;  %5131 = vpow2.f32 %v1572_v47  ;;  %v8362_v41 = vld [vmem:[#allocation70_spill] sm:$0xff] }
 0x5ae   : > { %v3302_v16 = vsel %vm3301_vm10, %v3300_v23, %v3298_v58  ;;  %v3958_v14 = vadd.f32 %v3957_v46, %v3831_v34  ;;  %v3578_v46 = vld [vmem:[%s5787_s21 + $0x68] sm:$0xff]  ;;  %v5128_v23 = vpop.eup %5127  ;;  %v1580_v34 = vmul.f32 1.442695, %v1391_v27  ;;  %v3835_v27 = vmul.f32 %v3579_v29, %v7182_v63 }
 0x5af   : > { %v3306_v25 = vsel %vm3305_vm11, %v3304_v54, %v3302_v16  ;;  %3030 = vperm.xlu2 %4710, %v2671_v4   ;;  %v7322_v4 = vadd.s32 4294967176, %v7164_v36  ;;  %v3316_v16 = vperm.slane %v7182_v63, %v7314_v62 }
 0x5b0   : > { %v3959_v53 = vadd.f32 %v3958_v14, %v3832_v30  ;;  %v3310_v21 = vsel %vm3309_vm12, %v3308_v17, %v3306_v25  ;;  %v1390_v30 = vadd.f32 %v6698_v2, %v8362_v41  ;;  %v2674_v17 = vmul.f32 %v5128_v23, %v6846_v50  ;;  %v3580_v14 = vld [vmem:[%s5787_s21 + $0x78] sm:$0xff]  ;;  %v5130_v3 = vpop.eup %5129 }
 0x5b1   : > { %3042 = vperm.xlu1 %4711, %v2675_v59   ;;  %v2932_v58 = vpop.permute.xlu2 %2931  ;;  %v3320_v47 = vperm.slane %v7284_v18, %v7322_v4  ;;  %v8364_v50 = vld [vmem:[#allocation130_spill] sm:$0xff]  ;;  %5133 = vpow2.f32 %v1580_v34  ;;  %v3836_v63 = vmul.f32 %v3580_v14, %v7284_v18  ;;  %v3324_v18 = vperm.slane %v7195_v44, %v7172_v61 }
 0x5b2   : > { %v3960_v0 = vadd.f32 %v3959_v53, %v3833_v42  ;;  %v8363_v42 = vld [vmem:[#allocation85_spill] sm:$0xff] }
 0x5b3   : > { %v2917_v55 = vpop.permute.xlu1 %2916  ;;  %v1394_v53 = vadd.f32 %v6698_v2, %v8363_v42  ;;  %v1578_v42 = vmul.f32 1.442695, %v1390_v30  ;;  %v3326_v30 = vperm.slane %v2932_v58, %v7201_v43 }
 0x5b4   : > { %v3312_v54 = vperm.slane %v2917_v55, %v7318_v39  ;;  %v3834_v11 = vmul.f32 %v3578_v46, %v2917_v55  ;;  %v2678_v46 = vmul.f32 %v5130_v3, %v8364_v50  ;;  %v7339_v55 = vpop.permute.xlu0 %2964 }
 0x5b5   : > { %5135 = vpow2.f32 %v1578_v42 }
 0x5b6   : > { %v3314_v59 = vsel %vm3313_vm13, %v3312_v54, %v3310_v21  ;;  %v3961_v25 = vadd.f32 %v3960_v0, %v3834_v11  ;;  %v5132_v21 = vpop.eup %5131  ;;  %v3582_v0 = vld [vmem:[%s5787_s21 + $0x88] sm:$0xff]  ;;  %v3581_v11 = vld [vmem:[%s5787_s21 + $0x80] sm:$0xff] }
 0x5b7   : > { %v3318_v23 = vsel %vm3317_vm14, %v3316_v16, %v3314_v59  ;;  %3039 = vperm.xlu2 %4710, %v2674_v17   ;;  %v1586_v16 = vmul.f32 1.442695, %v1394_v53  ;;  %v8365_v59 = vld [vmem:[#allocation72_spill] sm:$0xff]  ;;  %v3583_v17 = vld [vmem:[%s5787_s21 + $0x90] sm:$0xff]  ;;  %v3838_v14 = vmul.f32 %v3582_v0, %v7195_v44  ;;  %v8366_v0 = vld [vmem:[#allocation87_spill] sm:$0xff] }
 0x5b8   : > { %v3962_v29 = vadd.f32 %v3961_v25, %v3835_v27  ;;  %v7343_v41 = vsel %vm3321_vm15, %v3320_v47, %v3318_v23  ;;  %v1393_v34 = vadd.f32 %v6698_v2, %v8365_v59  ;;  %v2677_v25 = vmul.f32 %v5132_v21, %v6864_v1 }
 0x5b9   : > { %3051 = vperm.xlu1 %4711, %v2678_v46   ;;  %v2941_v54 = vpop.permute.xlu2 %2940  ;;  %v5134_v46 = vpop.eup %5133  ;;  %v3839_v53 = vmul.f32 %v3583_v17, %v2932_v58  ;;  %5137 = vpow2.f32 %v1586_v16  ;;  %v3585_v58 = vld [vmem:[%s5787_s21 + $0xa0] sm:$0xff]  ;;  %v8367_v16 = vld [vmem:[#allocation74_spill] sm:$0xff] }
 0x5ba   : > { %v7347_v3 = vadd.f32 %v3962_v29, %v3836_v63  ;;  %v2681_v29 = vmul.f32 %v5134_v46, %v6881_v19  ;;  %v1584_v1 = vmul.f32 1.442695, %v1393_v34  ;;  %v3330_v34 = vperm.slane %v7226_v37, %v7224_v45 }
 0x5bb   : > { %v2926_v50 = vpop.permute.xlu1 %2925 }
 0x5bc   : > { %v3323_v27 = vperm.slane %v2926_v50, %v7164_v36  ;;  %v3837_v47 = vmul.f32 %v3581_v11, %v2926_v50  ;;  %v1397_v11 = vadd.f32 %v6698_v2, %v8366_v0  ;;  %v3584_v50 = vld [vmem:[%s5787_s21 + $0x98] sm:$0xff]  ;;  %v7364_v42 = vpop.permute.xlu0 %2973  ;;  %5139 = vpow2.f32 %v1584_v1  ;;  %v8368_v0 = vld [vmem:[#allocation89_spill] sm:$0xff] }
 0x5be   : > { %v3325_v23 = vsel %vm3265_vm1, %v3324_v18, %v3323_v27  ;;  %v3970_v63 = vadd.f32 %v3838_v14, %v3837_v47  ;;  %v5136_v18 = vpop.eup %5135  ;;  %v1592_v14 = vmul.f32 1.442695, %v1397_v11  ;;  %v1396_v47 = vadd.f32 %v6698_v2, %v8367_v16  ;;  %v3588_v16 = vld [vmem:[%s5787_s21 + $0xb8] sm:$0xff] }
 0x5bf   : > { %3048 = vperm.xlu2 %4710, %v2677_v25   ;;  %v3327_v44 = vsel %vm3269_vm2, %v3326_v30, %v3325_v23  ;;  %v2680_v25 = vmul.f32 %v5136_v18, %v6870_v56  ;;  %v3586_v30 = vld [vmem:[%s5787_s21 + $0xa8] sm:$0xff]  ;;  %v5138_v46 = vpop.eup %5137  ;;  %v3332_v23 = vperm.slane %v2941_v54, %v7218_v40  ;;  %v1400_v11 = vadd.f32 %v6698_v2, %v8368_v0 }
 0x5c0   : > { %v3971_v21 = vadd.f32 %v3970_v63, %v3839_v53  ;;  %v3841_v53 = vmul.f32 %v3585_v58, %v7226_v37  ;;  %v2684_v1 = vmul.f32 %v5138_v46, %v6885_v26  ;;  %5141 = vpow2.f32 %v1592_v14  ;;  %v3589_v46 = vld [vmem:[%s5787_s21 + $0xc0] sm:$0xff] }
 0x5c1   : > { %3060 = vperm.xlu1 %4711, %v2681_v29   ;;  %v2950_v59 = vpop.permute.xlu2 %2949  ;;  %v3842_v56 = vmul.f32 %v3586_v30, %v2941_v54  ;;  %v1590_v37 = vmul.f32 1.442695, %v1396_v47  ;;  %v8369_v54 = vld [vmem:[#allocation76_spill] sm:$0xff]  ;;  %v3336_v30 = vperm.slane %v7259_v7, %v7256_v31 }
 0x5c2   : > { %v1399_v14 = vadd.f32 %v6698_v2, %v8369_v54 }
 0x5c3   : > { %v2935_v17 = vpop.permute.xlu1 %2934  ;;  %5143 = vpow2.f32 %v1590_v37  ;;  %v3845_v37 = vmul.f32 %v3589_v46, %v2950_v59  ;;  %v3592_v46 = vld [vmem:[%s5787_s21 + $0xd8] sm:$0xff] }
 0x5c4   : > { %v3328_v19 = vperm.slane %v2935_v17, %v7206_v8  ;;  %v3840_v27 = vmul.f32 %v3584_v50, %v2935_v17  ;;  %v7384_v33 = vpop.permute.xlu0 %2982 }
 0x5c6   : > { %v3329_v63 = vsel %vm3273_vm3, %v3328_v19, %v3327_v44  ;;  %v3972_v29 = vadd.f32 %v3971_v21, %v3840_v27  ;;  %v3587_v44 = vld [vmem:[%s5787_s21 + $0xb0] sm:$0xff]  ;;  %v5140_v21 = vpop.eup %5139  ;;  %v1598_v27 = vmul.f32 1.442695, %v1400_v11 }
 0x5c7   : > { %v3331_v50 = vsel %vm3277_vm4, %v3330_v34, %v3329_v63  ;;  %3057 = vperm.xlu2 %4710, %v2680_v25   ;;  %v8370_v25 = vld [vmem:[#allocation133_spill] sm:$0xff]  ;;  %v3338_v63 = vperm.slane %v2950_v59, %v7250_v32 }
 0x5c8   : > { %v3973_v17 = vadd.f32 %v3972_v29, %v3841_v53  ;;  %v3333_v18 = vsel %vm3281_vm5, %v3332_v23, %v3331_v50  ;;  %v2683_v47 = vmul.f32 %v5140_v21, %v8370_v25  ;;  %v5142_v53 = vpop.eup %5141  ;;  %v3844_v23 = vmul.f32 %v3588_v16, %v7259_v7 }
 0x5c9   : > { %3069 = vperm.xlu1 %4711, %v2684_v1   ;;  %v2959_v58 = vpop.permute.xlu2 %2958  ;;  %5145 = vpow2.f32 %v1598_v27  ;;  %v2687_v1 = vmul.f32 %v5142_v53, %v6907_v48  ;;  %v1596_v7 = vmul.f32 1.442695, %v1399_v14  ;;  %v5144_v27 = vpop.eup %5143  ;;  %v3342_v14 = vperm.slane %v7302_v9, %v7288_v57 }
 0x5ca   : > { %v3974_v19 = vadd.f32 %v3973_v17, %v3842_v56  ;;  %v8371_v56 = vld [vmem:[#allocation91_spill] sm:$0xff] }
 0x5cb   : > { %v2944_v0 = vpop.permute.xlu1 %2943  ;;  %v1403_v17 = vadd.f32 %v6698_v2, %v8371_v56  ;;  %5147 = vpow2.f32 %v1596_v7 }
 0x5cc   : > { %v3334_v26 = vperm.slane %v2944_v0, %v7232_v24  ;;  %v3843_v34 = vmul.f32 %v3587_v44, %v2944_v0  ;;  %v8372_v0 = vld [vmem:[#allocation78_spill] sm:$0xff] }
 0x5cd   : > { %v1402_v48 = vadd.f32 %v6698_v2, %v8372_v0  ;;  %v1604_v54 = vmul.f32 1.442695, %v1403_v17  ;;  %v3597_v17 = vld [vmem:[%s5787_s21 + $0x100] sm:$0xff]  ;;  %v3594_v0 = vld [vmem:[%s5787_s21 + $0xe8] sm:$0xff] }
 0x5ce   : > { %v3335_v29 = vsel %vm3285_vm6, %v3334_v26, %v3333_v18  ;;  %v3975_v11 = vadd.f32 %v3974_v19, %v3843_v34  ;;  %v3590_v18 = vld [vmem:[%s5787_s21 + $0xc8] sm:$0xff]  ;;  %v3591_v26 = vld [vmem:[%s5787_s21 + $0xd0] sm:$0xff] }
 0x5cf   : > { %v3337_v50 = vsel %vm3289_vm7, %v3336_v30, %v3335_v29  ;;  %3066 = vperm.xlu2 %4710, %v2683_v47   ;;  %v5146_v47 = vpop.eup %5145  ;;  %v2686_v30 = vmul.f32 %v5144_v27, %v6890_v60  ;;  %v3847_v53 = vmul.f32 %v3591_v26, %v7302_v9  ;;  %v1602_v56 = vmul.f32 1.442695, %v1402_v48  ;;  %v3598_v9 = vld [vmem:[%s5787_s21 + $0x108] sm:$0xff]  ;;  %v3593_v27 = vld [vmem:[%s5787_s21 + $0xe0] sm:$0xff] }
 0x5d0   : > { %v3976_v44 = vadd.f32 %v3975_v11, %v3844_v23  ;;  %v3339_v21 = vsel %vm3293_vm8, %v3338_v63, %v3337_v50  ;;  %v7413_v23 = vpop.permute.xlu0 %2991  ;;  %v3344_v63 = vperm.slane %v2959_v58, %v7282_v10  ;;  %5149 = vpow2.f32 %v1604_v54 }
 0x5d1   : > { %3078 = vperm.xlu1 %4711, %v2687_v1   ;;  %v7401_v16 = vpop.permute.xlu2 %2967  ;;  %v8373_v1 = vld [vmem:[#allocation93_spill] sm:$0xff]  ;;  %v3853_v48 = vmul.f32 %v3597_v17, %v7364_v42  ;;  %5151 = vpow2.f32 %v1602_v56 }
 0x5d2   : > { %v3977_v19 = vadd.f32 %v3976_v44, %v3845_v37  ;;  %v1406_v50 = vadd.f32 %v6698_v2, %v8373_v1  ;;  %v2690_v37 = vmul.f32 %v5146_v47, %v6911_v6  ;;  %v3848_v44 = vmul.f32 %v3592_v46, %v2959_v58  ;;  %v8374_v46 = vld [vmem:[#allocation80_spill] sm:$0xff] }
 0x5d3   : > { %v2953_v34 = vpop.permute.xlu1 %2952  ;;  %v3350_v56 = vperm.slane %v7401_v16, %v7314_v62 }
 0x5d4   : > { %v3340_v59 = vperm.slane %v2953_v34, %v7262_v5  ;;  %v3846_v25 = vmul.f32 %v3590_v18, %v2953_v34  ;;  %v1610_v54 = vmul.f32 1.442695, %v1406_v50  ;;  %v3964_v50 = vrot.slane %v7347_v3, 4 }
 0x5d6   : > { %v3341_v29 = vsel %vm3297_vm9, %v3340_v59, %v3339_v21  ;;  %v3978_v11 = vadd.f32 %v3977_v19, %v3846_v25  ;;  %v3354_v21 = vperm.slane %v7364_v42, %v7164_v36  ;;  %v5148_v59 = vpop.eup %5147  ;;  %v1405_v42 = vadd.f32 %v6698_v2, %v8374_v46 }
 0x5d7   : > { %v3343_v60 = vsel %vm3301_vm10, %v3342_v14, %v3341_v29  ;;  %3075 = vperm.xlu2 %4710, %v2686_v30   ;;  %v2689_v29 = vmul.f32 %v5148_v59, %v6896_v12  ;;  %v5150_v1 = vpop.eup %5149  ;;  %5153 = vpow2.f32 %v1610_v54  ;;  %v8377_v59 = vld [vmem:[#allocation82_spill] sm:$0xff] }
 0x5d8   : > { %v3979_v7 = vadd.f32 %v3978_v11, %v3847_v53  ;;  %v3345_v18 = vsel %vm3305_vm11, %v3344_v63, %v3343_v60  ;;  %v3348_v53 = vperm.slane %v7339_v55, %v7318_v39  ;;  %v3850_v63 = vmul.f32 %v3594_v0, %v7339_v55  ;;  %v3595_v11 = vld [vmem:[%s5787_s21 + $0xf0] sm:$0xff]  ;;  %v8376_v55 = vld [vmem:[#allocation96_spill] sm:$0xff]  ;;  %v5152_v0 = vpop.eup %5151 }
 0x5d9   : > { %3087 = vperm.xlu1 %4711, %v2690_v37   ;;  %v2977_v19 = vpop.permute.xlu2 %2976  ;;  %v8375_v60 = vld [vmem:[#allocation137_spill] sm:$0xff]  ;;  %v1409_v12 = vadd.f32 %v6698_v2, %v8376_v55  ;;  %v1408_v54 = vadd.f32 %v6698_v2, %v8377_v59 }
 0x5da   : > { %v3355_v6 = vperm.slane %v2977_v19, %v7172_v61  ;;  %v3854_v26 = vmul.f32 %v3598_v9, %v2977_v19  ;;  %v3980_v34 = vadd.f32 %v3979_v7, %v3848_v44  ;;  %v2693_v9 = vmul.f32 %v5150_v1, %v8375_v60  ;;  %v7451_v7 = vpop.permute.xlu0 %3000  ;;  %v3600_v60 = vld [vmem:[%s5787_s21 + $0x118] sm:$0xff] }
 0x5db   : > { %v2962_v58 = vpop.permute.xlu1 %2961 }
 0x5dc   : > { %v7431_v25 = vsel %vm3265_vm1, %v3355_v6, %v3354_v21  ;;  %v7433_v47 = vadd.f32 %v3854_v26, %v3853_v48  ;;  %v3346_v14 = vperm.slane %v2962_v58, %v7294_v49  ;;  %v3849_v30 = vmul.f32 %v3593_v27, %v2962_v58  ;;  %v3596_v48 = vld [vmem:[%s5787_s21 + $0xf8] sm:$0xff] }
 0x5dd   : > { %v3851_v21 = vmul.f32 %v3595_v11, %v7401_v16  ;;  %v1608_v6 = vmul.f32 1.442695, %v1405_v42  ;;  %v3965_v26 = vadd.f32 %v3964_v50, %v7347_v3  ;;  %v5154_v46 = vpop.eup %5153  ;;  %v8378_v50 = vld [vmem:[#allocation99_spill] sm:$0xff] }
 0x5de   : > { %v3347_v17 = vsel %vm3309_vm12, %v3346_v14, %v3345_v18  ;;  %v3981_v37 = vadd.f32 %v3980_v34, %v3849_v30  ;;  %v1616_v14 = vmul.f32 1.442695, %v1409_v12  ;;  %v2696_v11 = vmul.f32 %v5154_v46, %v6932_v20  ;;  %v8380_v46 = vld [vmem:[#allocation102_spill] sm:$0xff] }
 0x5df   : > { %v3349_v44 = vsel %vm3313_vm13, %v3348_v53, %v3347_v17  ;;  %3084 = vperm.xlu2 %4710, %v2689_v29   ;;  %v2692_v53 = vmul.f32 %v5152_v0, %v6915_v22  ;;  %5155 = vpow2.f32 %v1608_v6  ;;  %v1614_v29 = vmul.f32 1.442695, %v1408_v54  ;;  %v8379_v0 = vld [vmem:[#allocation84_spill] sm:$0xff] }
 0x5e0   : > { %v3982_v19 = vadd.f32 %v3981_v37, %v3850_v63  ;;  %v3351_v27 = vsel %vm3317_vm14, %v3350_v56, %v3349_v44  ;;  %v3966_v63 = vrot.slane %v3965_v26, 2  ;;  %5157 = vpow2.f32 %v1616_v14  ;;  %v3599_v37 = vld [vmem:[%s5787_s21 + $0x110] sm:$0xff] }
 0x5e1   : > { %3096 = vperm.xlu1 %4711, %v2693_v9   ;;  %v7455_v18 = vpop.permute.xlu2 %2985  ;;  %v1412_v56 = vadd.f32 %v6698_v2, %v8378_v50  ;;  %5159 = vpow2.f32 %v1614_v29  ;;  %v3359_v6 = vperm.slane %v7384_v33, %v7206_v8  ;;  %v3602_v50 = vld [vmem:[%s5787_s21 + $0x128] sm:$0xff] }
 0x5e2   : > { %v3983_v34 = vadd.f32 %v3982_v19, %v3851_v21  ;;  %v7475_v9 = vpop.permute.xlu0 %3009  ;;  %v3967_v44 = vadd.f32 %v3966_v63, %v3965_v26  ;;  %v3601_v26 = vld [vmem:[%s5787_s21 + $0x120] sm:$0xff] }
 0x5e3   : > { %v2971_v58 = vpop.permute.xlu1 %2970  ;;  %v1622_v12 = vmul.f32 1.442695, %v1412_v56 }
 0x5e4   : > { %v3352_v16 = vperm.slane %v2971_v58, %v7322_v4  ;;  %v3852_v30 = vmul.f32 %v3596_v48, %v2971_v58  ;;  %v1411_v48 = vadd.f32 %v6698_v2, %v8379_v0  ;;  %v3968_v58 = vrot.slane %v3967_v44, 1  ;;  %v8382_v0 = vld [vmem:[#allocation140_spill] sm:$0xff] }
 0x5e5   : > { %5161 = vpow2.f32 %v1622_v12 }
 0x5e6   : > { %v3353_v42 = vsel %vm3321_vm15, %v3352_v16, %v3351_v27  ;;  %v3984_v3 = vadd.f32 %v3983_v34, %v3852_v30  ;;  %v3856_v34 = vmul.f32 %v3600_v60, %v7384_v33  ;;  %v3361_v33 = vperm.slane %v7455_v18, %v7224_v45 }
 0x5e7   : > { %v7467_v1 = vsel %vm3540_vm0, %v3353_v42, %v7343_v41  ;;  %3093 = vperm.xlu2 %4710, %v2692_v53   ;;  %v5156_v41 = vpop.eup %5155  ;;  %v1415_v53 = vadd.f32 %v6698_v2, %v8380_v46  ;;  %v3857_v42 = vmul.f32 %v3601_v26, %v7455_v18  ;;  %v3969_v56 = vadd.f32 %v3968_v58, %v3967_v44 }
 0x5e8   : > { %v3985_v17 = vrot.slane %v3984_v3, 4  ;;  %v2695_v59 = vmul.f32 %v5156_v41, %v6921_v28  ;;  %v5158_v54 = vpop.eup %5157  ;;  %v3365_v44 = vperm.slane %v7413_v23, %v7232_v24 }
 0x5e9   : > { %3105 = vperm.xlu1 %4711, %v2696_v11   ;;  %v7471_v22 = vpop.permute.xlu2 %2994  ;;  %v2699_v63 = vmul.f32 %v5158_v54, %v6936_v51  ;;  %v1620_v11 = vmul.f32 1.442695, %v1411_v48  ;;  %v1628_v60 = vmul.f32 1.442695, %v1415_v53 }
 0x5ea   : > { %v3986_v20 = vadd.f32 %v3985_v17, %v3984_v3  ;;  %v7498_v41 = vpop.permute.xlu0 %3018  ;;  %v3367_v26 = vperm.slane %v7471_v22, %v7256_v31 }
 0x5eb   : > { %v2980_v55 = vpop.permute.xlu1 %2979  ;;  %5163 = vpow2.f32 %v1620_v11 }
 0x5ec   : > { %v3987_v21 = vrot.slane %v3986_v20, 2  ;;  %v3357_v19 = vperm.slane %v2980_v55, %v7201_v43  ;;  %v3855_v27 = vmul.f32 %v3599_v37, %v2980_v55  ;;  %5165 = vpow2.f32 %v1628_v60 }
 0x5ee   : > { %v3988_v14 = vadd.f32 %v3987_v21, %v3986_v20  ;;  %v3358_v16 = vsel %vm3269_vm2, %v3357_v19, %v7431_v25  ;;  %v3992_v30 = vadd.f32 %v7433_v47, %v3855_v27  ;;  %v5160_v25 = vpop.eup %5159  ;;  %v3603_v20 = vld [vmem:[%s5787_s21 + $0x130] sm:$0xff] }
 0x5ef   : > { %v3360_v28 = vsel %vm3273_vm3, %v3359_v6, %v3358_v16  ;;  %3102 = vperm.xlu2 %4710, %v2695_v59   ;;  %v8381_v19 = vld [vmem:[#allocation86_spill] sm:$0xff]  ;;  %v2698_v48 = vmul.f32 %v5160_v25, %v8382_v0  ;;  %v3859_v59 = vmul.f32 %v3603_v20, %v7413_v23  ;;  %v3606_v25 = vld [vmem:[%s5787_s21 + $0x148] sm:$0xff] }
 0x5f0   : > { %v3989_v3 = vrot.slane %v3988_v14, 1  ;;  %v3993_v29 = vadd.f32 %v3992_v30, %v3856_v34  ;;  %v3362_v51 = vsel %vm3277_vm4, %v3361_v33, %v3360_v28  ;;  %v1414_v27 = vadd.f32 %v6698_v2, %v8381_v19  ;;  %v3604_v6 = vld [vmem:[%s5787_s21 + $0x138] sm:$0xff]  ;;  %v5162_v34 = vpop.eup %5161  ;;  %v8383_v30 = vld [vmem:[#allocation105_spill] sm:$0xff]  ;;  %v8385_v0 = vld [vmem:[#allocation108_spill] sm:$0xff] }
 0x5f1   : > { %3114 = vperm.xlu1 %4711, %v2699_v63   ;;  %v3004_v47 = vpop.permute.xlu2 %3003  ;;  %v1418_v46 = vadd.f32 %v6698_v2, %v8383_v30  ;;  %v3860_v53 = vmul.f32 %v3604_v6, %v7471_v22  ;;  %v3607_v20 = vld [vmem:[%s5787_s21 + $0x150] sm:$0xff]  ;;  %v3609_v30 = vld [vmem:[%s5787_s21 + $0x160] sm:$0xff] }
 0x5f2   : > { %v3990_v17 = vadd.f32 %v3989_v3, %v3988_v14  ;;  %v3994_v37 = vadd.f32 %v3993_v29, %v3857_v42  ;;  %v2702_v14 = vmul.f32 %v5162_v34, %v6958_v52  ;;  %v1626_v33 = vmul.f32 1.442695, %v1414_v27  ;;  %v3605_v42 = vld [vmem:[%s5787_s21 + $0x140] sm:$0xff]  ;;  %v5164_v29 = vpop.eup %5163 }
 0x5f3   : > { %v2989_v55 = vpop.permute.xlu1 %2988  ;;  %v1634_v11 = vmul.f32 1.442695, %v1418_v46  ;;  %v2701_v60 = vmul.f32 %v5164_v29, %v6941_v38  ;;  %v3863_v38 = vmul.f32 %v3607_v20, %v3004_v47 }
 0x5f4   : > { %v7501_v18 = vsel %vm3540_vm0, %v3990_v17, %v3969_v56  ;;  %v3363_v12 = vperm.slane %v2989_v55, %v7218_v40  ;;  %v3858_v21 = vmul.f32 %v3602_v50, %v2989_v55  ;;  %v5166_v56 = vpop.eup %5165  ;;  %5167 = vpow2.f32 %v1626_v33  ;;  %v8384_v17 = vld [vmem:[#allocation88_spill] sm:$0xff]  ;;  %v8387_v33 = vld [vmem:[#allocation143_spill] sm:$0xff] }
 0x5f5   : > { %v1417_v22 = vadd.f32 %v6698_v2, %v8384_v17  ;;  %v3862_v55 = vmul.f32 %v3606_v25, %v7451_v7  ;;  %5169 = vpow2.f32 %v1634_v11  ;;  %v3865_v25 = vmul.f32 %v3609_v30, %v7475_v9 }
 0x5f6   : > { %v3364_v54 = vsel %vm3281_vm5, %v3363_v12, %v3362_v51  ;;  %v3995_v58 = vadd.f32 %v3994_v37, %v3858_v21  ;;  %v3371_v37 = vperm.slane %v7451_v7, %v7262_v5  ;;  %v7530_v12 = vpop.permute.xlu0 %3027  ;;  %v3373_v21 = vperm.slane %v3004_v47, %v7288_v57 }
 0x5f7   : > { %v3366_v16 = vsel %vm3285_vm6, %v3365_v44, %v3364_v54  ;;  %3111 = vperm.xlu2 %4710, %v2698_v48   ;;  %v1421_v48 = vadd.f32 %v6698_v2, %v8385_v0  ;;  %v2705_v44 = vmul.f32 %v5166_v56, %v6962_v35  ;;  %v3608_v54 = vld [vmem:[%s5787_s21 + $0x158] sm:$0xff]  ;;  %vm3542_vm0 = vcmask 1042434  }
 0x5f8   : > { %v3996_v63 = vadd.f32 %v3995_v58, %v3859_v59  ;;  %v3368_v23 = vsel %vm3289_vm7, %v3367_v26, %v3366_v16  ;;  %v1632_v59 = vmul.f32 1.442695, %v1417_v22  ;;  %v8389_v22 = vld [vmem:[#allocation111_spill] sm:$0xff] }
 0x5f9   : > { %3123 = vperm.xlu1 %4711, %v2702_v14   ;;  %v3013_v28 = vpop.permute.xlu2 %3012  ;;  %v1640_v16 = vmul.f32 1.442695, %v1421_v48 }
 0x5fa   : > { %v3997_v3 = vadd.f32 %v3996_v63, %v3860_v53  ;;  %v5168_v14 = vpop.eup %5167  ;;  %5171 = vpow2.f32 %v1632_v59  ;;  %v8386_v63 = vld [vmem:[#allocation90_spill] sm:$0xff] }
 0x5fb   : > { %v2998_v52 = vpop.permute.xlu1 %2997  ;;  %v1420_v47 = vadd.f32 %v6698_v2, %v8386_v63  ;;  %v5170_v29 = vpop.eup %5169  ;;  %5173 = vpow2.f32 %v1640_v16 }
 0x5fc   : > { %v3369_v50 = vperm.slane %v2998_v52, %v7250_v32  ;;  %v3861_v51 = vmul.f32 %v3605_v42, %v2998_v52  ;;  %v2704_v42 = vmul.f32 %v5168_v14, %v8387_v33  ;;  %v3379_v52 = vperm.slane %v3013_v28, %v7318_v39  ;;  %v8391_v14 = vld [vmem:[#allocation95_spill] sm:$0xff] }
 0x5fe   : > { %v3370_v19 = vsel %vm3293_vm8, %v3369_v50, %v3368_v23  ;;  %v3998_v27 = vadd.f32 %v3997_v3, %v3861_v51  ;;  %v3377_v23 = vperm.slane %v7475_v9, %v7294_v49  ;;  %v3610_v3 = vld [vmem:[%s5787_s21 + $0x168] sm:$0xff]  ;;  %v8388_v51 = vld [vmem:[#allocation147_spill] sm:$0xff] }
 0x5ff   : > { %v3372_v6 = vsel %vm3297_vm9, %v3371_v37, %v3370_v19  ;;  %3120 = vperm.xlu2 %4710, %v2701_v60   ;;  %v2708_v56 = vmul.f32 %v5170_v29, %v8388_v51  ;;  %v1424_v37 = vadd.f32 %v6698_v2, %v8389_v22  ;;  %v7557_v60 = vpop.permute.xlu0 %3036  ;;  %v3866_v20 = vmul.f32 %v3610_v3, %v3013_v28  ;;  %v3611_v19 = vld [vmem:[%s5787_s21 + $0x170] sm:$0xff] }
 0x600   : > { %v3999_v7 = vadd.f32 %v3998_v27, %v3862_v55  ;;  %v3374_v34 = vsel %vm3301_vm10, %v3373_v21, %v3372_v6  ;;  %v1638_v27 = vmul.f32 1.442695, %v1420_v47  ;;  %v5172_v48 = vpop.eup %5171 }
 0x601   : > { %3132 = vperm.xlu1 %4711, %v2705_v44   ;;  %v7539_v26 = vpop.permute.xlu2 %3021  ;;  %v8390_v44 = vld [vmem:[#allocation92_spill] sm:$0xff]  ;;  %v5174_v28 = vpop.eup %5173  ;;  %v2707_v16 = vmul.f32 %v5172_v48, %v8391_v14  ;;  %v8394_v48 = vld [vmem:[#allocation98_spill] sm:$0xff] }
 0x602   : > { %v4000_v58 = vadd.f32 %v3999_v7, %v3863_v38  ;;  %v1423_v6 = vadd.f32 %v6698_v2, %v8390_v44  ;;  %v3612_v38 = vld [vmem:[%s5787_s21 + $0x178] sm:$0xff]  ;;  %5175 = vpow2.f32 %v1638_v27  ;;  %v3388_v27 = vperm.slane %v7530_v12, %v7201_v43 }
 0x603   : > { %v3007_v46 = vpop.permute.xlu1 %3006  ;;  %v3868_v30 = vmul.f32 %v3612_v38, %v7498_v41 }
 0x604   : > { %v3375_v35 = vperm.slane %v3007_v46, %v7282_v10  ;;  %v3864_v53 = vmul.f32 %v3608_v54, %v3007_v46  ;;  %v1644_v47 = vmul.f32 1.442695, %v1423_v6  ;;  %v3616_v6 = vld [vmem:[%s5787_s21 + $0x198] sm:$0xff] }
 0x606   : > { %v3376_v11 = vsel %vm3305_vm11, %v3375_v35, %v3374_v34  ;;  %v4001_v50 = vadd.f32 %v4000_v58, %v3864_v53  ;;  %v1646_v34 = vmul.f32 1.442695, %v1424_v37  ;;  %v3383_v58 = vperm.slane %v7498_v41, %v7322_v4  ;;  %v8392_v53 = vld [vmem:[#allocation114_spill] sm:$0xff] }
 0x607   : > { %v3378_v17 = vsel %vm3309_vm12, %v3377_v23, %v3376_v11  ;;  %3129 = vperm.xlu2 %4710, %v2704_v42   ;;  %v1427_v63 = vadd.f32 %v6698_v2, %v8392_v53  ;;  %v2711_v23 = vmul.f32 %v5174_v28, %v6983_v13  ;;  %v8393_v41 = vld [vmem:[#allocation94_spill] sm:$0xff]  ;;  %v3614_v11 = vld [vmem:[%s5787_s21 + $0x188] sm:$0xff]  ;;  %v7587_v13 = vpop.permute.xlu0 %3045 }
 0x608   : > { %v4002_v55 = vadd.f32 %v4001_v50, %v3865_v25  ;;  %v3380_v9 = vsel %vm3313_vm13, %v3379_v52, %v3378_v17  ;;  %5177 = vpow2.f32 %v1646_v34  ;;  %v1426_v29 = vadd.f32 %v6698_v2, %v8393_v41  ;;  %v3613_v25 = vld [vmem:[%s5787_s21 + $0x180] sm:$0xff]  ;;  %v3615_v50 = vld [vmem:[%s5787_s21 + $0x190] sm:$0xff]  ;;  %v5176_v22 = vpop.eup %5175 }
 0x609   : > { %3141 = vperm.xlu1 %4711, %v2708_v56   ;;  %v7560_v21 = vpop.permute.xlu2 %3030  ;;  %v1652_v56 = vmul.f32 1.442695, %v1427_v63  ;;  %5179 = vpow2.f32 %v1644_v47  ;;  %v3869_v37 = vmul.f32 %v3613_v25, %v7539_v26  ;;  %v2710_v44 = vmul.f32 %v5176_v22, %v8394_v48  ;;  %v3617_v63 = vld [vmem:[%s5787_s21 + $0x1a0] sm:$0xff]  ;;  %v3618_v47 = vld [vmem:[%s5787_s21 + $0x1a8] sm:$0xff] }
 0x60a   : > { %v4003_v0 = vadd.f32 %v4002_v55, %v3866_v20  ;;  %v3872_v14 = vmul.f32 %v3616_v6, %v7560_v21  ;;  %v3874_v22 = vmul.f32 %v3618_v47, %v7557_v60  ;;  %v8401_v47 = vld [vmem:[#allocation101_spill] sm:$0xff] }
 0x60b   : > { %v3016_v7 = vpop.permute.xlu1 %3015  ;;  %5181 = vpow2.f32 %v1652_v56  ;;  %v8397_v56 = vld [vmem:[#allocation151_spill] sm:$0xff] }
 0x60c   : > { %v3381_v59 = vperm.slane %v3016_v7, %v7314_v62  ;;  %v3867_v54 = vmul.f32 %v3611_v19, %v3016_v7  ;;  %v1650_v19 = vmul.f32 1.442695, %v1426_v29  ;;  %v3390_v7 = vperm.slane %v7560_v21, %v7206_v8 }
 0x60e   : > { %v3382_v46 = vsel %vm3317_vm14, %v3381_v59, %v3380_v9  ;;  %v4004_v35 = vadd.f32 %v4003_v0, %v3867_v54  ;;  %v3871_v0 = vmul.f32 %v3615_v50, %v7530_v12  ;;  %v5178_v38 = vpop.eup %5177  ;;  %v8395_v54 = vld [vmem:[#allocation117_spill] sm:$0xff]  ;;  %5183 = vpow2.f32 %v1650_v19 }
 0x60f   : > { %v3384_v33 = vsel %vm3321_vm15, %v3383_v58, %v3382_v46  ;;  %3138 = vperm.xlu2 %4710, %v2707_v16   ;;  %v1430_v28 = vadd.f32 %v6698_v2, %v8395_v54  ;;  %v2714_v58 = vmul.f32 %v5178_v38, %v6987_v15  ;;  %v7609_v15 = vpop.permute.xlu0 %3054  ;;  %v8396_v50 = vld [vmem:[#allocation97_spill] sm:$0xff] }
 0x610   : > { %v7578_v42 = vsel %vm3542_vm0, %v3384_v33, %v7467_v1  ;;  %v4005_v3 = vadd.f32 %v4004_v35, %v3868_v30  ;;  %v3385_v1 = vperm.slane %v7539_v26, %v7164_v36  ;;  %v5180_v35 = vpop.eup %5179 }
 0x611   : > { %3150 = vperm.xlu1 %4711, %v2711_v23   ;;  %v7583_v52 = vpop.permute.xlu2 %3039 }
 0x612   : > { %v4006_v51 = vrot.slane %v4005_v3, 4 }
 0x613   : > { %v3025_v17 = vpop.permute.xlu1 %3024 }
 0x614   : > { %v4007_v20 = vadd.f32 %v4006_v51, %v4005_v3  ;;  %v3386_v55 = vperm.slane %v3025_v17, %v7172_v61  ;;  %v3870_v9 = vmul.f32 %v3614_v11, %v3025_v17  ;;  %v1658_v3 = vmul.f32 1.442695, %v1430_v28  ;;  %v5182_v11 = vpop.eup %5181  ;;  %v3621_v28 = vld [vmem:[%s5787_s21 + $0x1c0] sm:$0xff] }
 0x615   : > { %v1429_v51 = vadd.f32 %v6698_v2, %v8396_v50  ;;  %v3394_v17 = vperm.slane %v7557_v60, %v7218_v40  ;;  %v8399_v60 = vld [vmem:[#allocation120_spill] sm:$0xff]  ;;  %v8403_v50 = vld [vmem:[#allocation110_spill] sm:$0xff] }
 0x616   : > { %v4008_v34 = vrot.slane %v4007_v20, 2  ;;  %v3387_v26 = vsel %vm3265_vm1, %v3386_v55, %v3385_v1  ;;  %v4012_v59 = vadd.f32 %v3870_v9, %v3869_v37  ;;  %v2713_v1 = vmul.f32 %v5180_v35, %v8397_v56  ;;  %v3619_v37 = vld [vmem:[%s5787_s21 + $0x1b0] sm:$0xff] }
 0x617   : > { %v3389_v12 = vsel %vm3269_vm2, %v3388_v27, %v3387_v26  ;;  %3147 = vperm.xlu2 %4710, %v2710_v44   ;;  %v3396_v55 = vperm.slane %v7583_v52, %v7232_v24  ;;  %5185 = vpow2.f32 %v1658_v3  ;;  %v8398_v27 = vld [vmem:[#allocation107_spill] sm:$0xff]  ;;  %v1433_v44 = vadd.f32 %v6698_v2, %v8399_v60 }
 0x618   : > { %v4009_v16 = vadd.f32 %v4008_v34, %v4007_v20  ;;  %v4013_v30 = vadd.f32 %v4012_v59, %v3871_v0  ;;  %v3391_v46 = vsel %vm3273_vm3, %v3390_v7, %v3389_v12  ;;  %v2717_v0 = vmul.f32 %v5182_v11, %v8398_v27  ;;  %v3620_v26 = vld [vmem:[%s5787_s21 + $0x1b8] sm:$0xff]  ;;  %v5184_v59 = vpop.eup %5183 }
 0x619   : > { %3159 = vperm.xlu1 %4711, %v2714_v58   ;;  %v3049_v53 = vpop.permute.xlu2 %3048  ;;  %v3875_v6 = vmul.f32 %v3619_v37, %v7583_v52  ;;  %v1656_v7 = vmul.f32 1.442695, %v1429_v51  ;;  %v1664_v12 = vmul.f32 1.442695, %v1433_v44  ;;  %v8400_v52 = vld [vmem:[#allocation100_spill] sm:$0xff]  ;;  %v3877_v3 = vmul.f32 %v3621_v28, %v7587_v13 }
 0x61a   : > { %v4010_v23 = vrot.slane %v4009_v16, 1  ;;  %v4014_v33 = vadd.f32 %v4013_v30, %v3872_v14  ;;  %v7634_v14 = vpop.permute.xlu0 %3063  ;;  %v1432_v35 = vadd.f32 %v6698_v2, %v8400_v52 }
 0x61b   : > { %v3034_v41 = vpop.permute.xlu1 %3033  ;;  %5187 = vpow2.f32 %v1656_v7  ;;  %v8405_v7 = vld [vmem:[#allocation104_spill] sm:$0xff] }
 0x61c   : > { %v4011_v29 = vadd.f32 %v4010_v23, %v4009_v16  ;;  %v3392_v21 = vperm.slane %v3034_v41, %v7224_v45  ;;  %v3873_v25 = vmul.f32 %v3617_v63, %v3034_v41  ;;  %v3400_v63 = vperm.slane %v7587_v13, %v7250_v32 }
 0x61d   : > { %v2716_v23 = vmul.f32 %v5184_v59, %v8401_v47  ;;  %v3402_v41 = vperm.slane %v3049_v53, %v7262_v5  ;;  %5189 = vpow2.f32 %v1664_v12  ;;  %v1662_v13 = vmul.f32 1.442695, %v1432_v35  ;;  %v3625_v59 = vld [vmem:[%s5787_s21 + $0x1e0] sm:$0xff]  ;;  %v8407_v35 = vld [vmem:[#allocation126_spill] sm:$0xff] }
 0x61e   : > { %v7621_v20 = vsel %vm3542_vm0, %v4011_v29, %v7501_v18  ;;  %v3393_v9 = vsel %vm3277_vm4, %v3392_v21, %v3391_v46  ;;  %v4015_v19 = vadd.f32 %v4014_v33, %v3873_v25  ;;  %v5186_v46 = vpop.eup %5185  ;;  %v3622_v33 = vld [vmem:[%s5787_s21 + $0x1c8] sm:$0xff]  ;;  %v8402_v25 = vld [vmem:[#allocation123_spill] sm:$0xff]  ;;  %vm3544_vm0 = vcmask 1043459  }
 0x61f   : > { %v3395_v48 = vsel %vm3281_vm5, %v3394_v17, %v3393_v9  ;;  %3156 = vperm.xlu2 %4710, %v2713_v1   ;;  %v1436_v11 = vadd.f32 %v6698_v2, %v8402_v25  ;;  %v2720_v51 = vmul.f32 %v5186_v46, %v8403_v50  ;;  %v3878_v1 = vmul.f32 %v3622_v33, %v3049_v53  ;;  %v8404_v53 = vld [vmem:[#allocation103_spill] sm:$0xff] }
 0x620   : > { %v4016_v18 = vadd.f32 %v4015_v19, %v3874_v22  ;;  %v3397_v38 = vsel %vm3285_vm6, %v3396_v55, %v3395_v48  ;;  %v3623_v55 = vld [vmem:[%s5787_s21 + $0x1d0] sm:$0xff]  ;;  %5191 = vpow2.f32 %v1662_v13 }
 0x621   : > { %3168 = vperm.xlu1 %4711, %v2717_v0   ;;  %v3058_v34 = vpop.permute.xlu2 %3057  ;;  %v5188_v19 = vpop.eup %5187  ;;  %v1670_v27 = vmul.f32 1.442695, %v1436_v11  ;;  %v3624_v0 = vld [vmem:[%s5787_s21 + $0x1d8] sm:$0xff] }
 0x622   : > { %v4017_v54 = vadd.f32 %v4016_v18, %v3875_v6  ;;  %v7653_v60 = vpop.permute.xlu0 %3072  ;;  %v1435_v18 = vadd.f32 %v6698_v2, %v8404_v53  ;;  %v3880_v28 = vmul.f32 %v3624_v0, %v7609_v15  ;;  %v3881_v47 = vmul.f32 %v3625_v59, %v3058_v34  ;;  %v8408_v11 = vld [vmem:[#allocation106_spill] sm:$0xff] }
 0x623   : > { %v3043_v58 = vpop.permute.xlu1 %3042  ;;  %5193 = vpow2.f32 %v1670_v27  ;;  %v1438_v50 = vadd.f32 %v6698_v2, %v8408_v11 }
 0x624   : > { %v3398_v16 = vperm.slane %v3043_v58, %v7256_v31  ;;  %v3876_v30 = vmul.f32 %v3620_v26, %v3043_v58  ;;  %v2719_v26 = vmul.f32 %v5188_v19, %v8405_v7  ;;  %v3408_v58 = vperm.slane %v3058_v34, %v7294_v49  ;;  %v3628_v19 = vld [vmem:[%s5787_s21 + $0x1f8] sm:$0xff] }
 0x626   : > { %v3399_v29 = vsel %vm3289_vm7, %v3398_v16, %v3397_v38  ;;  %v4018_v21 = vadd.f32 %v4017_v54, %v3876_v30  ;;  %v3406_v38 = vperm.slane %v7609_v15, %v7282_v10  ;;  %v5190_v54 = vpop.eup %5189  ;;  %v8406_v30 = vld [vmem:[#allocation156_spill] sm:$0xff]  ;;  %v1668_v15 = vmul.f32 1.442695, %v1435_v18 }
 0x627   : > { %v3401_v56 = vsel %vm3293_vm8, %v3400_v63, %v3399_v29  ;;  %3165 = vperm.xlu2 %4710, %v2716_v23   ;;  %v2723_v46 = vmul.f32 %v5190_v54, %v8406_v30  ;;  %v1439_v63 = vadd.f32 %v6698_v2, %v8407_v35  ;;  %v3627_v29 = vld [vmem:[%s5787_s21 + $0x1f0] sm:$0xff]  ;;  %v5192_v25 = vpop.eup %5191  ;;  %v1674_v18 = vmul.f32 1.442695, %v1438_v50 }
 0x628   : > { %v4019_v17 = vadd.f32 %v4018_v21, %v3877_v3  ;;  %v3403_v22 = vsel %vm3297_vm9, %v3402_v41, %v3401_v56  ;;  %v3626_v41 = vld [vmem:[%s5787_s21 + $0x1e8] sm:$0xff]  ;;  %5195 = vpow2.f32 %v1668_v15  ;;  %v3883_v13 = vmul.f32 %v3627_v29, %v7634_v14 }
 0x629   : > { %3177 = vperm.xlu1 %4711, %v2720_v51   ;;  %v3067_v37 = vpop.permute.xlu2 %3066  ;;  %v1676_v56 = vmul.f32 1.442695, %v1439_v63  ;;  %v5194_v34 = vpop.eup %5193  ;;  %v8412_v35 = vld [vmem:[#allocation109_spill] sm:$0xff] }
 0x62a   : > { %v4020_v9 = vadd.f32 %v4019_v17, %v3878_v1  ;;  %v7680_v27 = vpop.permute.xlu0 %3081  ;;  %v3414_v0 = vperm.slane %v3067_v37, %v7322_v4  ;;  %v1441_v63 = vadd.f32 %v6698_v2, %v8412_v35 }
 0x62b   : > { %v3052_v48 = vpop.permute.xlu1 %3051  ;;  %5197 = vpow2.f32 %v1676_v56 }
 0x62c   : > { %v3404_v44 = vperm.slane %v3052_v48, %v7288_v57  ;;  %v3879_v6 = vmul.f32 %v3623_v55, %v3052_v48  ;;  %v8409_v55 = vld [vmem:[#allocation113_spill] sm:$0xff]  ;;  %5199 = vpow2.f32 %v1674_v18 }
 0x62e   : > { %v3405_v12 = vsel %vm3301_vm10, %v3404_v44, %v3403_v22  ;;  %v4021_v16 = vadd.f32 %v4020_v9, %v3879_v6  ;;  %v3412_v22 = vperm.slane %v7634_v14, %v7314_v62  ;;  %v2722_v9 = vmul.f32 %v5192_v25, %v8409_v55  ;;  %v8410_v6 = vld [vmem:[#allocation129_spill] sm:$0xff] }
 0x62f   : > { %v3407_v52 = vsel %vm3305_vm11, %v3406_v38, %v3405_v12  ;;  %3174 = vperm.xlu2 %4710, %v2719_v26   ;;  %v1442_v53 = vadd.f32 %v6698_v2, %v8410_v6  ;;  %v8411_v38 = vld [vmem:[#allocation119_spill] sm:$0xff]  ;;  %v3884_v26 = vmul.f32 %v3628_v19, %v3067_v37  ;;  %v3417_v37 = vperm.slane %v7653_v60, %v7172_v61 }
 0x630   : > { %v4022_v23 = vadd.f32 %v4021_v16, %v3880_v28  ;;  %v3409_v33 = vsel %vm3309_vm12, %v3408_v58, %v3407_v52  ;;  %v2726_v7 = vmul.f32 %v5194_v34, %v8411_v38  ;;  %v3630_v28 = vld [vmem:[%s5787_s21 + $0x208] sm:$0xff]  ;;  %v3629_v12 = vld [vmem:[%s5787_s21 + $0x200] sm:$0xff] }
 0x631   : > { %3186 = vperm.xlu1 %4711, %v2723_v46   ;;  %v3076_v3 = vpop.permute.xlu2 %3075  ;;  %v5196_v46 = vpop.eup %5195  ;;  %v1682_v52 = vmul.f32 1.442695, %v1442_v53  ;;  %v8414_v34 = vld [vmem:[#allocation132_spill] sm:$0xff] }
 0x632   : > { %v4023_v21 = vadd.f32 %v4022_v23, %v3881_v47  ;;  %v3631_v47 = vld [vmem:[%s5787_s21 + $0x210] sm:$0xff]  ;;  %v3419_v25 = vperm.slane %v3076_v3, %v7201_v43  ;;  %v5198_v11 = vpop.eup %5197  ;;  %v7706_v50 = vpop.permute.xlu0 %3090  ;;  %v3633_v6 = vld [vmem:[%s5787_s21 + $0x220] sm:$0xff] }
 0x633   : > { %v3061_v51 = vpop.permute.xlu1 %3060  ;;  %5201 = vpow2.f32 %v1682_v52  ;;  %v3634_v52 = vld [vmem:[%s5787_s21 + $0x228] sm:$0xff] }
 0x634   : > { %v3410_v1 = vperm.slane %v3061_v51, %v7318_v39  ;;  %v3882_v17 = vmul.f32 %v3626_v41, %v3061_v51  ;;  %v3887_v51 = vmul.f32 %v3631_v47, %v3076_v3 }
 0x636   : > { %v3411_v48 = vsel %vm3313_vm13, %v3410_v1, %v3409_v33  ;;  %v4024_v44 = vadd.f32 %v4023_v21, %v3882_v17  ;;  %v3886_v33 = vmul.f32 %v3630_v28, %v7653_v60  ;;  %v1445_v60 = vadd.f32 %v6698_v2, %v8414_v34  ;;  %v8417_v28 = vld [vmem:[#allocation157_spill] sm:$0xff] }
 0x637   : > { %v3413_v14 = vsel %vm3317_vm14, %v3412_v22, %v3411_v48  ;;  %3183 = vperm.xlu2 %4710, %v2722_v9   ;;  %v8415_v22 = vld [vmem:[#allocation43_spill] sm:$0xff]  ;;  %v1680_v9 = vmul.f32 1.442695, %v1441_v63  ;;  %v5200_v48 = vpop.eup %5199 }
 0x638   : > { %v3415_v59 = vsel %vm3321_vm15, %v3414_v0, %v3413_v14  ;;  %v4025_v54 = vadd.f32 %v4024_v44, %v3883_v13  ;;  %v2729_v13 = vmul.f32 %v5198_v11, %v8415_v22  ;;  %v3632_v44 = vld [vmem:[%s5787_s21 + $0x218] sm:$0xff]  ;;  %v1688_v18 = vmul.f32 1.442695, %v1445_v60 }
 0x639   : > { %3195 = vperm.xlu1 %4711, %v2726_v7   ;;  %v7690_v58 = vpop.permute.xlu2 %3084  ;;  %v7695_v16 = vsel %vm3544_vm0, %v3415_v59, %v7578_v42  ;;  %v8413_v42 = vld [vmem:[#allocation116_spill] sm:$0xff]  ;;  %5203 = vpow2.f32 %v1680_v9  ;;  %v5202_v35 = vpop.eup %5201 }
 0x63a   : > { %v4026_v30 = vadd.f32 %v4025_v54, %v3884_v26  ;;  %v2725_v21 = vmul.f32 %v5196_v46, %v8413_v42  ;;  %v8416_v59 = vld [vmem:[#allocation112_spill] sm:$0xff]  ;;  %v3889_v46 = vmul.f32 %v3633_v6, %v7680_v27  ;;  %v7723_v63 = vpop.permute.xlu0 %3099  ;;  %v3425_v47 = vperm.slane %v7690_v58, %v7218_v40 }
 0x63b   : > { %v3070_v23 = vpop.permute.xlu1 %3069  ;;  %v1444_v54 = vadd.f32 %v6698_v2, %v8416_v59  ;;  %5205 = vpow2.f32 %v1688_v18  ;;  %v8422_v59 = vld [vmem:[#allocation145_spill] sm:$0xff] }
 0x63c   : > { %v4027_v15 = vrot.slane %v4026_v30, 4  ;;  %v3416_v41 = vperm.slane %v3070_v23, %v7164_v36  ;;  %v3885_v29 = vmul.f32 %v3629_v12, %v3070_v23  ;;  %v2728_v12 = vmul.f32 %v5200_v48, %v8417_v28 }
 0x63e   : > { %v4028_v56 = vadd.f32 %v4027_v15, %v4026_v30  ;;  %v3418_v1 = vsel %vm3265_vm1, %v3417_v37, %v3416_v41  ;;  %v4033_v17 = vadd.f32 %v3886_v33, %v3885_v29  ;;  %v3423_v30 = vperm.slane %v7680_v27, %v7224_v45  ;;  %v8418_v15 = vld [vmem:[#allocation135_spill] sm:$0xff]  ;;  %v8419_v29 = vld [vmem:[#allocation45_spill] sm:$0xff] }
 0x63f   : > { %3192 = vperm.xlu2 %4710, %v2725_v21   ;;  %v3420_v55 = vsel %vm3269_vm2, %v3419_v25, %v3418_v1  ;;  %v1448_v41 = vadd.f32 %v6698_v2, %v8418_v15  ;;  %v2732_v42 = vmul.f32 %v5202_v35, %v8419_v29  ;;  %v3890_v21 = vmul.f32 %v3634_v52, %v7690_v58  ;;  %v5204_v34 = vpop.eup %5203  ;;  %v3639_v15 = vld [vmem:[%s5787_s21 + $0x250] sm:$0xff] }
 0x640   : > { %v4029_v19 = vrot.slane %v4028_v56, 2  ;;  %v4034_v0 = vadd.f32 %v4033_v17, %v3887_v51  ;;  %v3635_v17 = vld [vmem:[%s5787_s21 + $0x230] sm:$0xff] }
 0x641   : > { %3204 = vperm.xlu1 %4711, %v2729_v13   ;;  %v3094_v3 = vpop.permute.xlu2 %3093  ;;  %v1694_v22 = vmul.f32 1.442695, %v1448_v41  ;;  %v3636_v13 = vld [vmem:[%s5787_s21 + $0x238] sm:$0xff] }
 0x642   : > { %v4030_v53 = vadd.f32 %v4029_v19, %v4028_v56  ;;  %v1686_v56 = vmul.f32 1.442695, %v1444_v54  ;;  %v5206_v19 = vpop.eup %5205  ;;  %v3892_v18 = vmul.f32 %v3636_v13, %v7706_v50 }
 0x643   : > { %v3079_v38 = vpop.permute.xlu1 %3078  ;;  %v2735_v54 = vmul.f32 %v5206_v19, %v8422_v59  ;;  %v3641_v59 = vld [vmem:[%s5787_s21 + $0x260] sm:$0xff] }
 0x644   : > { %v4031_v7 = vrot.slane %v4030_v53, 1  ;;  %v3421_v14 = vperm.slane %v3079_v38, %v7206_v8  ;;  %v3888_v26 = vmul.f32 %v3632_v44, %v3079_v38  ;;  %5207 = vpow2.f32 %v1686_v56  ;;  %v8421_v44 = vld [vmem:[#allocation122_spill] sm:$0xff]  ;;  %v7748_v38 = vpop.permute.xlu0 %3108  ;;  %v8425_v56 = vld [vmem:[#allocation36_spill] sm:$0xff] }
 0x645   : > { %v2731_v6 = vmul.f32 %v5204_v34, %v8421_v44  ;;  %5209 = vpow2.f32 %v1694_v22  ;;  %v3640_v34 = vld [vmem:[%s5787_s21 + $0x258] sm:$0xff] }
 0x646   : > { %v4032_v37 = vadd.f32 %v4031_v7, %v4030_v53  ;;  %v3422_v23 = vsel %vm3273_vm3, %v3421_v14, %v3420_v55  ;;  %v4035_v33 = vadd.f32 %v4034_v0, %v3888_v26  ;;  %v8420_v0 = vld [vmem:[#allocation115_spill] sm:$0xff]  ;;  %v3431_v7 = vperm.slane %v3094_v3, %v7250_v32 }
 0x647   : > { %v3424_v27 = vsel %vm3277_vm4, %v3423_v30, %v3422_v23  ;;  %3201 = vperm.xlu2 %4710, %v2728_v12   ;;  %v1447_v48 = vadd.f32 %v6698_v2, %v8420_v0  ;;  %v3637_v53 = vld [vmem:[%s5787_s21 + $0x240] sm:$0xff] }
 0x648   : > { %v4036_v25 = vadd.f32 %v4035_v33, %v3889_v46  ;;  %v3426_v11 = vsel %vm3281_vm5, %v3425_v47, %v3424_v27  ;;  %v7736_v51 = vsel %vm3544_vm0, %v4032_v37, %v7621_v20  ;;  %v3429_v20 = vperm.slane %v7706_v50, %v7256_v31  ;;  %v8423_v12 = vld [vmem:[#allocation136_spill] sm:$0xff] }
 0x649   : > { %3213 = vperm.xlu1 %4711, %v2732_v42   ;;  %v3103_v1 = vpop.permute.xlu2 %3102  ;;  %v1451_v30 = vadd.f32 %v6698_v2, %v8423_v12  ;;  %v3893_v46 = vmul.f32 %v3637_v53, %v3094_v3  ;;  %v1692_v35 = vmul.f32 1.442695, %v1447_v48  ;;  %v3638_v47 = vld [vmem:[%s5787_s21 + $0x248] sm:$0xff]  ;;  %v8424_v3 = vld [vmem:[#allocation118_spill] sm:$0xff]  ;;  %vm3546_vm0 = vcmask 1044484  }
 0x64a   : > { %v4037_v60 = vadd.f32 %v4036_v25, %v3890_v21  ;;  %v5208_v33 = vpop.eup %5207  ;;  %v1450_v25 = vadd.f32 %v6698_v2, %v8424_v3  ;;  %v3437_v13 = vperm.slane %v3103_v1, %v7282_v10  ;;  %v8427_v0 = vld [vmem:[#allocation40_spill] sm:$0xff] }
 0x64b   : > { %v3088_v55 = vpop.permute.xlu1 %3087  ;;  %v1700_v29 = vmul.f32 1.442695, %v1451_v30  ;;  %v5210_v21 = vpop.eup %5209  ;;  %5211 = vpow2.f32 %v1692_v35  ;;  %v3642_v35 = vld [vmem:[%s5787_s21 + $0x268] sm:$0xff] }
 0x64c   : > { %v3427_v9 = vperm.slane %v3088_v55, %v7232_v24  ;;  %v3891_v58 = vmul.f32 %v3635_v17, %v3088_v55  ;;  %v2734_v17 = vmul.f32 %v5208_v33, %v8425_v56  ;;  %v3118_v22 = vpop.permute.xlu0 %3117  ;;  %v2738_v48 = vmul.f32 %v5210_v21, %v8427_v0  ;;  %v3643_v21 = vld [vmem:[%s5787_s21 + $0x270] sm:$0xff] }
 0x64d   : > { %5213 = vpow2.f32 %v1700_v29  ;;  %v3441_v29 = vperm.slane %v7748_v38, %v7318_v39 }
 0x64e   : > { %v3428_v14 = vsel %vm3285_vm6, %v3427_v9, %v3426_v11  ;;  %v4038_v26 = vadd.f32 %v4037_v60, %v3891_v58  ;;  %v3435_v11 = vperm.slane %v7723_v63, %v7288_v57  ;;  %v3895_v60 = vmul.f32 %v3639_v15, %v7723_v63  ;;  %v8426_v58 = vld [vmem:[#allocation139_spill] sm:$0xff] }
 0x64f   : > { %v3430_v28 = vsel %vm3289_vm7, %v3429_v20, %v3428_v14  ;;  %3210 = vperm.xlu2 %4710, %v2731_v6   ;;  %v1454_v19 = vadd.f32 %v6698_v2, %v8426_v58  ;;  %v3645_v20 = vld [vmem:[%s5787_s21 + $0x280] sm:$0xff]  ;;  %v3646_v6 = vld [vmem:[%s5787_s21 + $0x288] sm:$0xff]  ;;  %v3896_v63 = vmul.f32 %v3640_v34, %v3103_v1  ;;  %v3447_v14 = vperm.slane %v3118_v22, %v7164_v36 }
 0x650   : > { %v4039_v50 = vadd.f32 %v4038_v26, %v3892_v18  ;;  %v3432_v52 = vsel %vm3293_vm8, %v3431_v7, %v3430_v28  ;;  %v1698_v7 = vmul.f32 1.442695, %v1450_v25  ;;  %v3898_v25 = vmul.f32 %v3642_v35, %v7748_v38 }
 0x651   : > { %3222 = vperm.xlu1 %4711, %v2735_v54   ;;  %v7757_v37 = vpop.permute.xlu2 %3111  ;;  %v3901_v54 = vmul.f32 %v3645_v20, %v3118_v22 }
 0x652   : > { %v4040_v23 = vadd.f32 %v4039_v50, %v3893_v46  ;;  %v5212_v46 = vpop.eup %5211  ;;  %v1706_v50 = vmul.f32 1.442695, %v1454_v19  ;;  %5215 = vpow2.f32 %v1698_v7  ;;  %v3899_v58 = vmul.f32 %v3643_v21, %v7757_v37 }
 0x653   : > { %v3097_v41 = vpop.permute.xlu1 %3096  ;;  %v5214_v3 = vpop.eup %5213 }
 0x654   : > { %v3433_v42 = vperm.slane %v3097_v41, %v7262_v5  ;;  %v3894_v27 = vmul.f32 %v3638_v47, %v3097_v41  ;;  %5217 = vpow2.f32 %v1706_v50 }
 0x656   : > { %v3434_v55 = vsel %vm3297_vm9, %v3433_v42, %v3432_v52  ;;  %v4041_v9 = vadd.f32 %v4040_v23, %v3894_v27  ;;  %v8428_v52 = vld [vmem:[#allocation121_spill] sm:$0xff] }
 0x657   : > { %v3436_v44 = vsel %vm3301_vm10, %v3435_v11, %v3434_v55  ;;  %3219 = vperm.xlu2 %4710, %v2734_v17   ;;  %v1453_v1 = vadd.f32 %v6698_v2, %v8428_v52  ;;  %v8429_v42 = vld [vmem:[#allocation37_spill] sm:$0xff]  ;;  %v3443_v11 = vperm.slane %v7757_v37, %v7314_v62  ;;  %v8431_v55 = vld [vmem:[#allocation142_spill] sm:$0xff] }
 0x658   : > { %v4042_v53 = vadd.f32 %v4041_v9, %v3895_v60  ;;  %v3438_v18 = vsel %vm3305_vm11, %v3437_v13, %v3436_v44  ;;  %v2737_v27 = vmul.f32 %v5212_v46, %v8429_v42  ;;  %v8430_v60 = vld [vmem:[#allocation49_spill] sm:$0xff]  ;;  %v1457_v9 = vadd.f32 %v6698_v2, %v8431_v55  ;;  %v5216_v44 = vpop.eup %5215 }
 0x659   : > { %3231 = vperm.xlu1 %4711, %v2738_v48   ;;  %v3121_v26 = vpop.permute.xlu2 %3120  ;;  %v1704_v34 = vmul.f32 1.442695, %v1453_v1  ;;  %v2741_v22 = vmul.f32 %v5214_v3, %v8430_v60  ;;  %v3644_v48 = vld [vmem:[%s5787_s21 + $0x278] sm:$0xff] }
 0x65a   : > { %v3448_v28 = vperm.slane %v3121_v26, %v7172_v61  ;;  %v3902_v12 = vmul.f32 %v3646_v6, %v3121_v26  ;;  %v4043_v30 = vadd.f32 %v4042_v53, %v3896_v63  ;;  %v1712_v63 = vmul.f32 1.442695, %v1457_v9  ;;  %v5218_v7 = vpop.eup %5217  ;;  %v8433_v26 = vld [vmem:[#allocation141_spill] sm:$0xff]  ;;  %v8435_v3 = vld [vmem:[#allocation47_spill] sm:$0xff]  ;;  %v8436_v9 = vld [vmem:[#allocation138_spill] sm:$0xff] }
 0x65b   : > { %v3106_v47 = vpop.permute.xlu1 %3105  ;;  %5219 = vpow2.f32 %v1704_v34 }
 0x65c   : > { %v7785_v23 = vsel %vm3265_vm1, %v3448_v28, %v3447_v14  ;;  %v7787_v33 = vadd.f32 %v3902_v12, %v3901_v54  ;;  %v3439_v15 = vperm.slane %v3106_v47, %v7294_v49  ;;  %v3897_v41 = vmul.f32 %v3641_v59, %v3106_v47  ;;  %v8432_v14 = vld [vmem:[#allocation124_spill] sm:$0xff]  ;;  %v3127_v54 = vpop.permute.xlu0 %3126  ;;  %v3647_v47 = vld [vmem:[%s5787_s21 + $0x290] sm:$0xff] }
 0x65d   : > { %v1456_v37 = vadd.f32 %v6698_v2, %v8432_v14  ;;  %v2740_v59 = vmul.f32 %v5216_v44, %v8433_v26  ;;  %5221 = vpow2.f32 %v1712_v63  ;;  %v3650_v63 = vld [vmem:[%s5787_s21 + $0x2a8] sm:$0xff] }
 0x65e   : > { %v3440_v56 = vsel %vm3309_vm12, %v3439_v15, %v3438_v18  ;;  %v4044_v17 = vadd.f32 %v4043_v30, %v3897_v41  ;;  %v8434_v30 = vld [vmem:[#allocation125_spill] sm:$0xff]  ;;  %v3648_v15 = vld [vmem:[%s5787_s21 + $0x298] sm:$0xff] }
 0x65f   : > { %v3442_v13 = vsel %vm3313_vm13, %v3441_v29, %v3440_v56  ;;  %3228 = vperm.xlu2 %4710, %v2737_v27   ;;  %v2744_v46 = vmul.f32 %v5218_v7, %v8434_v30  ;;  %v1710_v35 = vmul.f32 1.442695, %v1456_v37  ;;  %v3649_v56 = vld [vmem:[%s5787_s21 + $0x2a0] sm:$0xff] }
 0x660   : > { %v4045_v19 = vadd.f32 %v4044_v17, %v3898_v25  ;;  %v3444_v38 = vsel %vm3317_vm14, %v3443_v11, %v3442_v13  ;;  %v3904_v11 = vmul.f32 %v3648_v15, %v3127_v54 }
 0x661   : > { %3240 = vperm.xlu1 %4711, %v2741_v22   ;;  %v3130_v0 = vpop.permute.xlu2 %3129  ;;  %v5220_v1 = vpop.eup %5219  ;;  %5223 = vpow2.f32 %v1710_v35 }
 0x662   : > { %v4046_v20 = vadd.f32 %v4045_v19, %v3899_v58  ;;  %v2743_v25 = vmul.f32 %v5220_v1, %v8435_v3  ;;  %v3454_v60 = vperm.slane %v3130_v0, %v7224_v45 }
 0x663   : > { %v3115_v6 = vpop.permute.xlu1 %3114  ;;  %v5222_v17 = vpop.eup %5221 }
 0x664   : > { %v3445_v53 = vperm.slane %v3115_v6, %v7322_v4  ;;  %v3900_v18 = vmul.f32 %v3644_v48, %v3115_v6  ;;  %v3136_v34 = vpop.permute.xlu0 %3135  ;;  %v2747_v58 = vmul.f32 %v5222_v17, %v8436_v9 }
 0x665   : > { %v3458_v26 = vperm.slane %v3136_v34, %v7232_v24 }
 0x666   : > { %v3446_v28 = vsel %vm3321_vm15, %v3445_v53, %v3444_v38  ;;  %v4047_v12 = vadd.f32 %v4046_v20, %v3900_v18  ;;  %v3905_v38 = vmul.f32 %v3649_v56, %v3130_v0 }
 0x667   : > { %3237 = vperm.xlu2 %4710, %v2740_v59   ;;  %v7813_v50 = vsel %vm3546_vm0, %v3446_v28, %v7695_v16  ;;  %v3452_v16 = vperm.slane %v3127_v54, %v7206_v8  ;;  %v5224_v7 = vpop.eup %5223  ;;  %v8437_v59 = vld [vmem:[#allocation38_spill] sm:$0xff] }
 0x668   : > { %v4048_v52 = vrot.slane %v4047_v12, 4  ;;  %v2746_v54 = vmul.f32 %v5224_v7, %v8437_v59  ;;  %v3652_v28 = vld [vmem:[%s5787_s21 + $0x2b8] sm:$0xff] }
 0x669   : > { %3249 = vperm.xlu1 %4711, %v2744_v46   ;;  %v3139_v2 = vpop.permute.xlu2 %3138 }
 0x66a   : > { %v4049_v41 = vadd.f32 %v4048_v52, %v4047_v12  ;;  %v3460_v46 = vperm.slane %v3139_v2, %v7256_v31 }
 0x66b   : > { %v3124_v29 = vpop.permute.xlu1 %3123 }
 0x66c   : > { %v4050_v42 = vrot.slane %v4049_v41, 2  ;;  %v3450_v27 = vperm.slane %v3124_v29, %v7201_v43  ;;  %v3903_v21 = vmul.f32 %v3647_v47, %v3124_v29  ;;  %v3145_v30 = vpop.permute.xlu0 %3144  ;;  %v3908_v47 = vmul.f32 %v3652_v28, %v3139_v2  ;;  %v3653_v29 = vld [vmem:[%s5787_s21 + $0x2c0] sm:$0xff] }
 0x66e   : > { %v4051_v22 = vadd.f32 %v4050_v42, %v4049_v41  ;;  %v3451_v13 = vsel %vm3269_vm2, %v3450_v27, %v7785_v23  ;;  %v4055_v55 = vadd.f32 %v7787_v33, %v3903_v21  ;;  %v3651_v23 = vld [vmem:[%s5787_s21 + $0x2b0] sm:$0xff]  ;;  %v3654_v27 = vld [vmem:[%s5787_s21 + $0x2c8] sm:$0xff] }
 0x66f   : > { %v3453_v19 = vsel %vm3273_vm3, %v3452_v16, %v3451_v13  ;;  %3246 = vperm.xlu2 %4710, %v2743_v25   ;;  %v3907_v12 = vmul.f32 %v3651_v23, %v3136_v34  ;;  %v3464_v16 = vperm.slane %v3145_v30, %v7262_v5  ;;  %v3910_v56 = vmul.f32 %v3654_v27, %v3145_v30 }
 0x670   : > { %v4052_v48 = vrot.slane %v4051_v22, 1  ;;  %v4056_v20 = vadd.f32 %v4055_v55, %v3904_v11  ;;  %v3455_v44 = vsel %vm3277_vm4, %v3454_v60, %v3453_v19  ;;  %v3655_v11 = vld [vmem:[%s5787_s21 + $0x2d0] sm:$0xff]  ;;  %v3656_v19 = vld [vmem:[%s5787_s21 + $0x2d8] sm:$0xff] }
 0x671   : > { %3258 = vperm.xlu1 %4711, %v2747_v58   ;;  %v3148_v6 = vpop.permute.xlu2 %3147 }
 0x672   : > { %v4053_v53 = vadd.f32 %v4052_v48, %v4051_v22  ;;  %v4057_v18 = vadd.f32 %v4056_v20, %v3905_v38  ;;  %v3466_v2 = vperm.slane %v3148_v6, %v7288_v57  ;;  %v3911_v13 = vmul.f32 %v3655_v11, %v3148_v6  ;;  %v3657_v48 = vld [vmem:[%s5787_s21 + $0x2e0] sm:$0xff] }
 0x673   : > { %v3133_v14 = vpop.permute.xlu1 %3132 }
 0x674   : > { %v3456_v33 = vperm.slane %v3133_v14, %v7218_v40  ;;  %v3906_v37 = vmul.f32 %v3650_v63, %v3133_v14  ;;  %v7833_v0 = vsel %vm3546_vm0, %v4053_v53, %v7736_v51  ;;  %v3154_v17 = vpop.permute.xlu0 %3153  ;;  %vm3548_vm0 = vcmask 1045509  }
 0x675   : > { %v3470_v53 = vperm.slane %v3154_v17, %v7294_v49  ;;  %v3913_v7 = vmul.f32 %v3657_v48, %v3154_v17 }
 0x676   : > { %v3457_v52 = vsel %vm3281_vm5, %v3456_v33, %v3455_v44  ;;  %v4058_v1 = vadd.f32 %v4057_v18, %v3906_v37  ;;  %v3658_v18 = vld [vmem:[%s5787_s21 + $0x2e8] sm:$0xff] }
 0x677   : > { %v3459_v35 = vsel %vm3285_vm6, %v3458_v26, %v3457_v52  ;;  %3255 = vperm.xlu2 %4710, %v2746_v54  }
 0x678   : > { %v4059_v51 = vadd.f32 %v4058_v1, %v3907_v12  ;;  %v3461_v15 = vsel %vm3289_vm7, %v3460_v46, %v3459_v35  ;;  %v3659_v12 = vld [vmem:[%s5787_s21 + $0x2f0] sm:$0xff]  ;;  %v3660_v46 = vld [vmem:[%s5787_s21 + $0x2f8] sm:$0xff] }
 0x679   : > { %v3157_v41 = vpop.permute.xlu2 %3156 }
 0x67a   : > { %v4060_v42 = vadd.f32 %v4059_v51, %v3908_v47  ;;  %v3472_v6 = vperm.slane %v3157_v41, %v7318_v39  ;;  %v3914_v26 = vmul.f32 %v3658_v18, %v3157_v41 }
 0x67b   : > { %v3142_v21 = vpop.permute.xlu1 %3141 }
 0x67c   : > { %v3462_v3 = vperm.slane %v3142_v21, %v7250_v32  ;;  %v3909_v25 = vmul.f32 %v3653_v29, %v3142_v21  ;;  %v3163_v23 = vpop.permute.xlu0 %3162 }
 0x67d   : > { %v3476_v47 = vperm.slane %v3163_v23, %v7322_v4  ;;  %v3916_v51 = vmul.f32 %v3660_v46, %v3163_v23 }
 0x67e   : > { %v3463_v34 = vsel %vm3293_vm8, %v3462_v3, %v3461_v15  ;;  %v4061_v60 = vadd.f32 %v4060_v42, %v3909_v25 }
 0x67f   : > { %v3465_v22 = vsel %vm3297_vm9, %v3464_v16, %v3463_v34 }
 0x680   : > { %v4062_v55 = vadd.f32 %v4061_v60, %v3910_v56  ;;  %v3467_v9 = vsel %vm3301_vm10, %v3466_v2, %v3465_v22 }
 0x681   : > { %v7851_v58 = vpop.permute.xlu2 %3165 }
 0x682   : > { %v4063_v38 = vadd.f32 %v4062_v55, %v3911_v13  ;;  %v3478_v11 = vperm.slane %v7851_v58, %v7164_v36 }
 0x683   : > { %v3151_v20 = vpop.permute.xlu1 %3150 }
 0x684   : > { %v3468_v44 = vperm.slane %v3151_v20, %v7282_v10  ;;  %v3912_v63 = vmul.f32 %v3656_v19, %v3151_v20  ;;  %v3172_v42 = vpop.permute.xlu0 %3171 }
 0x685   : > { %v3481_v55 = vperm.slane %v3172_v42, %v7201_v43 }
 0x686   : > { %v3469_v14 = vsel %vm3305_vm11, %v3468_v44, %v3467_v9  ;;  %v4064_v33 = vadd.f32 %v4063_v38, %v3912_v63 }
 0x687   : > { %v3471_v37 = vsel %vm3309_vm12, %v3470_v53, %v3469_v14  ;;  %v3662_v53 = vld [vmem:[%s5787_s21 + $0x308] sm:$0xff] }
 0x688   : > { %v4065_v59 = vadd.f32 %v4064_v33, %v3913_v7  ;;  %v3473_v54 = vsel %vm3313_vm13, %v3472_v6, %v3471_v37  ;;  %v3661_v6 = vld [vmem:[%s5787_s21 + $0x300] sm:$0xff] }
 0x689   : > { %v3175_v28 = vpop.permute.xlu2 %3174 }
 0x68a   : > { %v4066_v30 = vadd.f32 %v4065_v59, %v3914_v26  ;;  %v3483_v20 = vperm.slane %v3175_v28, %v7206_v8  ;;  %v3917_v59 = vmul.f32 %v3661_v6, %v7851_v58 }
 0x68b   : > { %v3160_v52 = vpop.permute.xlu1 %3159 }
 0x68c   : > { %v3474_v1 = vperm.slane %v3160_v52, %v7314_v62  ;;  %v3915_v35 = vmul.f32 %v3659_v12, %v3160_v52  ;;  %v3181_v60 = vpop.permute.xlu0 %3180  ;;  %v3663_v12 = vld [vmem:[%s5787_s21 + $0x310] sm:$0xff] }
 0x68d   : > { %v3487_v23 = vperm.slane %v3181_v60, %v7218_v40 }
 0x68e   : > { %v3475_v15 = vsel %vm3317_vm14, %v3474_v1, %v3473_v54  ;;  %v4067_v29 = vadd.f32 %v4066_v30, %v3915_v35  ;;  %v3919_v35 = vmul.f32 %v3663_v12, %v3172_v42 }
 0x68f   : > { %v3477_v41 = vsel %vm3321_vm15, %v3476_v47, %v3475_v15  ;;  %v3665_v15 = vld [vmem:[%s5787_s21 + $0x320] sm:$0xff] }
 0x690   : > { %v4068_v27 = vadd.f32 %v4067_v29, %v3916_v51  ;;  %v7870_v21 = vsel %vm3548_vm0, %v3477_v41, %v7813_v50  ;;  %v3664_v51 = vld [vmem:[%s5787_s21 + $0x318] sm:$0xff] }
 0x691   : > { %v7872_v3 = vpop.permute.xlu2 %3183 }
 0x692   : > { %v4069_v25 = vrot.slane %v4068_v27, 4  ;;  %v3489_v54 = vperm.slane %v7872_v3, %v7232_v24 }
 0x693   : > { %v3169_v16 = vpop.permute.xlu1 %3168 }
 0x694   : > { %v4070_v56 = vadd.f32 %v4069_v25, %v4068_v27  ;;  %v3479_v17 = vperm.slane %v3169_v16, %v7172_v61  ;;  %v7888_v63 = vpop.permute.xlu0 %3189  ;;  %v3918_v14 = vmul.f32 %v3662_v53, %v3169_v16  ;;  %v3920_v16 = vmul.f32 %v3664_v51, %v3175_v28 }
 0x695   : > { %v3493_v47 = vperm.slane %v7888_v63, %v7250_v32 }
 0x696   : > { %v4071_v2 = vrot.slane %v4070_v56, 2  ;;  %v3480_v34 = vsel %vm3265_vm1, %v3479_v17, %v3478_v11  ;;  %v4075_v30 = vadd.f32 %v3918_v14, %v3917_v59 }
 0x697   : > { %v3482_v38 = vsel %vm3269_vm2, %v3481_v55, %v3480_v34  ;;  %v3666_v34 = vld [vmem:[%s5787_s21 + $0x328] sm:$0xff] }
 0x698   : > { %v4072_v22 = vadd.f32 %v4071_v2, %v4070_v56  ;;  %v3484_v18 = vsel %vm3273_vm3, %v3483_v20, %v3482_v38  ;;  %v4076_v29 = vadd.f32 %v4075_v30, %v3919_v35  ;;  %v3922_v38 = vmul.f32 %v3666_v34, %v3181_v60  ;;  %v3668_v20 = vld [vmem:[%s5787_s21 + $0x338] sm:$0xff]  ;;  %v3677_v30 = vld [vmem:[%s5787_s21 + $0x380] sm:$0xff] }
 0x699   : > { %v7878_v13 = vpop.permute.xlu2 %3192 }
 0x69a   : > { %v4073_v50 = vrot.slane %v4072_v22, 1  ;;  %v3495_v27 = vperm.slane %v7878_v13, %v7262_v5  ;;  %v4077_v17 = vadd.f32 %v4076_v29, %v3920_v16  ;;  %v3679_v16 = vld [vmem:[%s5787_s21 + $0x390] sm:$0xff] }
 0x69b   : > { %v3178_v9 = vpop.permute.xlu1 %3177 }
 0x69c   : > { %v4074_v19 = vadd.f32 %v4073_v50, %v4072_v22  ;;  %v3485_v48 = vperm.slane %v3178_v9, %v7224_v45  ;;  %v7904_v52 = vpop.permute.xlu0 %3198  ;;  %v3921_v11 = vmul.f32 %v3665_v15, %v3178_v9 }
 0x69d   : > { %v3499_v22 = vperm.slane %v7904_v52, %v7282_v10 }
 0x69e   : > { %v7886_v44 = vsel %vm3548_vm0, %v4074_v19, %v7833_v0  ;;  %v3486_v7 = vsel %vm3277_vm4, %v3485_v48, %v3484_v18  ;;  %v4078_v55 = vadd.f32 %v4077_v17, %v3921_v11  ;;  %v3667_v48 = vld [vmem:[%s5787_s21 + $0x330] sm:$0xff]  ;;  %vm3550_vm0 = vcmask 1046534  }
 0x69f   : > { %v3488_v26 = vsel %vm3281_vm5, %v3487_v23, %v3486_v7  ;;  %v3923_v14 = vmul.f32 %v3667_v48, %v7872_v3 }
 0x6a0   : > { %v3490_v46 = vsel %vm3285_vm6, %v3489_v54, %v3488_v26  ;;  %v4079_v7 = vadd.f32 %v4078_v55, %v3922_v38 }
 0x6a1   : > { %v7895_v33 = vpop.permute.xlu2 %3201 }
 0x6a2   : > { %v3501_v28 = vperm.slane %v7895_v33, %v7294_v49  ;;  %v4080_v12 = vadd.f32 %v4079_v7, %v3923_v14  ;;  %v3673_v14 = vld [vmem:[%s5787_s21 + $0x360] sm:$0xff] }
 0x6a3   : > { %v3187_v37 = vpop.permute.xlu1 %3186 }
 0x6a4   : > { %v3491_v0 = vperm.slane %v3187_v37, %v7256_v31  ;;  %v7922_v50 = vpop.permute.xlu0 %3207  ;;  %v3924_v26 = vmul.f32 %v3668_v20, %v3187_v37 }
 0x6a5   : > { %v3505_v18 = vperm.slane %v7922_v50, %v7314_v62 }
 0x6a6   : > { %v3492_v1 = vsel %vm3289_vm7, %v3491_v0, %v3490_v46  ;;  %v4081_v3 = vadd.f32 %v4080_v12, %v3924_v26  ;;  %v3674_v26 = vld [vmem:[%s5787_s21 + $0x368] sm:$0xff]  ;;  %v3683_v12 = vld [vmem:[%s5787_s21 + $0x3b0] sm:$0xff] }
 0x6a7   : > { %v3494_v58 = vsel %vm3293_vm8, %v3493_v47, %v3492_v1  ;;  %v3669_v1 = vld [vmem:[%s5787_s21 + $0x340] sm:$0xff]  ;;  %v3678_v47 = vld [vmem:[%s5787_s21 + $0x388] sm:$0xff] }
 0x6a8   : > { %v3496_v42 = vsel %vm3297_vm9, %v3495_v27, %v3494_v58  ;;  %v3925_v15 = vmul.f32 %v3669_v1, %v7888_v63  ;;  %v3670_v58 = vld [vmem:[%s5787_s21 + $0x348] sm:$0xff]  ;;  %v3671_v27 = vld [vmem:[%s5787_s21 + $0x350] sm:$0xff] }
 0x6a9   : > { %v7915_v56 = vpop.permute.xlu2 %3210 }
 0x6aa   : > { %v3507_v60 = vperm.slane %v7915_v56, %v7322_v4 }
 0x6ab   : > { %v3196_v41 = vpop.permute.xlu1 %3195 }
 0x6ac   : > { %v3497_v25 = vperm.slane %v3196_v41, %v7288_v57  ;;  %v3217_v35 = vpop.permute.xlu0 %3216 }
 0x6ad   : > { %v3934_v29 = vmul.f32 %v3678_v47, %v3217_v35  ;;  %v3510_v48 = vperm.slane %v3217_v35, %v7172_v61  ;;  %v3684_v47 = vld [vmem:[%s5787_s21 + $0x3b8] sm:$0xff] }
 0x6ae   : > { %v3498_v2 = vsel %vm3301_vm10, %v3497_v25, %v3496_v42  ;;  %v4082_v25 = vadd.f32 %v4081_v3, %v3925_v15  ;;  %v3927_v42 = vmul.f32 %v3671_v27, %v3196_v41  ;;  %v3675_v27 = vld [vmem:[%s5787_s21 + $0x370] sm:$0xff] }
 0x6af   : > { %v3500_v19 = vsel %vm3305_vm11, %v3499_v22, %v3498_v2  ;;  %v3680_v2 = vld [vmem:[%s5787_s21 + $0x398] sm:$0xff] }
 0x6b0   : > { %v3502_v23 = vsel %vm3309_vm12, %v3501_v28, %v3500_v19  ;;  %v3681_v19 = vld [vmem:[%s5787_s21 + $0x3a0] sm:$0xff]  ;;  %v3672_v28 = vld [vmem:[%s5787_s21 + $0x358] sm:$0xff] }
 0x6b1   : > { %v3220_v0 = vpop.permute.xlu2 %3219 }
 0x6b2   : > { %v3935_v22 = vmul.f32 %v3679_v16, %v3220_v0 }
 0x6b3   : > { %v7927_v9 = vpop.permute.xlu1 %3204 }
 0x6b4   : > { %v3503_v53 = vperm.slane %v7927_v9, %v7318_v39  ;;  %v3226_v34 = vpop.permute.xlu0 %3225 }
 0x6b5   : > { %v3937_v41 = vmul.f32 %v3681_v19, %v3226_v34  ;;  %v3687_v19 = vld [vmem:[%s5787_s21 + $0x3d0] sm:$0xff] }
 0x6b6   : > { %v3504_v6 = vsel %vm3313_vm13, %v3503_v53, %v3502_v23 }
 0x6b7   : > { %v3506_v59 = vsel %vm3317_vm14, %v3505_v18, %v3504_v6  ;;  %v3682_v6 = vld [vmem:[%s5787_s21 + $0x3a8] sm:$0xff] }
 0x6b8   : > { %v3508_v54 = vsel %vm3321_vm15, %v3507_v60, %v3506_v59  ;;  %v3512_v60 = vperm.slane %v3220_v0, %v7201_v43  ;;  %v3930_v43 = vmul.f32 %v3674_v26, %v7927_v9  ;;  %v3690_v26 = vld [vmem:[%s5787_s21 + $0x3e8] sm:$0xff] }
 0x6b9   : > { %v7945_v46 = vsel %vm3550_vm0, %v3508_v54, %v7870_v21  ;;  %v3926_v21 = vmul.f32 %v3670_v58, %v7878_v13  ;;  %v3229_v17 = vpop.permute.xlu2 %3228 }
 0x6ba   : > { %v3938_v1 = vmul.f32 %v3682_v6, %v3229_v17 }
 0x6bb   : > { %v3214_v51 = vpop.permute.xlu1 %3213  ;;  %v4083_v63 = vadd.f32 %v4082_v25, %v3926_v21  ;;  %v3518_v25 = vperm.slane %v3229_v17, %v7218_v40 }
 0x6bc   : > { %v3933_v37 = vmul.f32 %v3677_v30, %v3214_v51  ;;  %v3509_v55 = vperm.slane %v3214_v51, %v7164_v36  ;;  %v3928_v36 = vmul.f32 %v3672_v28, %v7904_v52  ;;  %v3235_v30 = vpop.permute.xlu0 %3234  ;;  %v3929_v52 = vmul.f32 %v3673_v14, %v7895_v33 }
 0x6bd   : > { %v4084_v13 = vadd.f32 %v4083_v63, %v3927_v42  ;;  %v3931_v42 = vmul.f32 %v3675_v27, %v7922_v50 }
 0x6be   : > { %v4096_v11 = vadd.f32 %v3934_v29, %v3933_v37  ;;  %v3511_v18 = vsel %vm3265_vm1, %v3510_v48, %v3509_v55  ;;  %v3676_v55 = vld [vmem:[%s5787_s21 + $0x378] sm:$0xff]  ;;  %vm3552_vm1 = vcmask 1047559  }
 0x6bf   : > { %v4085_v61 = vadd.f32 %v4084_v13, %v3928_v36  ;;  %v3513_v54 = vsel %vm3269_vm2, %v3512_v60, %v3511_v18  ;;  %vm3562_vm2 = vcmask 7168  }
 0x6c0   : > { %v4097_v53 = vadd.f32 %v4096_v11, %v3935_v22  ;;  %v3685_v11 = vld [vmem:[%s5787_s21 + $0x3c0] sm:$0xff]  ;;  %v3522_v22 = vperm.slane %v3235_v30, %v7256_v31 }
 0x6c1   : > { %v3238_v0 = vpop.permute.xlu2 %3237  ;;  %v4086_v15 = vadd.f32 %v4085_v61, %v3929_v52  ;;  %v3691_v52 = vld [vmem:[%s5787_s21 + $0x3f0] sm:$0xff] }
 0x6c3   : > { %v3223_v38 = vpop.permute.xlu1 %3222  ;;  %v4087_v33 = vadd.f32 %v4086_v15, %v3930_v43 }
 0x6c4   : > { %v3936_v20 = vmul.f32 %v3680_v2, %v3223_v38  ;;  %v3514_v7 = vperm.slane %v3223_v38, %v7206_v8  ;;  %v3516_v8 = vperm.slane %v3226_v34, %v7224_v45  ;;  %v3940_v45 = vmul.f32 %v3684_v47, %v3235_v30  ;;  %v3686_v34 = vld [vmem:[%s5787_s21 + $0x3c8] sm:$0xff]  ;;  %v3244_v63 = vpop.permute.xlu0 %3243 }
 0x6c5   : > { %v4088_v38 = vadd.f32 %v4087_v33, %v3931_v42  ;;  %v3943_v13 = vmul.f32 %v3687_v19, %v3244_v63  ;;  %v3528_v6 = vperm.slane %v3244_v63, %v7288_v57 }
 0x6c6   : > { %v4098_v23 = vadd.f32 %v4097_v53, %v3936_v20  ;;  %v3515_v35 = vsel %vm3273_vm3, %v3514_v7, %v3513_v54  ;;  %v3932_v20 = vmul.f32 %v3676_v55, %v7915_v56  ;;  %v3524_v53 = vperm.slane %v3238_v0, %v7250_v32  ;;  %v3688_v7 = vld [vmem:[%s5787_s21 + $0x3d8] sm:$0xff] }
 0x6c7   : > { %v3517_v29 = vsel %vm3277_vm4, %v3516_v8, %v3515_v35 }
 0x6c8   : > { %v4099_v59 = vadd.f32 %v4098_v23, %v3937_v41  ;;  %v3519_v9 = vsel %vm3281_vm5, %v3518_v25, %v3517_v29  ;;  %v4089_v18 = vadd.f32 %v4088_v38, %v3932_v20 }
 0x6c9   : > { %v3247_v31 = vpop.permute.xlu2 %3246 }
 0x6ca   : > { %v4100_v37 = vadd.f32 %v4099_v59, %v3938_v1  ;;  %v3944_v14 = vmul.f32 %v3688_v7, %v3247_v31  ;;  %v4090_v56 = vrot.slane %v4089_v18, 4  ;;  %v3530_v54 = vperm.slane %v3247_v31, %v7282_v10 }
 0x6cb   : > { %v3232_v3 = vpop.permute.xlu1 %3231 }
 0x6cc   : > { %v3939_v51 = vmul.f32 %v3683_v12, %v3232_v3  ;;  %v3520_v58 = vperm.slane %v3232_v3, %v7232_v24  ;;  %v3941_v24 = vmul.f32 %v3685_v11, %v3238_v0  ;;  %v3253_v59 = vpop.permute.xlu0 %3252  ;;  %v4091_v47 = vadd.f32 %v4090_v56, %v4089_v18 }
 0x6cd   : > { %v3946_v35 = vmul.f32 %v3690_v26, %v3253_v59  ;;  %v3534_v3 = vperm.slane %v3253_v59, %v7318_v39 }
 0x6ce   : > { %v4101_v16 = vadd.f32 %v4100_v37, %v3939_v51  ;;  %v3521_v2 = vsel %vm3285_vm6, %v3520_v58, %v3519_v9  ;;  %v3692_v37 = vld [vmem:[%s5787_s21 + $0x3f8] sm:$0xff] }
 0x6cf   : > { %v3523_v17 = vsel %vm3289_vm7, %v3522_v22, %v3521_v2 }
 0x6d0   : > { %v4102_v21 = vadd.f32 %v4101_v16, %v3940_v45  ;;  %v3525_v23 = vsel %vm3293_vm8, %v3524_v53, %v3523_v17 }
 0x6d1   : > { %v3256_v43 = vpop.permute.xlu2 %3255 }
 0x6d2   : > { %v4103_v50 = vadd.f32 %v4102_v21, %v3941_v24  ;;  %v3947_v10 = vmul.f32 %v3691_v52, %v3256_v43  ;;  %v3536_v29 = vperm.slane %v3256_v43, %v7314_v62  ;;  %v3564_v24 = vld [vmem:[#allocation2] sm:$0xff] }
 0x6d3   : > { %v3241_v40 = vpop.permute.xlu1 %3240 }
 0x6d4   : > { %v3526_v28 = vperm.slane %v3241_v40, %v7262_v5  ;;  %v3942_v48 = vmul.f32 %v3686_v34, %v3241_v40  ;;  %v3689_v5 = vld [vmem:[%s5787_s21 + $0x3e0] sm:$0xff] }
 0x6d5   : > { %v3558_v40 = vld [vmem:[#allocation3] sm:$0xff] }
 0x6d6   : > { %v4104_v41 = vadd.f32 %v4103_v50, %v3942_v48  ;;  %v3527_v36 = vsel %vm3297_vm9, %v3526_v28, %v3525_v23 }
 0x6d7   : > { %v3529_v32 = vsel %vm3301_vm10, %v3528_v6, %v3527_v36 }
 0x6d8   : > { %v4105_v60 = vadd.f32 %v4104_v41, %v3943_v13  ;;  %v3531_v57 = vsel %vm3305_vm11, %v3530_v54, %v3529_v32 }
 0x6da   : > { %v4106_v1 = vadd.f32 %v4105_v60, %v3944_v14 }
 0x6db   : > { %v3250_v61 = vpop.permute.xlu1 %3249 }
 0x6dc   : > { %v3532_v12 = vperm.slane %v3250_v61, %v7294_v49  ;;  %v3945_v30 = vmul.f32 %v3689_v5, %v3250_v61  ;;  %v4092_v49 = vrot.slane %v4091_v47, 2 }
 0x6de   : > { %v4107_v8 = vadd.f32 %v4106_v1, %v3945_v30  ;;  %v3533_v0 = vsel %vm3309_vm12, %v3532_v12, %v3531_v57  ;;  %v4093_v11 = vadd.f32 %v4092_v49, %v4091_v47 }
 0x6df   : > { %v3535_v15 = vsel %vm3313_vm13, %v3534_v3, %v3533_v0 }
 0x6e0   : > { %v4108_v51 = vadd.f32 %v4107_v8, %v3946_v35  ;;  %v3537_v16 = vsel %vm3317_vm14, %v3536_v29, %v3535_v15  ;;  %v4094_v42 = vrot.slane %v4093_v11, 1 }
 0x6e2   : > { %v4109_v25 = vadd.f32 %v4108_v51, %v3947_v10  ;;  %v4095_v34 = vadd.f32 %v4094_v42, %v4093_v11 }
 0x6e3   : > { %v3259_v58 = vpop.permute.xlu1 %3258 }
 0x6e4   : > { %v3538_v27 = vperm.slane %v3259_v58, %v7322_v4  ;;  %v3948_v45 = vmul.f32 %v3692_v37, %v3259_v58  ;;  %v4130_v19 = vsel %vm3550_vm0, %v4095_v34, %v7886_v44 }
 0x6e6   : > { %v4110_v33 = vadd.f32 %v4109_v25, %v3948_v45  ;;  %v3539_v39 = vsel %vm3321_vm15, %v3538_v27, %v3537_v16 }
 0x6e7   : > { %v3553_v9 = vsel %vm3552_vm1, %v3539_v39, %v7945_v46 }
 0x6e8   : > { %v4111_v21 = vrot.slane %v4110_v33, 4  ;;  %3559 = vadd.xlane.f32.xlu0 %v3553_v9  ;;  %3557 = vst [vmem:[%s3556_s22] sm:$0xff] %v3553_v9 }
 0x6ea   : > { %v4112_v62 = vadd.f32 %v4111_v21, %v4110_v33 }
 0x6ec   : > { %v4113_v2 = vrot.slane %v4112_v62, 2 }
 0x6ee   : > { %v4114_v4 = vadd.f32 %v4113_v2, %v4112_v62 }
 0x6f0   : > { %v4115_v22 = vrot.slane %v4114_v4, 1 }
 0x6f2   : > { %v4116_v55 = vadd.f32 %v4115_v22, %v4114_v4 }
 0x6f4   : > { %v4131_v63 = vsel %vm3552_vm1, %v4116_v55, %v4130_v19 }
 0x6f5   : > { %v4133_v38 = vadd.f32 %v4131_v63, %v3564_v24 }
 0x6f7   : > { %4134 = vst [vmem:[#allocation2] sm:$0xff] %v4133_v38 }
 0x75a   : > { %4138 = sbr.rel (%p4428_p6) target bundleno = 2027 (0x7eb), region = 72 }
 0x75b   : > { %v3560_v46 = vpop.xlane.xlu0 %3559 }
 0x75c   : > { %v3561_v17 = vadd.f32 %v3560_v46, %v3558_v40 }
 0x75e   : > { %3563 = vst.msk [vmem:[#allocation3] sm:$0xff] %vm3562_vm2, %v3561_v17 }
 0x75f   : > { %v5499_v48 = vmov 0   ;;  %v4144_v31 = vld [vmem:[%s5799_s18] sm:$0xff]  ;;  %v4145_v13 = vld [vmem:[%s5799_s18 + $0x8] sm:$0xff] }
 0x760   : > { %5227 = vset.pattern.permute.xlu0 %v5499_v48  ;;  %v4155_v41 = vld [vmem:[#allocation2] sm:$0xff] }
 0x765   : > { %v4139_v28 = vld [vmem:[#allocation3] sm:$0xff] }
 0x766   : > { %5228 = vrcp.f32 %v4139_v28 }
 0x76c   : > { %v5229_v44 = vpop.eup %5228 }
 0x76d   : > { %v4141_v50 = vmul.f32 %v5229_v44, %v4139_v28 }
 0x76f   : > { %v4142_v20 = vsub.f32 2.0, %v4141_v50 }
 0x771   : > { %v4143_v53 = vmul.f32 %v5229_v44, %v4142_v20 }
 0x773   : > { %4148 = vperm.xlu0 %5227, %v4143_v53  }
 0x7e5   : > { %v4149_v18 = vpop.permute.xlu0 %4148 }
 0x7e6   : > { %v4151_v7 = vmul.f32 %v4149_v18, %v4144_v31  ;;  %v4152_v23 = vmul.f32 %v4149_v18, %v4145_v13  ;;  %v4156_v36 = vmul.f32 %v4155_v41, %v4149_v18 }
 0x7e8   : > { %4153 = vst [vmem:[%s5799_s18] sm:$0xff] %v4151_v7 }
 0x7e9   : > { %4154 = vst [vmem:[%s5799_s18 + $0x8] sm:$0xff] %v4152_v23 }
 0x7ea   : > { %4157 = vst [vmem:[%s5801_s23] sm:$0xff] %v4156_v36 }
 0x7eb PF: > { %s4431_s0 = sshll.u32 %s5470_s9, 3  ;;  %s8439_s16 = sld [smem:[#allocation165_spill]] }
 0x7ec   : > { %s4175_s2 = sshll.u32 %s5799_s18, 4  ;;  %s4159_s19 = scalar_lea.sflag [#allocation7], %s5767_s20  ;;  %s4176_s2 = int_to_ptr.vmem [resolvable:$true] %s4175_s2 }
 0x7f1   : > { %s4174_s6 = scalar_lea.hbm %s8439_s16, %s4431_s0  ;;  %s5336_s9 = scalar_lea.hbm %s8439_s16, 32 }
 0x7f2   : > { %s4177_s24 = sshll.u32 %s4174_s6, 4  ;;  %s4178_s24 = int_to_ptr.hbm [resolvable:$true] %s4177_s24 }
 0x7f3   : > { %s5330_s25 = sshra.s32 %s4178_s24, 4  ;;  %s5331_s25 = int_to_ptr.hbm [resolvable:$true] %s5330_s25 }
 0x7f4   : > { %s5332_s26 = scalar_lea.hbm %s5331_s25, 16  ;;  %p5337_p2 = scmp.lt.s32.totalorder %s5331_s25, %s8439_s16 }
 0x7f5   : > { %p5333_p12 = scmp.ne.s32.totalorder %s5331_s25, %s5332_s26  ;;  %p5338_p8 = scmp.lt.s32.totalorder %s5336_s9, %s5332_s26 }
 0x7f7   : > { %p5334_p13 = pnand %p5333_p12, %p5669_p7  ;;  %p5339_p11 = por %p5338_p8, %p5337_p2 }
 0x7f9   : > { %p5335_p5 = pneg %p5334_p13 }
 0x7fb   : > { %p5340_p1 = pnand %p5339_p11, %p5335_p5 }
 0x7fd   : > { %5343 = shalt.err (!%p5340_p1)
}
 0x7fe   : > { %s5500_s17 = smov 128   ;;  %s5501_s18 = smov 256  }
 0x7ff   : > { %s5502_s7 = smov 8   ;;  %s8440_s15 = sld [smem:[#allocation166_spill]] }
 0x800   : > { %4465 = dma.vmem_to_hbm [thread:$0]  (%p5669_p7), %s4176_s2, 256, %s4178_s24, %s4159_s19, %s5500_s17, %s5501_s18, %s5502_s7  }
 0x801   : > { %s4192_s6 = sshll.u32 %s5801_s23, 4  ;;  %s4164_s25 = scalar_lea.sflag [#allocation16], %s5767_s20  ;;  %s4193_s6 = int_to_ptr.vmem [resolvable:$true] %s4192_s6 }
 0x805   : > { %s4190_s4 = scalar_lea.hbm %s8440_s15, %s4431_s0  ;;  %s5364_s2 = scalar_lea.hbm %s8440_s15, 16 }
 0x806   : > { %s4194_s29 = sshll.u32 %s4190_s4, 4  ;;  %s4195_s29 = int_to_ptr.hbm [resolvable:$true] %s4194_s29 }
 0x807   : > { %s5358_s26 = sshra.s32 %s4195_s29, 4  ;;  %s5359_s26 = int_to_ptr.hbm [resolvable:$true] %s5358_s26 }
 0x808   : > { %s5360_s21 = scalar_lea.hbm %s5359_s26, 8  ;;  %p5365_p4 = scmp.lt.s32.totalorder %s5359_s26, %s8440_s15 }
 0x809   : > { %p5361_p9 = scmp.ne.s32.totalorder %s5359_s26, %s5360_s21  ;;  %p5366_p6 = scmp.lt.s32.totalorder %s5364_s2, %s5360_s21 }
 0x80b   : > { %p5362_p0 = pnand %p5361_p9, %p5669_p7  ;;  %p5367_p12 = por %p5366_p6, %p5365_p4 }
 0x80d   : > { %p5363_p3 = pneg %p5362_p0 }
 0x80f   : > { %p5368_p13 = pnand %p5367_p12, %p5363_p3 }
 0x811   : > { %5371 = shalt.err (!%p5368_p13)
}
 0x812   : > { %4466 = dma.vmem_to_hbm [thread:$0]  (%p5669_p7), %s4193_s6, 128, %s4195_s29, %s4164_s25  }
 0x813 PF: > { %s8441_s20 = sld [smem:[#allocation29_spill]]  ;;  %p4482_p5 = scmp.ge.s32.totalorder %s5482_s12, 2 }
 0x815   : > { %p4474_p2 = pnand %p4482_p5, %p5677_p10 }
 0x817   : > { %p4475_p8 = pneg %p4474_p2 }
 0x819   : > { %s4206_s0 = sand.u32 1, %s8441_s20  }
 0x81a   : > { %s4207_s14 = scalar_lea.sflag [#allocation7], %s4206_s0 }
 0x81b   : > { %5433 = dma.done.wait (%p4475_p8), %s4207_s14, 256  }
 0x81c   : > { %5435 = vsyncadd (%p4475_p8), %s4207_s14, 4294967040  ;;  %s4217_s17 = scalar_lea.sflag [#allocation16], %s4206_s0 }
 0x81d   : > { %5437 = dma.done.wait (%p4475_p8), %s4217_s17, 128  }
 0x81e   : > { %5439 = vsyncadd (%p4475_p8), %s4217_s17, 4294967168  ;;  %s35_s12 = sadd.s32 1, %s5482_s12   ;;  %s8443_s8 = sld [smem:[#allocation33_spill]] }
 0x81f   : > { %p32_p11 = scmp.ge.s32.totalorder %s35_s12, 6   ;;  %s8444_s18 = sld [smem:[#allocation32_spill]] }
 0x820   : > { %s8445_s7 = sld [smem:[#allocation30_spill]]  ;;  %s8447_s26 = smov %s5446_s27 }
 0x821   : > { %s8446_s13 = sld [smem:[#allocation31_spill]]  ;;  %s8448_s27 = smov %s5450_s28 }
 0x822   : > { %s8450_s29 = smov %s5458_s5  ;;  %s8451_s5 = smov %s5462_s30 }
 0x823   : > { %s8454_s9 = smov %s5478_s11  ;;  %34 = sbr.rel (!%p32_p11) target bundleno = 22 (0x16), region = 166 }
 0x824   : > { %s8449_s28 = smov %s8443_s8  ;;  %s8453_s8 = smov %s5474_s10 }
 0x825   : > { %s8452_s30 = smov %s8444_s18 }
 0x826   : > { %s8455_s10 = smov %s8445_s7 }
 0x827   : > { %s8456_s11 = smov %s8446_s13 }
 0x828   :  { %4223 = vsyncpa [#allocation6], 1 }
 0x829   :  { %4225 = vsyncpa [#allocation6 + $0x1], 1 }
 0x82a   :  { %4226 = vsyncpa [#allocation9], 1 }
 0x82b   :  { %4228 = vsyncpa [#allocation9 + $0x1], 1 }
 0x82c   :  { %4229 = vsyncpa [#allocation12], 1 }
 0x82d   :  { %4231 = vsyncpa [#allocation12 + $0x1], 1 }
 0x82e   :  { %4232 = vsyncpa [#allocation7], 1 }
 0x82f   :  { %4234 = vsyncpa [#allocation7 + $0x1], 1 }
 0x830   :  { %4235 = vsyncpa [#allocation16], 1 }
 0x831   :  { %4237 = vsyncpa [#allocation16 + $0x1], 1 }

</bundles_post_ra>
